<compile_context>
chip_gen: v7x
topology: tpu7x:2x2x1
jax: 0.10.0
libtpu: 0.0.40
codegen_flags: <defaults>
</compile_context>

<pallas_src>
import functools

import jax
import jax.numpy as jnp
from jax.experimental import pallas as pl
from jax.experimental.pallas import tpu as pltpu

LATENT_DIM = 64
H1, H2, H3, H4 = 128, 256, 512, 1024
OUT_DIM = 784
BN_EPS = 1e-5
LRELU_SLOPE = 0.2


def _leaky_relu(x):
    return jnp.where(x > 0, x, LRELU_SLOPE * x)


def _round_up(x, m):
    return (x + m - 1) // m * m


# --------------------------------------------------------------------------
# Kernels (one pallas_call per BN boundary; batch axis is the grid axis).
# --------------------------------------------------------------------------
def _write_stats(stats_ref, x_f32, *, batch, tile):
    """Write per-tile (sum, sum_sq) over the batch rows of this tile."""
    if batch % tile:  # padded rows exist -> mask them out of the statistics
        row0 = pl.program_id(0) * tile
        rows = row0 + jax.lax.broadcasted_iota(jnp.int32, x_f32.shape, 0)
        x_f32 = jnp.where(rows < batch, x_f32, 0.0)
    s = jnp.sum(x_f32, axis=0, keepdims=True)
    ss = jnp.sum(x_f32 * x_f32, axis=0, keepdims=True)
    stats_ref[...] = jnp.concatenate([s, ss], axis=0)[None]


def stage_in_kernel(z_ref, w1_ref, b1_ref, w2_ref, h_ref, stats_ref, *,
                    batch, tile):
    # Linear1 + LeakyReLU + Linear2 (no bias: cancelled by BN mean-sub).
    h1 = jnp.dot(z_ref[...], w1_ref[...],
                 preferred_element_type=jnp.float32) + b1_ref[...]
    h1 = _leaky_relu(h1)
    h2 = jnp.dot(h1.astype(jnp.bfloat16), w2_ref[...],
                 preferred_element_type=jnp.float32)
    h2_bf = h2.astype(jnp.bfloat16)
    h_ref[...] = h2_bf
    _write_stats(stats_ref, h2_bf.astype(jnp.float32), batch=batch, tile=tile)


def stage_mid_kernel(h_in_ref, scale_ref, shift_ref, w_ref, h_ref, stats_ref,
                     *, batch, tile):
    # BN (fused scale/shift) + LeakyReLU + next Linear (no bias).
    x = h_in_ref[...].astype(jnp.float32) * scale_ref[...] + shift_ref[...]
    x = _leaky_relu(x)
    h = jnp.dot(x.astype(jnp.bfloat16), w_ref[...],
                preferred_element_type=jnp.float32)
    h_bf = h.astype(jnp.bfloat16)
    h_ref[...] = h_bf
    _write_stats(stats_ref, h_bf.astype(jnp.float32), batch=batch, tile=tile)


def stage_out_kernel(h_in_ref, scale_ref, shift_ref, w5_ref, b5_ref, out_ref):
    # BN + LeakyReLU + final Linear + Tanh, bf16 output.
    x = h_in_ref[...].astype(jnp.float32) * scale_ref[...] + shift_ref[...]
    x = _leaky_relu(x)
    y = jnp.dot(x.astype(jnp.bfloat16), w5_ref[...],
                preferred_element_type=jnp.float32) + b5_ref[...]
    out_ref[...] = jnp.tanh(y).astype(out_ref.dtype)


# --------------------------------------------------------------------------
# pallas_call wrappers
# --------------------------------------------------------------------------
def _const_spec(shape):
    nd = len(shape)
    return pl.BlockSpec(shape, lambda i, _nd=nd: (0,) * _nd)


def _tile_spec(tile, feat):
    return pl.BlockSpec((tile, feat), lambda i: (i, 0))


_PARAMS_PAR = pltpu.CompilerParams(dimension_semantics=("parallel",))


def _call_stage_in(z, w1, b1, w2, *, batch, tile, n_tiles):
    kernel = functools.partial(stage_in_kernel, batch=batch, tile=tile)
    return pl.pallas_call(
        kernel,
        grid=(n_tiles,),
        in_specs=[_tile_spec(tile, LATENT_DIM),
                  _const_spec((LATENT_DIM, H1)),
                  _const_spec((1, H1)),
                  _const_spec((H1, H2))],
        out_specs=(_tile_spec(tile, H2),
                   pl.BlockSpec((1, 2, H2), lambda i: (i, 0, 0))),
        out_shape=(jax.ShapeDtypeStruct((n_tiles * tile, H2), jnp.bfloat16),
                   jax.ShapeDtypeStruct((n_tiles, 2, H2), jnp.float32)),
        compiler_params=_PARAMS_PAR,
    )(z, w1, b1, w2)


def _call_stage_mid(h_in, scale, shift, w, *, feat_in, feat_out, batch, tile,
                    n_tiles):
    kernel = functools.partial(stage_mid_kernel, batch=batch, tile=tile)
    return pl.pallas_call(
        kernel,
        grid=(n_tiles,),
        in_specs=[_tile_spec(tile, feat_in),
                  _const_spec((1, feat_in)),
                  _const_spec((1, feat_in)),
                  _const_spec((feat_in, feat_out))],
        out_specs=(_tile_spec(tile, feat_out),
                   pl.BlockSpec((1, 2, feat_out), lambda i: (i, 0, 0))),
        out_shape=(jax.ShapeDtypeStruct((n_tiles * tile, feat_out),
                                        jnp.bfloat16),
                   jax.ShapeDtypeStruct((n_tiles, 2, feat_out), jnp.float32)),
        compiler_params=_PARAMS_PAR,
    )(h_in, scale, shift, w)


def _call_stage_out(h_in, scale, shift, w5, b5, *, tile, n_tiles):
    return pl.pallas_call(
        stage_out_kernel,
        grid=(n_tiles,),
        in_specs=[_tile_spec(tile, H4),
                  _const_spec((1, H4)),
                  _const_spec((1, H4)),
                  _const_spec((H4, OUT_DIM)),
                  _const_spec((1, OUT_DIM))],
        out_specs=_tile_spec(tile, OUT_DIM),
        out_shape=jax.ShapeDtypeStruct((n_tiles * tile, OUT_DIM),
                                       jnp.bfloat16),
        compiler_params=_PARAMS_PAR,
    )(h_in, scale, shift, w5, b5)


def _bn_scale_shift(stats, gamma, beta, batch):
    """Reduce per-tile (sum, sum_sq) -> fused per-feature (scale, shift)."""
    s = jnp.sum(stats, axis=0)                       # [2, F]
    mean = s[0] / batch
    var = jnp.maximum(s[1] / batch - mean * mean, 0.0)   # biased variance
    scale = gamma * jax.lax.rsqrt(var + BN_EPS)
    shift = beta - mean * scale
    return scale[None, :], shift[None, :]


@jax.jit
def generator_forward(z, params):
    (w1, b1, w2, g2, be2, w3, g3, be3, w4, g4, be4, w5, b5) = params
    B = z.shape[0]
    # TODO(synk): TB=128 is enough to fill the v5e 128-wide MXU; keep 256 here.
    TB = 256 if B >= 256 else _round_up(max(B, 8), 8)
    Bp = _round_up(B, TB)
    n_tiles = Bp // TB

    zb = z.astype(jnp.bfloat16)
    if Bp != B:
        zb = jnp.pad(zb, ((0, Bp - B), (0, 0)))

    h2, st2 = _call_stage_in(zb, w1, b1, w2, batch=B, tile=TB,
                             n_tiles=n_tiles)
    sc2, sh2 = _bn_scale_shift(st2, g2, be2, B)

    h3, st3 = _call_stage_mid(h2, sc2, sh2, w3, feat_in=H2, feat_out=H3,
                              batch=B, tile=TB, n_tiles=n_tiles)
    sc3, sh3 = _bn_scale_shift(st3, g3, be3, B)

    h4, st4 = _call_stage_mid(h3, sc3, sh3, w4, feat_in=H3, feat_out=H4,
                              batch=B, tile=TB, n_tiles=n_tiles)
    sc4, sh4 = _bn_scale_shift(st4, g4, be4, B)

    out = _call_stage_out(h4, sc4, sh4, w5, b5, tile=TB, n_tiles=n_tiles)
    if Bp != B:
        out = out[:B]
    return out


# --------------------------------------------------------------------------
# Parameters & pure-JAX reference
# --------------------------------------------------------------------------
def init_params(key):
    """Deterministic init mirroring nn.Linear / fresh nn.BatchNorm1d."""
    dims = [LATENT_DIM, H1, H2, H3, H4, OUT_DIM]
    keys = jax.random.split(key, 5)
    ws, bs = [], []
    for i, (din, dout) in enumerate(zip(dims[:-1], dims[1:])):
        kw, kb = jax.random.split(keys[i])
        bound = 1.0 / jnp.sqrt(float(din))
        ws.append(jax.random.uniform(kw, (din, dout), jnp.float32,
                                     -bound, bound))
        bs.append(jax.random.uniform(kb, (dout,), jnp.float32, -bound, bound))

    # bf16 weight streaming (halves HBM traffic on this bandwidth-bound path).
    w1, w2, w3, w4, w5 = (w.astype(jnp.bfloat16) for w in ws)
    # Biases of layers feeding a BatchNorm (2-4) are cancelled exactly by the
    # BN mean subtraction in training mode -> only b1 and b5 are kept.
    b1 = bs[0][None, :]
    b5 = bs[4][None, :]
    g2, be2 = jnp.ones((H2,), jnp.float32), jnp.zeros((H2,), jnp.float32)
    g3, be3 = jnp.ones((H3,), jnp.float32), jnp.zeros((H3,), jnp.float32)
    g4, be4 = jnp.ones((H4,), jnp.float32), jnp.zeros((H4,), jnp.float32)
    return (w1, b1, w2, g2, be2, w3, g3, be3, w4, g4, be4, w5, b5)


def generator_reference(z, params):
    """Pure-JAX reference mirroring the kernel's math (bf16 weights/acts)."""
    (w1, b1, w2, g2, be2, w3, g3, be3, w4, g4, be4, w5, b5) = params

    def dot(a, w):
        return jnp.dot(a.astype(jnp.bfloat16), w,
                       preferred_element_type=jnp.float32)

    def lrelu(x):
        return jnp.where(x > 0, x, LRELU_SLOPE * x)

    def bn(h_bf16, g, be):
        x = h_bf16.astype(jnp.float32)
        mean = jnp.mean(x, axis=0)
        var = jnp.maximum(jnp.mean(x * x, axis=0) - mean * mean, 0.0)
        scale = g * jax.lax.rsqrt(var + BN_EPS)
        shift = be - mean * scale
        return x * scale[None, :] + shift[None, :]

    h = lrelu(dot(z, w1) + b1)
    h = lrelu(bn(dot(h, w2).astype(jnp.bfloat16), g2, be2))
    h = lrelu(bn(dot(h, w3).astype(jnp.bfloat16), g3, be3))
    h = lrelu(bn(dot(h, w4).astype(jnp.bfloat16), g4, be4))
    return jnp.tanh(dot(h, w5) + b5)


if __name__ == "__main__":
    key = jax.random.PRNGKey(0)
    kp, kz = jax.random.split(key)
    params = init_params(kp)

    B = 8
    z = jax.random.normal(kz, (B, LATENT_DIM), jnp.float32)

    out = generator_forward(z, params)
    out = jax.block_until_ready(out)

    ref = generator_reference(z, params)
    assert out.shape == (B, OUT_DIM), out.shape
    assert out.dtype == jnp.bfloat16
    assert jnp.allclose(out.astype(jnp.float32), ref, atol=2e-2, rtol=2e-2), \
        "mismatch vs reference"

    print("KERNEL_OK")
</pallas_src>

<mosaic_0001>
module attributes {stable_mosaic.version = 11 : i64} {
  func.func @stage_in_kernel(%arg0: i32, %arg1: memref<8x64xbf16, #tpu.memory_space<vmem>>, %arg2: memref<64x128xbf16, #tpu.memory_space<vmem>>, %arg3: memref<1x128xf32, #tpu.memory_space<vmem>>, %arg4: memref<128x256xbf16, #tpu.memory_space<vmem>>, %arg5: memref<8x256xbf16, #tpu.memory_space<vmem>>, %arg6: memref<1x2x256xf32, #tpu.memory_space<vmem>>) attributes {dimension_semantics = [#tpu.dimension_semantics<parallel>], iteration_bounds = array<i64: 1>, scalar_prefetch = 0 : i64, scratch_operands = 0 : i64, tpu.core_type = #tpu.core_type<tc>, window_params = [{transform_indices = @transform_0, window_bounds = array<i64: 8, 64>}, {pipeline_mode = #tpu.pipeline_mode<synchronous>, transform_indices = @transform_1, window_bounds = array<i64: 64, 128>}, {pipeline_mode = #tpu.pipeline_mode<synchronous>, transform_indices = @transform_2, window_bounds = array<i64: 1, 128>}, {pipeline_mode = #tpu.pipeline_mode<synchronous>, transform_indices = @transform_3, window_bounds = array<i64: 128, 256>}, {transform_indices = @transform_4, window_bounds = array<i64: 8, 256>}, {transform_indices = @transform_5, window_bounds = array<i64: 1, 2, 256>}]} {
    %c0 = arith.constant 0 : index
    %c0_0 = arith.constant 0 : index
    %0 = vector.load %arg1[%c0, %c0_0] : memref<8x64xbf16, #tpu.memory_space<vmem>>, vector<8x64xbf16>
    %c0_1 = arith.constant 0 : index
    %c0_2 = arith.constant 0 : index
    %1 = vector.load %arg2[%c0_1, %c0_2] : memref<64x128xbf16, #tpu.memory_space<vmem>>, vector<64x128xbf16>
    %cst = arith.constant dense<0.000000e+00> : vector<8x128xf32>
    %2 = tpu.matmul %0, %1, %cst {dimension_numbers = #tpu.dot_dimension_numbers<[1], [0], [0], [1], [0, 0, 1, 1], [], []>} : vector<8x64xbf16>, vector<64x128xbf16>, vector<8x128xf32> -> vector<8x128xf32>
    %c0_3 = arith.constant 0 : index
    %c0_4 = arith.constant 0 : index
    %3 = vector.load %arg3[%c0_3, %c0_4] : memref<1x128xf32, #tpu.memory_space<vmem>>, vector<1x128xf32>
    %4 = vector.broadcast %3 : vector<1x128xf32> to vector<8x128xf32>
    %5 = arith.addf %2, %4 : vector<8x128xf32>
    %cst_5 = arith.constant 0.000000e+00 : f32
    %6 = vector.broadcast %cst_5 : f32 to vector<8x128xf32>
    %7 = arith.cmpf ogt, %5, %6 : vector<8x128xf32>
    %cst_6 = arith.constant 2.000000e-01 : f32
    %8 = vector.broadcast %cst_6 : f32 to vector<8x128xf32>
    %9 = arith.mulf %8, %5 : vector<8x128xf32>
    %10 = arith.select %7, %5, %9 : vector<8x128xi1>, vector<8x128xf32>
    %11 = arith.truncf %10 : vector<8x128xf32> to vector<8x128xbf16>
    %c0_7 = arith.constant 0 : index
    %c0_8 = arith.constant 0 : index
    %12 = vector.load %arg4[%c0_7, %c0_8] : memref<128x256xbf16, #tpu.memory_space<vmem>>, vector<128x256xbf16>
    %cst_9 = arith.constant dense<0.000000e+00> : vector<8x256xf32>
    %13 = tpu.matmul %11, %12, %cst_9 {dimension_numbers = #tpu.dot_dimension_numbers<[1], [0], [0], [1], [0, 0, 1, 1], [], []>} : vector<8x128xbf16>, vector<128x256xbf16>, vector<8x256xf32> -> vector<8x256xf32>
    %14 = arith.truncf %13 : vector<8x256xf32> to vector<8x256xbf16>
    %c0_10 = arith.constant 0 : index
    %c0_11 = arith.constant 0 : index
    %15 = vector.load %arg5[%c0_10, %c0_11] : memref<8x256xbf16, #tpu.memory_space<vmem>>, vector<8x256xbf16>
    tpu.vector_store %arg5[%c0_10, %c0_11], %14 {strides = array<i32>} : memref<8x256xbf16, #tpu.memory_space<vmem>>, vector<8x256xbf16>,
    %16 = arith.extf %14 : vector<8x256xbf16> to vector<8x256xf32>
    %cst_12 = arith.constant dense<0.000000e+00> : vector<256xf32>
    %17 = vector.multi_reduction <add>, %16, %cst_12 [0] : vector<8x256xf32> to vector<256xf32>
    %18 = vector.shape_cast %17 : vector<256xf32> to vector<1x256xf32>
    %19 = arith.mulf %16, %16 : vector<8x256xf32>
    %cst_13 = arith.constant dense<0.000000e+00> : vector<256xf32>
    %20 = vector.multi_reduction <add>, %19, %cst_13 [0] : vector<8x256xf32> to vector<256xf32>
    %21 = vector.shape_cast %20 : vector<256xf32> to vector<1x256xf32>
    %22 = tpu.concatenate %18, %21 in 0 : vector<1x256xf32>, vector<1x256xf32> -> vector<2x256xf32>
    %23 = vector.shape_cast %22 : vector<2x256xf32> to vector<1x2x256xf32>
    %c0_14 = arith.constant 0 : index
    %c0_15 = arith.constant 0 : index
    %c0_16 = arith.constant 0 : index
    %24 = vector.load %arg6[%c0_14, %c0_15, %c0_16] : memref<1x2x256xf32, #tpu.memory_space<vmem>>, vector<1x2x256xf32>
    tpu.vector_store %arg6[%c0_14, %c0_15, %c0_16], %23 {strides = array<i32>} : memref<1x2x256xf32, #tpu.memory_space<vmem>>, vector<1x2x256xf32>,
    return
  }
  func.func @transform_0(%arg0: i32) -> (i32, i32) {
    %c0_i32 = arith.constant 0 : i32
    %c0_i32_0 = arith.constant 0 : i32
    return %arg0, %c0_i32 : i32, i32
  }
  func.func @transform_1(%arg0: i32) -> (i32, i32) {
    %c0_i32 = arith.constant 0 : i32
    %c0_i32_0 = arith.constant 0 : i32
    %c0_i32_1 = arith.constant 0 : i32
    return %c0_i32, %c0_i32_0 : i32, i32
  }
  func.func @transform_2(%arg0: i32) -> (i32, i32) {
    %c0_i32 = arith.constant 0 : i32
    %c0_i32_0 = arith.constant 0 : i32
    %c0_i32_1 = arith.constant 0 : i32
    return %c0_i32, %c0_i32_0 : i32, i32
  }
  func.func @transform_3(%arg0: i32) -> (i32, i32) {
    %c0_i32 = arith.constant 0 : i32
    %c0_i32_0 = arith.constant 0 : i32
    %c0_i32_1 = arith.constant 0 : i32
    return %c0_i32, %c0_i32_0 : i32, i32
  }
  func.func @transform_4(%arg0: i32) -> (i32, i32) {
    %c0_i32 = arith.constant 0 : i32
    %c0_i32_0 = arith.constant 0 : i32
    return %arg0, %c0_i32 : i32, i32
  }
  func.func @transform_5(%arg0: i32) -> (i32, i32, i32) {
    %c0_i32 = arith.constant 0 : i32
    %c0_i32_0 = arith.constant 0 : i32
    %c0_i32_1 = arith.constant 0 : i32
    return %arg0, %c0_i32, %c0_i32_0 : i32, i32, i32
  }
}

module attributes {stable_mosaic.version = 11 : i64} {
  func.func @stage_mid_kernel(%arg0: i32, %arg1: memref<8x256xbf16, #tpu.memory_space<vmem>>, %arg2: memref<1x256xf32, #tpu.memory_space<vmem>>, %arg3: memref<1x256xf32, #tpu.memory_space<vmem>>, %arg4: memref<256x512xbf16, #tpu.memory_space<vmem>>, %arg5: memref<8x512xbf16, #tpu.memory_space<vmem>>, %arg6: memref<1x2x512xf32, #tpu.memory_space<vmem>>) attributes {dimension_semantics = [#tpu.dimension_semantics<parallel>], iteration_bounds = array<i64: 1>, scalar_prefetch = 0 : i64, scratch_operands = 0 : i64, tpu.core_type = #tpu.core_type<tc>, window_params = [{transform_indices = @transform_0, window_bounds = array<i64: 8, 256>}, {pipeline_mode = #tpu.pipeline_mode<synchronous>, transform_indices = @transform_1, window_bounds = array<i64: 1, 256>}, {pipeline_mode = #tpu.pipeline_mode<synchronous>, transform_indices = @transform_2, window_bounds = array<i64: 1, 256>}, {pipeline_mode = #tpu.pipeline_mode<synchronous>, transform_indices = @transform_3, window_bounds = array<i64: 256, 512>}, {transform_indices = @transform_4, window_bounds = array<i64: 8, 512>}, {transform_indices = @transform_5, window_bounds = array<i64: 1, 2, 512>}]} {
    %c0 = arith.constant 0 : index
    %c0_0 = arith.constant 0 : index
    %0 = vector.load %arg1[%c0, %c0_0] : memref<8x256xbf16, #tpu.memory_space<vmem>>, vector<8x256xbf16>
    %1 = arith.extf %0 : vector<8x256xbf16> to vector<8x256xf32>
    %c0_1 = arith.constant 0 : index
    %c0_2 = arith.constant 0 : index
    %2 = vector.load %arg2[%c0_1, %c0_2] : memref<1x256xf32, #tpu.memory_space<vmem>>, vector<1x256xf32>
    %3 = vector.broadcast %2 : vector<1x256xf32> to vector<8x256xf32>
    %4 = arith.mulf %1, %3 : vector<8x256xf32>
    %c0_3 = arith.constant 0 : index
    %c0_4 = arith.constant 0 : index
    %5 = vector.load %arg3[%c0_3, %c0_4] : memref<1x256xf32, #tpu.memory_space<vmem>>, vector<1x256xf32>
    %6 = vector.broadcast %5 : vector<1x256xf32> to vector<8x256xf32>
    %7 = arith.addf %4, %6 : vector<8x256xf32>
    %cst = arith.constant 0.000000e+00 : f32
    %8 = vector.broadcast %cst : f32 to vector<8x256xf32>
    %9 = arith.cmpf ogt, %7, %8 : vector<8x256xf32>
    %cst_5 = arith.constant 2.000000e-01 : f32
    %10 = vector.broadcast %cst_5 : f32 to vector<8x256xf32>
    %11 = arith.mulf %10, %7 : vector<8x256xf32>
    %12 = arith.select %9, %7, %11 : vector<8x256xi1>, vector<8x256xf32>
    %13 = arith.truncf %12 : vector<8x256xf32> to vector<8x256xbf16>
    %c0_6 = arith.constant 0 : index
    %c0_7 = arith.constant 0 : index
    %14 = vector.load %arg4[%c0_6, %c0_7] : memref<256x512xbf16, #tpu.memory_space<vmem>>, vector<256x512xbf16>
    %cst_8 = arith.constant dense<0.000000e+00> : vector<8x512xf32>
    %15 = tpu.matmul %13, %14, %cst_8 {dimension_numbers = #tpu.dot_dimension_numbers<[1], [0], [0], [1], [0, 0, 1, 1], [], []>} : vector<8x256xbf16>, vector<256x512xbf16>, vector<8x512xf32> -> vector<8x512xf32>
    %16 = arith.truncf %15 : vector<8x512xf32> to vector<8x512xbf16>
    %c0_9 = arith.constant 0 : index
    %c0_10 = arith.constant 0 : index
    %17 = vector.load %arg5[%c0_9, %c0_10] : memref<8x512xbf16, #tpu.memory_space<vmem>>, vector<8x512xbf16>
    tpu.vector_store %arg5[%c0_9, %c0_10], %16 {strides = array<i32>} : memref<8x512xbf16, #tpu.memory_space<vmem>>, vector<8x512xbf16>,
    %18 = arith.extf %16 : vector<8x512xbf16> to vector<8x512xf32>
    %cst_11 = arith.constant dense<0.000000e+00> : vector<512xf32>
    %19 = vector.multi_reduction <add>, %18, %cst_11 [0] : vector<8x512xf32> to vector<512xf32>
    %20 = vector.shape_cast %19 : vector<512xf32> to vector<1x512xf32>
    %21 = arith.mulf %18, %18 : vector<8x512xf32>
    %cst_12 = arith.constant dense<0.000000e+00> : vector<512xf32>
    %22 = vector.multi_reduction <add>, %21, %cst_12 [0] : vector<8x512xf32> to vector<512xf32>
    %23 = vector.shape_cast %22 : vector<512xf32> to vector<1x512xf32>
    %24 = tpu.concatenate %20, %23 in 0 : vector<1x512xf32>, vector<1x512xf32> -> vector<2x512xf32>
    %25 = vector.shape_cast %24 : vector<2x512xf32> to vector<1x2x512xf32>
    %c0_13 = arith.constant 0 : index
    %c0_14 = arith.constant 0 : index
    %c0_15 = arith.constant 0 : index
    %26 = vector.load %arg6[%c0_13, %c0_14, %c0_15] : memref<1x2x512xf32, #tpu.memory_space<vmem>>, vector<1x2x512xf32>
    tpu.vector_store %arg6[%c0_13, %c0_14, %c0_15], %25 {strides = array<i32>} : memref<1x2x512xf32, #tpu.memory_space<vmem>>, vector<1x2x512xf32>,
    return
  }
  func.func @transform_0(%arg0: i32) -> (i32, i32) {
    %c0_i32 = arith.constant 0 : i32
    %c0_i32_0 = arith.constant 0 : i32
    return %arg0, %c0_i32 : i32, i32
  }
  func.func @transform_1(%arg0: i32) -> (i32, i32) {
    %c0_i32 = arith.constant 0 : i32
    %c0_i32_0 = arith.constant 0 : i32
    %c0_i32_1 = arith.constant 0 : i32
    return %c0_i32, %c0_i32_0 : i32, i32
  }
  func.func @transform_2(%arg0: i32) -> (i32, i32) {
    %c0_i32 = arith.constant 0 : i32
    %c0_i32_0 = arith.constant 0 : i32
    %c0_i32_1 = arith.constant 0 : i32
    return %c0_i32, %c0_i32_0 : i32, i32
  }
  func.func @transform_3(%arg0: i32) -> (i32, i32) {
    %c0_i32 = arith.constant 0 : i32
    %c0_i32_0 = arith.constant 0 : i32
    %c0_i32_1 = arith.constant 0 : i32
    return %c0_i32, %c0_i32_0 : i32, i32
  }
  func.func @transform_4(%arg0: i32) -> (i32, i32) {
    %c0_i32 = arith.constant 0 : i32
    %c0_i32_0 = arith.constant 0 : i32
    return %arg0, %c0_i32 : i32, i32
  }
  func.func @transform_5(%arg0: i32) -> (i32, i32, i32) {
    %c0_i32 = arith.constant 0 : i32
    %c0_i32_0 = arith.constant 0 : i32
    %c0_i32_1 = arith.constant 0 : i32
    return %arg0, %c0_i32, %c0_i32_0 : i32, i32, i32
  }
}

module attributes {stable_mosaic.version = 11 : i64} {
  func.func @stage_mid_kernel(%arg0: i32, %arg1: memref<8x512xbf16, #tpu.memory_space<vmem>>, %arg2: memref<1x512xf32, #tpu.memory_space<vmem>>, %arg3: memref<1x512xf32, #tpu.memory_space<vmem>>, %arg4: memref<512x1024xbf16, #tpu.memory_space<vmem>>, %arg5: memref<8x1024xbf16, #tpu.memory_space<vmem>>, %arg6: memref<1x2x1024xf32, #tpu.memory_space<vmem>>) attributes {dimension_semantics = [#tpu.dimension_semantics<parallel>], iteration_bounds = array<i64: 1>, scalar_prefetch = 0 : i64, scratch_operands = 0 : i64, tpu.core_type = #tpu.core_type<tc>, window_params = [{transform_indices = @transform_0, window_bounds = array<i64: 8, 512>}, {pipeline_mode = #tpu.pipeline_mode<synchronous>, transform_indices = @transform_1, window_bounds = array<i64: 1, 512>}, {pipeline_mode = #tpu.pipeline_mode<synchronous>, transform_indices = @transform_2, window_bounds = array<i64: 1, 512>}, {pipeline_mode = #tpu.pipeline_mode<synchronous>, transform_indices = @transform_3, window_bounds = array<i64: 512, 1024>}, {transform_indices = @transform_4, window_bounds = array<i64: 8, 1024>}, {transform_indices = @transform_5, window_bounds = array<i64: 1, 2, 1024>}]} {
    %c0 = arith.constant 0 : index
    %c0_0 = arith.constant 0 : index
    %0 = vector.load %arg1[%c0, %c0_0] : memref<8x512xbf16, #tpu.memory_space<vmem>>, vector<8x512xbf16>
    %1 = arith.extf %0 : vector<8x512xbf16> to vector<8x512xf32>
    %c0_1 = arith.constant 0 : index
    %c0_2 = arith.constant 0 : index
    %2 = vector.load %arg2[%c0_1, %c0_2] : memref<1x512xf32, #tpu.memory_space<vmem>>, vector<1x512xf32>
    %3 = vector.broadcast %2 : vector<1x512xf32> to vector<8x512xf32>
    %4 = arith.mulf %1, %3 : vector<8x512xf32>
    %c0_3 = arith.constant 0 : index
    %c0_4 = arith.constant 0 : index
    %5 = vector.load %arg3[%c0_3, %c0_4] : memref<1x512xf32, #tpu.memory_space<vmem>>, vector<1x512xf32>
    %6 = vector.broadcast %5 : vector<1x512xf32> to vector<8x512xf32>
    %7 = arith.addf %4, %6 : vector<8x512xf32>
    %cst = arith.constant 0.000000e+00 : f32
    %8 = vector.broadcast %cst : f32 to vector<8x512xf32>
    %9 = arith.cmpf ogt, %7, %8 : vector<8x512xf32>
    %cst_5 = arith.constant 2.000000e-01 : f32
    %10 = vector.broadcast %cst_5 : f32 to vector<8x512xf32>
    %11 = arith.mulf %10, %7 : vector<8x512xf32>
    %12 = arith.select %9, %7, %11 : vector<8x512xi1>, vector<8x512xf32>
    %13 = arith.truncf %12 : vector<8x512xf32> to vector<8x512xbf16>
    %c0_6 = arith.constant 0 : index
    %c0_7 = arith.constant 0 : index
    %14 = vector.load %arg4[%c0_6, %c0_7] : memref<512x1024xbf16, #tpu.memory_space<vmem>>, vector<512x1024xbf16>
    %cst_8 = arith.constant dense<0.000000e+00> : vector<8x1024xf32>
    %15 = tpu.matmul %13, %14, %cst_8 {dimension_numbers = #tpu.dot_dimension_numbers<[1], [0], [0], [1], [0, 0, 1, 1], [], []>} : vector<8x512xbf16>, vector<512x1024xbf16>, vector<8x1024xf32> -> vector<8x1024xf32>
    %16 = arith.truncf %15 : vector<8x1024xf32> to vector<8x1024xbf16>
    %c0_9 = arith.constant 0 : index
    %c0_10 = arith.constant 0 : index
    %17 = vector.load %arg5[%c0_9, %c0_10] : memref<8x1024xbf16, #tpu.memory_space<vmem>>, vector<8x1024xbf16>
    tpu.vector_store %arg5[%c0_9, %c0_10], %16 {strides = array<i32>} : memref<8x1024xbf16, #tpu.memory_space<vmem>>, vector<8x1024xbf16>,
    %18 = arith.extf %16 : vector<8x1024xbf16> to vector<8x1024xf32>
    %cst_11 = arith.constant dense<0.000000e+00> : vector<1024xf32>
    %19 = vector.multi_reduction <add>, %18, %cst_11 [0] : vector<8x1024xf32> to vector<1024xf32>
    %20 = vector.shape_cast %19 : vector<1024xf32> to vector<1x1024xf32>
    %21 = arith.mulf %18, %18 : vector<8x1024xf32>
    %cst_12 = arith.constant dense<0.000000e+00> : vector<1024xf32>
    %22 = vector.multi_reduction <add>, %21, %cst_12 [0] : vector<8x1024xf32> to vector<1024xf32>
    %23 = vector.shape_cast %22 : vector<1024xf32> to vector<1x1024xf32>
    %24 = tpu.concatenate %20, %23 in 0 : vector<1x1024xf32>, vector<1x1024xf32> -> vector<2x1024xf32>
    %25 = vector.shape_cast %24 : vector<2x1024xf32> to vector<1x2x1024xf32>
    %c0_13 = arith.constant 0 : index
    %c0_14 = arith.constant 0 : index
    %c0_15 = arith.constant 0 : index
    %26 = vector.load %arg6[%c0_13, %c0_14, %c0_15] : memref<1x2x1024xf32, #tpu.memory_space<vmem>>, vector<1x2x1024xf32>
    tpu.vector_store %arg6[%c0_13, %c0_14, %c0_15], %25 {strides = array<i32>} : memref<1x2x1024xf32, #tpu.memory_space<vmem>>, vector<1x2x1024xf32>,
    return
  }
  func.func @transform_0(%arg0: i32) -> (i32, i32) {
    %c0_i32 = arith.constant 0 : i32
    %c0_i32_0 = arith.constant 0 : i32
    return %arg0, %c0_i32 : i32, i32
  }
  func.func @transform_1(%arg0: i32) -> (i32, i32) {
    %c0_i32 = arith.constant 0 : i32
    %c0_i32_0 = arith.constant 0 : i32
    %c0_i32_1 = arith.constant 0 : i32
    return %c0_i32, %c0_i32_0 : i32, i32
  }
  func.func @transform_2(%arg0: i32) -> (i32, i32) {
    %c0_i32 = arith.constant 0 : i32
    %c0_i32_0 = arith.constant 0 : i32
    %c0_i32_1 = arith.constant 0 : i32
    return %c0_i32, %c0_i32_0 : i32, i32
  }
  func.func @transform_3(%arg0: i32) -> (i32, i32) {
    %c0_i32 = arith.constant 0 : i32
    %c0_i32_0 = arith.constant 0 : i32
    %c0_i32_1 = arith.constant 0 : i32
    return %c0_i32, %c0_i32_0 : i32, i32
  }
  func.func @transform_4(%arg0: i32) -> (i32, i32) {
    %c0_i32 = arith.constant 0 : i32
    %c0_i32_0 = arith.constant 0 : i32
    return %arg0, %c0_i32 : i32, i32
  }
  func.func @transform_5(%arg0: i32) -> (i32, i32, i32) {
    %c0_i32 = arith.constant 0 : i32
    %c0_i32_0 = arith.constant 0 : i32
    %c0_i32_1 = arith.constant 0 : i32
    return %arg0, %c0_i32, %c0_i32_0 : i32, i32, i32
  }
}

module attributes {stable_mosaic.version = 11 : i64} {
  func.func @stage_out_kernel(%arg0: i32, %arg1: memref<8x1024xbf16, #tpu.memory_space<vmem>>, %arg2: memref<1x1024xf32, #tpu.memory_space<vmem>>, %arg3: memref<1x1024xf32, #tpu.memory_space<vmem>>, %arg4: memref<1024x784xbf16, #tpu.memory_space<vmem>>, %arg5: memref<1x784xf32, #tpu.memory_space<vmem>>, %arg6: memref<8x784xbf16, #tpu.memory_space<vmem>>) attributes {dimension_semantics = [#tpu.dimension_semantics<parallel>], iteration_bounds = array<i64: 1>, scalar_prefetch = 0 : i64, scratch_operands = 0 : i64, tpu.core_type = #tpu.core_type<tc>, window_params = [{transform_indices = @transform_0, window_bounds = array<i64: 8, 1024>}, {pipeline_mode = #tpu.pipeline_mode<synchronous>, transform_indices = @transform_1, window_bounds = array<i64: 1, 1024>}, {pipeline_mode = #tpu.pipeline_mode<synchronous>, transform_indices = @transform_2, window_bounds = array<i64: 1, 1024>}, {pipeline_mode = #tpu.pipeline_mode<synchronous>, transform_indices = @transform_3, window_bounds = array<i64: 1024, 784>}, {pipeline_mode = #tpu.pipeline_mode<synchronous>, transform_indices = @transform_4, window_bounds = array<i64: 1, 784>}, {transform_indices = @transform_5, window_bounds = array<i64: 8, 784>}]} {
    %c0 = arith.constant 0 : index
    %c0_0 = arith.constant 0 : index
    %0 = vector.load %arg1[%c0, %c0_0] : memref<8x1024xbf16, #tpu.memory_space<vmem>>, vector<8x1024xbf16>
    %1 = arith.extf %0 : vector<8x1024xbf16> to vector<8x1024xf32>
    %c0_1 = arith.constant 0 : index
    %c0_2 = arith.constant 0 : index
    %2 = vector.load %arg2[%c0_1, %c0_2] : memref<1x1024xf32, #tpu.memory_space<vmem>>, vector<1x1024xf32>
    %3 = vector.broadcast %2 : vector<1x1024xf32> to vector<8x1024xf32>
    %4 = arith.mulf %1, %3 : vector<8x1024xf32>
    %c0_3 = arith.constant 0 : index
    %c0_4 = arith.constant 0 : index
    %5 = vector.load %arg3[%c0_3, %c0_4] : memref<1x1024xf32, #tpu.memory_space<vmem>>, vector<1x1024xf32>
    %6 = vector.broadcast %5 : vector<1x1024xf32> to vector<8x1024xf32>
    %7 = arith.addf %4, %6 : vector<8x1024xf32>
    %cst = arith.constant 0.000000e+00 : f32
    %8 = vector.broadcast %cst : f32 to vector<8x1024xf32>
    %9 = arith.cmpf ogt, %7, %8 : vector<8x1024xf32>
    %cst_5 = arith.constant 2.000000e-01 : f32
    %10 = vector.broadcast %cst_5 : f32 to vector<8x1024xf32>
    %11 = arith.mulf %10, %7 : vector<8x1024xf32>
    %12 = arith.select %9, %7, %11 : vector<8x1024xi1>, vector<8x1024xf32>
    %13 = arith.truncf %12 : vector<8x1024xf32> to vector<8x1024xbf16>
    %c0_6 = arith.constant 0 : index
    %c0_7 = arith.constant 0 : index
    %14 = vector.load %arg4[%c0_6, %c0_7] : memref<1024x784xbf16, #tpu.memory_space<vmem>>, vector<1024x784xbf16>
    %cst_8 = arith.constant dense<0.000000e+00> : vector<8x784xf32>
    %15 = tpu.matmul %13, %14, %cst_8 {dimension_numbers = #tpu.dot_dimension_numbers<[1], [0], [0], [1], [0, 0, 1, 1], [], []>} : vector<8x1024xbf16>, vector<1024x784xbf16>, vector<8x784xf32> -> vector<8x784xf32>
    %c0_9 = arith.constant 0 : index
    %c0_10 = arith.constant 0 : index
    %16 = vector.load %arg5[%c0_9, %c0_10] : memref<1x784xf32, #tpu.memory_space<vmem>>, vector<1x784xf32>
    %17 = vector.broadcast %16 : vector<1x784xf32> to vector<8x784xf32>
    %18 = arith.addf %15, %17 : vector<8x784xf32>
    %19 = math.tanh %18 : vector<8x784xf32>
    %20 = arith.truncf %19 : vector<8x784xf32> to vector<8x784xbf16>
    %c0_11 = arith.constant 0 : index
    %c0_12 = arith.constant 0 : index
    %21 = vector.load %arg6[%c0_11, %c0_12] : memref<8x784xbf16, #tpu.memory_space<vmem>>, vector<8x784xbf16>
    tpu.vector_store %arg6[%c0_11, %c0_12], %20 {strides = array<i32>} : memref<8x784xbf16, #tpu.memory_space<vmem>>, vector<8x784xbf16>,
    return
  }
  func.func @transform_0(%arg0: i32) -> (i32, i32) {
    %c0_i32 = arith.constant 0 : i32
    %c0_i32_0 = arith.constant 0 : i32
    return %arg0, %c0_i32 : i32, i32
  }
  func.func @transform_1(%arg0: i32) -> (i32, i32) {
    %c0_i32 = arith.constant 0 : i32
    %c0_i32_0 = arith.constant 0 : i32
    %c0_i32_1 = arith.constant 0 : i32
    return %c0_i32, %c0_i32_0 : i32, i32
  }
  func.func @transform_2(%arg0: i32) -> (i32, i32) {
    %c0_i32 = arith.constant 0 : i32
    %c0_i32_0 = arith.constant 0 : i32
    %c0_i32_1 = arith.constant 0 : i32
    return %c0_i32, %c0_i32_0 : i32, i32
  }
  func.func @transform_3(%arg0: i32) -> (i32, i32) {
    %c0_i32 = arith.constant 0 : i32
    %c0_i32_0 = arith.constant 0 : i32
    %c0_i32_1 = arith.constant 0 : i32
    return %c0_i32, %c0_i32_0 : i32, i32
  }
  func.func @transform_4(%arg0: i32) -> (i32, i32) {
    %c0_i32 = arith.constant 0 : i32
    %c0_i32_0 = arith.constant 0 : i32
    %c0_i32_1 = arith.constant 0 : i32
    return %c0_i32, %c0_i32_0 : i32, i32
  }
  func.func @transform_5(%arg0: i32) -> (i32, i32) {
    %c0_i32 = arith.constant 0 : i32
    %c0_i32_0 = arith.constant 0 : i32
    return %arg0, %c0_i32 : i32, i32
  }
}

</mosaic_0001>

<bundles_post_ra>
// kernel: generator_forward.4
= control target key start
LH: loop header
LB: loop body
LE: loop exit
PB: predicated region body
PF: predicated region fallthrough
CT: control target
= control target key end

     0   :  { %11 = vsyncpa [#allocation3], 0  ;;  %s588_s0 = inlined_call_operand.vmem [shape: bf16[8,64], index: 0, kind: input, shape index: {}]   ;;  %s589_s1 = inlined_call_operand.hbm [shape: bf16[64,128], index: 1, kind: input, shape index: {}]   ;;  %s590_s2 = inlined_call_operand.hbm [shape: f32[1,128], index: 2, kind: input, shape index: {}]   ;;  %s591_s3 = inlined_call_operand.hbm [shape: bf16[128,256], index: 3, kind: input, shape index: {}]   ;;  %s592_s4 = inlined_call_operand.vmem [shape: bf16[8,256], index: 4, kind: output, shape index: {0}]   ;;  %s593_s5 = inlined_call_operand.vmem [shape: f32[1,2,256], index: 5, kind: output, shape index: {1}]  }
   0x1   :  { %12 = vsyncpa [#allocation5], 0  ;;  %s496_s18 = smov [#allocation4]   ;;  %s497_s20 = smov [#allocation2]  }
   0x2   :  { %s33_s19 = sshll.u32 %s496_s18, 4  ;;  %s20_s21 = sshll.u32 %s497_s20, 4  ;;  %s34_s19 = int_to_ptr.vmem [resolvable:$true] %s33_s19  ;;  %s536_s21 = int_to_ptr.vmem [resolvable:$true] %s20_s21 }
   0x3   :  { %s426_s24 = scalar_lea.hbm %s590_s2, 16 }
   0x4   :  { %p427_p0 = scmp.ne.s32.totalorder %s590_s2, %s426_s24  ;;  %p430_p1 = scmp.lt.u32.totalorder %s426_s24, %s590_s2 }
   0x6   :  { %p432_p2 = pnand %p430_p1, %p427_p0 }
   0x8   :  { %435 = shalt.err (!%p432_p2)
}
   0x9   :  { %s436_s29 = scalar_lea.vmem %s34_s19, 16  ;;  %s440_s30 = scalar_lea.vmem %s34_s19, 32 }
   0xa   :  { %p437_p3 = scmp.ne.s32.totalorder %s34_s19, %s436_s29  ;;  %p441_p4 = scmp.lt.s32.totalorder %s34_s19, %s34_s19 }
   0xb   :  { %p442_p5 = scmp.lt.s32.totalorder %s440_s30, %s436_s29 }
   0xd   :  { %p443_p6 = por %p442_p5, %p441_p4 }
   0xf   :  { %p444_p7 = pnand %p443_p6, %p437_p3 }
  0x11   :  { %447 = shalt.err (!%p444_p7)
}
  0x12   :  { %36 = dma.hbm_to_vmem [thread:$0]  %s590_s2, 16, %s34_s19, [#allocation5]  }
  0x13   :  { %s448_s10 = scalar_lea.hbm %s589_s1, 512 }
  0x14   :  { %p449_p8 = scmp.ne.s32.totalorder %s589_s1, %s448_s10  ;;  %p452_p9 = scmp.lt.u32.totalorder %s448_s10, %s589_s1 }
  0x16   :  { %p454_p10 = pnand %p452_p9, %p449_p8 }
  0x18   :  { %457 = shalt.err (!%p454_p10)
}
  0x19   :  { %s458_s15 = scalar_lea.vmem %s536_s21, 512  ;;  %p463_p12 = scmp.lt.s32.totalorder %s536_s21, %s536_s21 }
  0x1a   :  { %p459_p11 = scmp.ne.s32.totalorder %s536_s21, %s458_s15  ;;  %p464_p13 = scmp.lt.s32.totalorder %s458_s15, %s458_s15 }
  0x1c   :  { %p465_p0 = por %p464_p13, %p463_p12 }
  0x1e   :  { %p466_p1 = pnand %p465_p0, %p459_p11 }
  0x20   :  { %469 = shalt.err (!%p466_p1)
}
  0x21   :  { %s498_s2 = smov 64   ;;  %s499_s16 = smov 4  }
  0x22   :  { %26 = dma.hbm_to_vmem [thread:$0]  %s589_s1, 512, %s536_s21, [#allocation3], %s498_s2, %s498_s2, %s499_s16  }
  0x23   :  { %s500_s19 = smov [#allocation6]   ;;  %s470_s24 = scalar_lea.hbm %s591_s3, 2048 }
  0x24   :  { %s42_s20 = sshll.u32 %s500_s19, 4  ;;  %p471_p2 = scmp.ne.s32.totalorder %s591_s3, %s470_s24  ;;  %s43_s20 = int_to_ptr.vmem [resolvable:$true] %s42_s20 }
  0x25   :  { %p474_p3 = scmp.lt.u32.totalorder %s470_s24, %s591_s3 }
  0x27   :  { %p476_p4 = pnand %p474_p3, %p471_p2 }
  0x29   :  { %479 = shalt.err (!%p476_p4)
}
  0x2a   :  { %s480_s29 = scalar_lea.vmem %s43_s20, 2048  ;;  %p485_p6 = scmp.lt.s32.totalorder %s43_s20, %s43_s20 }
  0x2b   :  { %p481_p5 = scmp.ne.s32.totalorder %s43_s20, %s480_s29  ;;  %p486_p7 = scmp.lt.s32.totalorder %s480_s29, %s480_s29 }
  0x2d   :  { %p487_p8 = por %p486_p7, %p485_p6 }
  0x2f   :  { %p488_p9 = pnand %p487_p8, %p481_p5 }
  0x31   :  { %491 = shalt.err (!%p488_p9)
}
  0x32   :  { %s501_s1 = smov 128   ;;  %s502_s21 = smov 8  }
  0x33   :  { %48 = dma.hbm_to_vmem [thread:$0]  %s591_s3, 2048, %s43_s20, [#allocation5], %s501_s1, %s501_s1, %s502_s21  }
  0x34   :  { %492 = dma.done.wait [#allocation3], 512  }
  0x35   :  { %493 = vsyncadd [#allocation3], 4294966784 }
  0x36   :  { %494 = dma.done.wait [#allocation5], 2064  }
  0x37   :  { %495 = vsyncadd [#allocation5], 4294965232  ;;  %v503_v0 = vmov 0.0   ;;  %vm504_vm0 = vmmov 0   ;;  %v398_v1 = vld [vmem:[#allocation2] sm:$0xff]   ;;  %v399_v2 = vld [vmem:[#allocation2 + $0x8] sm:$0xff]  }
  0x38   :  { %376 = vmatprep.subr.bf16.mxu0 %v503_v0  ;;  %384 = vmatprep.mubr.msk.bf16.mxu0 %vm504_vm0, %v503_v0  ;;  %v402_v3 = vld [vmem:[#allocation6 + $0x4] ss:$8 sps:$4 sm:$0xff]   ;;  %v404_v4 = vld [vmem:[#allocation6] ss:$8 sps:$4 sm:$0xff]   ;;  %v405_v6 = vld [vmem:[#allocation6 + $0x14] ss:$8 sps:$4 sm:$0xff]  }
  0x39   :  { %377 = vmatpush3.bf16.msra.mxu0 %v398_v1  ;;  %v400_v5 = vld [vmem:[#allocation2 + $0x10] sm:$0xff]   ;;  %243 = vmatprep.subr.bf16.mxu1 %v402_v3  ;;  %v401_v9 = vld [vmem:[#allocation2 + $0x18] sm:$0xff]   ;;  %v410_v10 = vld [vmem:[#allocation6 + $0x20] ss:$8 sps:$4 sm:$0xff]   ;;  %vm99_vm1 = vcmask 523264   ;;  %v505_v22 = vmov 0  }
  0x3a   :  { %378 = vmatprep.subr.bf16.mxu0 %v503_v0  ;;  %244 = vmatpush1.bf16.msra.mxu1 %v404_v4  ;;  %v407_v7 = vld [vmem:[#allocation6 + $0x10] ss:$8 sps:$4 sm:$0xff]   ;;  %v408_v8 = vld [vmem:[#allocation6 + $0x24] ss:$8 sps:$4 sm:$0xff]   ;;  %v411_v11 = vld [vmem:[#allocation6 + $0x34] ss:$8 sps:$4 sm:$0xff]  }
  0x3b   :  { %245 = vmatprep.subr.bf16.mxu1 %v405_v6  ;;  %v59_v12 = vld [vmem:[%s588_s0] sm:$0xf]  ;;  %v413_v13 = vld [vmem:[#allocation6 + $0x30] ss:$8 sps:$4 sm:$0xff]   ;;  %v414_v14 = vld [vmem:[#allocation6 + $0x44] ss:$8 sps:$4 sm:$0xff]   ;;  %275 = vmatprep.mubr.bf16.mxu1 %v505_v22 }
  0x3c   :  { %v416_v15 = vld [vmem:[#allocation6 + $0x40] ss:$8 sps:$4 sm:$0xff]   ;;  %v417_v16 = vld [vmem:[#allocation6 + $0x54] ss:$8 sps:$4 sm:$0xff]   ;;  %v419_v17 = vld [vmem:[#allocation6 + $0x50] ss:$8 sps:$4 sm:$0xff]  }
  0x3d   :  { %379 = vmatpush3.bf16.msra.mxu0 %v399_v2  ;;  %v420_v18 = vld [vmem:[#allocation6 + $0x64] ss:$8 sps:$4 sm:$0xff]   ;;  %v422_v19 = vld [vmem:[#allocation6 + $0x60] ss:$8 sps:$4 sm:$0xff]   ;;  %v423_v20 = vld [vmem:[#allocation6 + $0x74] ss:$8 sps:$4 sm:$0xff]  }
  0x3e   :  { %380 = vmatprep.subr.bf16.mxu0 %v503_v0  ;;  %246 = vmatpush1.bf16.msra.mxu1 %v407_v7  ;;  %v425_v21 = vld [vmem:[#allocation6 + $0x70] ss:$8 sps:$4 sm:$0xff]   ;;  %v346_v23 = vld [vmem:[#allocation4] ss:$0 sm:$0xff]  ;;  %vm321_vm3 = vcmask 1040384  }
  0x3f   :  { %247 = vmatprep.subr.bf16.mxu1 %v408_v8 }
  0x41   :  { %381 = vmatpush3.bf16.msra.mxu0 %v400_v5 }
  0x42   :  { %382 = vmatprep.subr.bf16.mxu0 %v503_v0  ;;  %248 = vmatpush1.bf16.msra.mxu1 %v410_v10 }
  0x43   :  { %249 = vmatprep.subr.bf16.mxu1 %v411_v11 }
  0x45   :  { %383 = vmatpush3.bf16.msra.mxu0 %v401_v9 }
  0x46   :  { %250 = vmatpush1.bf16.msra.mxu1 %v413_v13 }
  0x47   :  { %251 = vmatprep.subr.bf16.mxu1 %v414_v14 }
  0x48   :  { %385 = vmatmul.mubr.msk.bf16.vlgmr.msra.gmra.mrb[0].mxu0 %vm99_vm1, %v59_v12 }
  0x4a   :  { %252 = vmatpush1.bf16.msra.mxu1 %v416_v15 }
  0x4b   :  { %253 = vmatprep.subr.bf16.mxu1 %v417_v16 }
  0x4e   :  { %254 = vmatpush1.bf16.msra.mxu1 %v419_v17 }
  0x4f   :  { %255 = vmatprep.subr.bf16.mxu1 %v420_v18 }
  0x52   :  { %256 = vmatpush1.bf16.msra.mxu1 %v422_v19 }
  0x53   :  { %257 = vmatprep.subr.bf16.mxu1 %v423_v20 }
  0x56   :  { %258 = vmatpush1.bf16.msra.mxu1 %v425_v21 }
 0x11b   :  { %v137_v24 = vpop.f32.mrb[0].mxu0 }
 0x11c   :  { %v138_v25 = vadd.f32 %v346_v23, %v137_v24  ;;  %v386_v26 = vpop.f32.mrb[1].mxu0 }
 0x11d   :  { %v140_v27 = vpop.f32.mrb[2].mxu0 }
 0x11e   :  { %vm143_vm2 = vcmp.gt.f32.partialorder %v138_v25, 0.0  ;;  %v144_v28 = vmul.f32 0.2, %v138_v25  ;;  %v387_v29 = vpop.f32.mrb[3].mxu0 }
 0x120   :  { %v145_v30 = vsel %vm143_vm2, %v138_v25, %v144_v28 }
 0x121   :  { %v146_v31 = vpack.c.bf16 %v145_v30, %v145_v30 }
 0x123   :  { %276 = vmatmul.mubr.bf16.vlgmr.msra.gmra.mrb[0].mxu1 %v146_v31 }
 0x1f6   :  { %v277_v32 = vpop.f32.mrb[0].mxu1 }
 0x1f7   :  { %v284_v33 = vpack.c.bf16 %v277_v32, %v277_v32  ;;  %v279_v34 = vpop.f32.mrb[1].mxu1 }
 0x1f8   :  { %v285_v35 = vpack.c.bf16 %v279_v34, %v279_v34  ;;  %v370_v36 = vpack.c.bf16 %v279_v34, %v277_v32  ;;  %v281_v37 = vpop.f32.mrb[2].mxu1 }
 0x1f9   :  { %v293_v38 = vunpack.c.l.bf16 %v284_v33  ;;  %v282_v39 = vpop.f32.mrb[3].mxu1 }
 0x1fa   :  { %292 = vst [vmem:[%s592_s4] sm:$0xff] %v370_v36  ;;  %v294_v40 = vunpack.c.l.bf16 %v285_v35 }
 0x1fb   :  { %v295_v41 = vrot.slane %v293_v38, 4  ;;  %v307_v42 = vmul.f32 %v293_v38, %v293_v38 }
 0x1fc   :  { %v301_v43 = vrot.slane %v294_v40, 4  ;;  %v308_v44 = vmul.f32 %v294_v40, %v294_v40 }
 0x1fd   :  { %v296_v45 = vadd.f32 %v295_v41, %v293_v38  ;;  %v309_v46 = vrot.slane %v307_v42, 4 }
 0x1fe   :  { %v302_v47 = vadd.f32 %v301_v43, %v294_v40  ;;  %v315_v48 = vrot.slane %v308_v44, 4 }
 0x1ff   :  { %v297_v49 = vrot.slane %v296_v45, 2  ;;  %v310_v50 = vadd.f32 %v309_v46, %v307_v42 }
 0x200   :  { %v303_v51 = vrot.slane %v302_v47, 2  ;;  %v316_v52 = vadd.f32 %v315_v48, %v308_v44 }
 0x201   :  { %v298_v53 = vadd.f32 %v297_v49, %v296_v45  ;;  %v311_v54 = vrot.slane %v310_v50, 2 }
 0x202   :  { %v304_v55 = vadd.f32 %v303_v51, %v302_v47  ;;  %v317_v56 = vrot.slane %v316_v52, 2 }
 0x203   :  { %v299_v57 = vrot.slane %v298_v53, 1  ;;  %v312_v58 = vadd.f32 %v311_v54, %v310_v50 }
 0x204   :  { %v305_v59 = vrot.slane %v304_v55, 1  ;;  %v318_v60 = vadd.f32 %v317_v56, %v316_v52 }
 0x205   :  { %v313_v61 = vrot.slane %v312_v58, 1  ;;  %v300_v63 = vadd.f32 %v299_v57, %v298_v53 }
 0x206   :  { %v319_v62 = vrot.slane %v318_v60, 1  ;;  %v306_v1 = vadd.f32 %v305_v59, %v304_v55 }
 0x207   :  { %v314_v0 = vadd.f32 %v313_v61, %v312_v58 }
 0x208   :  { %v320_v2 = vadd.f32 %v319_v62, %v318_v60 }
 0x209   :  { %v322_v3 = vsel %vm321_vm3, %v300_v63, %v314_v0 }
 0x20a   :  { %v323_v4 = vsel %vm321_vm3, %v306_v1, %v320_v2 }
 0x20b   :  { %v326_v5 = vcombine.low %v322_v3, %v323_v4 }
 0x20d   :  { %369 = vst.sshfl [vmem:[%s593_s5] sm:$0x33 pattern:$0x76325410] %v326_v5 }
 0x20e   :  { %344 = vsyncpa [#allocation3], 1 }
 0x20f   :  { %345 = vsyncpa [#allocation5], 1 }

// kernel: generator_forward.5
= control target key start
LH: loop header
LB: loop body
LE: loop exit
PB: predicated region body
PF: predicated region fallthrough
CT: control target
= control target key end

     0   :  { %11 = vsyncpa [#allocation3], 0  ;;  %s841_s18 = smov [#allocation2]   ;;  %s910_s0 = inlined_call_operand.vmem [shape: bf16[8,256], index: 0, kind: input, shape index: {}]   ;;  %s911_s1 = inlined_call_operand.vmem [shape: f32[1,256], index: 1, kind: input, shape index: {}]   ;;  %s912_s2 = inlined_call_operand.vmem [shape: f32[1,256], index: 2, kind: input, shape index: {}]   ;;  %s913_s3 = inlined_call_operand.hbm [shape: bf16[256,512], index: 3, kind: input, shape index: {}]   ;;  %s914_s4 = inlined_call_operand.vmem [shape: bf16[8,512], index: 4, kind: output, shape index: {0}]   ;;  %s915_s5 = inlined_call_operand.vmem [shape: f32[1,2,512], index: 5, kind: output, shape index: {1}]  }
   0x1   :  { %s23_s19 = sshll.u32 %s841_s18, 4  ;;  %s817_s22 = scalar_lea.hbm %s913_s3, 8192  ;;  %s24_s19 = int_to_ptr.vmem [resolvable:$true] %s23_s19 }
   0x2   :  { %p818_p0 = scmp.ne.s32.totalorder %s913_s3, %s817_s22  ;;  %p821_p1 = scmp.lt.u32.totalorder %s817_s22, %s913_s3 }
   0x4   :  { %p823_p2 = pnand %p821_p1, %p818_p0 }
   0x6   :  { %826 = shalt.err (!%p823_p2)
}
   0x7   :  { %s827_s27 = scalar_lea.vmem %s24_s19, 8192  ;;  %p832_p4 = scmp.lt.s32.totalorder %s24_s19, %s24_s19 }
   0x8   :  { %p828_p3 = scmp.ne.s32.totalorder %s24_s19, %s827_s27  ;;  %p833_p5 = scmp.lt.s32.totalorder %s827_s27, %s827_s27 }
   0xa   :  { %p834_p6 = por %p833_p5, %p832_p4 }
   0xc   :  { %p835_p7 = pnand %p834_p6, %p828_p3 }
   0xe   :  { %838 = shalt.err (!%p835_p7)
}
   0xf   :  { %s842_s28 = smov 256   ;;  %s843_s29 = smov 16  }
  0x10   :  { %29 = dma.hbm_to_vmem [thread:$0]  %s913_s3, 8192, %s24_s19, [#allocation3], %s842_s28, %s842_s28, %s843_s29  }
  0x11   :  { %839 = dma.done.wait [#allocation3], 8192  }
  0x12   :  { %840 = vsyncadd [#allocation3], 4294959104  ;;  %v721_v0 = vld [vmem:[#allocation2 + $0x4] ss:$16 sps:$4 sm:$0xff]   ;;  %v723_v1 = vld [vmem:[#allocation2 + $0xc] ss:$16 sps:$4 sm:$0xff]   ;;  %v38_v37 = vlaneseq }
  0x13   :  { %456 = vmatprep.subr.bf16.mxu0 %v721_v0  ;;  %v725_v2 = vld [vmem:[#allocation2] ss:$16 sps:$4 sm:$0xff]   ;;  %v726_v3 = vld [vmem:[#allocation2 + $0x8] ss:$16 sps:$4 sm:$0xff]   ;;  %497 = vmatprep.subr.bf16.mxu1 %v723_v1  ;;  %v727_v4 = vld [vmem:[#allocation2 + $0x24] ss:$16 sps:$4 sm:$0xff]  }
  0x14   :  { %457 = vmatpush1.bf16.msra.mxu0 %v725_v2  ;;  %498 = vmatpush1.bf16.msra.mxu1 %v726_v3  ;;  %v729_v5 = vld [vmem:[#allocation2 + $0x2c] ss:$16 sps:$4 sm:$0xff]   ;;  %v731_v6 = vld [vmem:[#allocation2 + $0x20] ss:$16 sps:$4 sm:$0xff]   ;;  %v732_v7 = vld [vmem:[#allocation2 + $0x28] ss:$16 sps:$4 sm:$0xff]  }
  0x15   :  { %458 = vmatprep.subr.bf16.mxu0 %v727_v4  ;;  %499 = vmatprep.subr.bf16.mxu1 %v729_v5  ;;  %v733_v8 = vld [vmem:[#allocation2 + $0x44] ss:$16 sps:$4 sm:$0xff]   ;;  %v735_v9 = vld [vmem:[#allocation2 + $0x4c] ss:$16 sps:$4 sm:$0xff]   ;;  %v737_v10 = vld [vmem:[#allocation2 + $0x40] ss:$16 sps:$4 sm:$0xff]  }
  0x16   :  { %v738_v11 = vld [vmem:[#allocation2 + $0x48] ss:$16 sps:$4 sm:$0xff]   ;;  %v739_v12 = vld [vmem:[#allocation2 + $0x64] ss:$16 sps:$4 sm:$0xff]   ;;  %v741_v13 = vld [vmem:[#allocation2 + $0x6c] ss:$16 sps:$4 sm:$0xff]  }
  0x17   :  { %v743_v14 = vld [vmem:[#allocation2 + $0x60] ss:$16 sps:$4 sm:$0xff]   ;;  %v744_v15 = vld [vmem:[#allocation2 + $0x68] ss:$16 sps:$4 sm:$0xff]   ;;  %v745_v16 = vld [vmem:[#allocation2 + $0x84] ss:$16 sps:$4 sm:$0xff]  }
  0x18   :  { %459 = vmatpush1.bf16.msra.mxu0 %v731_v6  ;;  %500 = vmatpush1.bf16.msra.mxu1 %v732_v7  ;;  %v747_v17 = vld [vmem:[#allocation2 + $0x8c] ss:$16 sps:$4 sm:$0xff]   ;;  %v749_v18 = vld [vmem:[#allocation2 + $0x80] ss:$16 sps:$4 sm:$0xff]   ;;  %v750_v19 = vld [vmem:[#allocation2 + $0x88] ss:$16 sps:$4 sm:$0xff]  }
  0x19   :  { %460 = vmatprep.subr.bf16.mxu0 %v733_v8  ;;  %501 = vmatprep.subr.bf16.mxu1 %v735_v9  ;;  %v751_v20 = vld [vmem:[#allocation2 + $0xa4] ss:$16 sps:$4 sm:$0xff]   ;;  %v753_v21 = vld [vmem:[#allocation2 + $0xac] ss:$16 sps:$4 sm:$0xff]   ;;  %v755_v22 = vld [vmem:[#allocation2 + $0xa0] ss:$16 sps:$4 sm:$0xff]  }
  0x1a   :  { %v756_v23 = vld [vmem:[#allocation2 + $0xa8] ss:$16 sps:$4 sm:$0xff]   ;;  %v757_v24 = vld [vmem:[#allocation2 + $0xc4] ss:$16 sps:$4 sm:$0xff]   ;;  %v759_v25 = vld [vmem:[#allocation2 + $0xcc] ss:$16 sps:$4 sm:$0xff]  }
  0x1b   :  { %v761_v26 = vld [vmem:[#allocation2 + $0xc0] ss:$16 sps:$4 sm:$0xff]   ;;  %v762_v27 = vld [vmem:[#allocation2 + $0xc8] ss:$16 sps:$4 sm:$0xff]   ;;  %v763_v28 = vld [vmem:[#allocation2 + $0xe4] ss:$16 sps:$4 sm:$0xff]  }
  0x1c   :  { %461 = vmatpush1.bf16.msra.mxu0 %v737_v10  ;;  %502 = vmatpush1.bf16.msra.mxu1 %v738_v11  ;;  %v765_v29 = vld [vmem:[#allocation2 + $0xec] ss:$16 sps:$4 sm:$0xff]   ;;  %v767_v30 = vld [vmem:[#allocation2 + $0xe0] ss:$16 sps:$4 sm:$0xff]   ;;  %v768_v31 = vld [vmem:[#allocation2 + $0xe8] ss:$16 sps:$4 sm:$0xff]  }
  0x1d   :  { %462 = vmatprep.subr.bf16.mxu0 %v739_v12  ;;  %503 = vmatprep.subr.bf16.mxu1 %v741_v13  ;;  %v769_v32 = vld [vmem:[#allocation2 + $0x104] ss:$16 sps:$4 sm:$0xff]   ;;  %v771_v33 = vld [vmem:[#allocation2 + $0x10c] ss:$16 sps:$4 sm:$0xff]   ;;  %v773_v34 = vld [vmem:[#allocation2 + $0x100] ss:$16 sps:$4 sm:$0xff]  }
  0x1e   :  { %v774_v35 = vld [vmem:[#allocation2 + $0x108] ss:$16 sps:$4 sm:$0xff]   ;;  %v775_v36 = vld [vmem:[#allocation2 + $0x124] ss:$16 sps:$4 sm:$0xff]   ;;  %v777_v38 = vld [vmem:[#allocation2 + $0x12c] ss:$16 sps:$4 sm:$0xff]  }
  0x1f   :  { %v779_v39 = vld [vmem:[#allocation2 + $0x120] ss:$16 sps:$4 sm:$0xff]   ;;  %v780_v40 = vld [vmem:[#allocation2 + $0x128] ss:$16 sps:$4 sm:$0xff]   ;;  %v781_v41 = vld [vmem:[#allocation2 + $0x144] ss:$16 sps:$4 sm:$0xff]  }
  0x20   :  { %463 = vmatpush1.bf16.msra.mxu0 %v743_v14  ;;  %504 = vmatpush1.bf16.msra.mxu1 %v744_v15  ;;  %v887_v42 = vshrl.u32 %v38_v37, 7  ;;  %v783_v43 = vld [vmem:[#allocation2 + $0x14c] ss:$16 sps:$4 sm:$0xff]   ;;  %v785_v44 = vld [vmem:[#allocation2 + $0x140] ss:$16 sps:$4 sm:$0xff]   ;;  %vm612_vm2 = vcmask 1040384  }
  0x21   :  { %464 = vmatprep.subr.bf16.mxu0 %v745_v16  ;;  %505 = vmatprep.subr.bf16.mxu1 %v747_v17  ;;  %v786_v45 = vld [vmem:[#allocation2 + $0x148] ss:$16 sps:$4 sm:$0xff]   ;;  %v787_v46 = vld [vmem:[#allocation2 + $0x164] ss:$16 sps:$4 sm:$0xff]   ;;  %v789_v49 = vld [vmem:[#allocation2 + $0x16c] ss:$16 sps:$4 sm:$0xff]  }
  0x22   :  { %v40_v47 = vsub.s32 0, %v887_v42  ;;  %v44_v48 = vsub.s32 1, %v887_v42  ;;  %v33_v50 = vld [vmem:[%s910_s0] sm:$0xff]  ;;  %v792_v55 = vld [vmem:[#allocation2 + $0x168] ss:$16 sps:$4 sm:$0xff]  }
  0x23   :  { %v35_v51 = vunpack.c.h.bf16 %v33_v50  ;;  %v36_v52 = vld [vmem:[%s911_s1] sm:$0x3]  ;;  %v34_v56 = vunpack.c.l.bf16 %v33_v50  ;;  %v793_v59 = vld [vmem:[#allocation2 + $0x184] ss:$16 sps:$4 sm:$0xff]   ;;  %v795_v60 = vld [vmem:[#allocation2 + $0x18c] ss:$16 sps:$4 sm:$0xff]  }
  0x24   :  { %465 = vmatpush1.bf16.msra.mxu0 %v749_v18  ;;  %506 = vmatpush1.bf16.msra.mxu1 %v750_v19  ;;  %v50_v53 = vld [vmem:[%s912_s2] sm:$0x3]  ;;  %v41_v57 = vrot.slane %v36_v52, %v40_v47  ;;  %v45_v58 = vrot.slane %v36_v52, %v44_v48  ;;  %v798_v0 = vld [vmem:[#allocation2 + $0x188] ss:$16 sps:$4 sm:$0xff]   ;;  %v799_v4 = vld [vmem:[#allocation2 + $0x1a4] ss:$16 sps:$4 sm:$0xff]  }
  0x25   :  { %466 = vmatprep.subr.bf16.mxu0 %v751_v20  ;;  %507 = vmatprep.subr.bf16.mxu1 %v753_v21  ;;  %v791_v54 = vld [vmem:[#allocation2 + $0x160] ss:$16 sps:$4 sm:$0xff]   ;;  %v59_v61 = vrot.slane %v50_v53, %v44_v48  ;;  %v55_v1 = vrot.slane %v50_v53, %v40_v47  ;;  %v801_v5 = vld [vmem:[#allocation2 + $0x1ac] ss:$16 sps:$4 sm:$0xff]   ;;  %v804_v8 = vld [vmem:[#allocation2 + $0x1a8] ss:$16 sps:$4 sm:$0xff]  }
  0x26   :  { %v49_v62 = vmul.f32 %v45_v58, %v35_v51  ;;  %v797_v63 = vld [vmem:[#allocation2 + $0x180] ss:$16 sps:$4 sm:$0xff]   ;;  %v48_v3 = vmul.f32 %v41_v57, %v34_v56  ;;  %v805_v11 = vld [vmem:[#allocation2 + $0x1c4] ss:$16 sps:$4 sm:$0xff]   ;;  %v807_v12 = vld [vmem:[#allocation2 + $0x1cc] ss:$16 sps:$4 sm:$0xff]  }
  0x27   :  { %v803_v7 = vld [vmem:[#allocation2 + $0x1a0] ss:$16 sps:$4 sm:$0xff]   ;;  %v810_v15 = vld [vmem:[#allocation2 + $0x1c8] ss:$16 sps:$4 sm:$0xff]   ;;  %v811_v17 = vld [vmem:[#allocation2 + $0x1e4] ss:$16 sps:$4 sm:$0xff]  }
  0x28   :  { %467 = vmatpush1.bf16.msra.mxu0 %v755_v22  ;;  %508 = vmatpush1.bf16.msra.mxu1 %v756_v23  ;;  %v63_v2 = vadd.f32 %v59_v61, %v49_v62  ;;  %v62_v10 = vadd.f32 %v55_v1, %v48_v3  ;;  %v809_v14 = vld [vmem:[#allocation2 + $0x1c0] ss:$16 sps:$4 sm:$0xff]   ;;  %v813_v18 = vld [vmem:[#allocation2 + $0x1ec] ss:$16 sps:$4 sm:$0xff]   ;;  %v816_v20 = vld [vmem:[#allocation2 + $0x1e8] ss:$16 sps:$4 sm:$0xff]  }
  0x29   :  { %468 = vmatprep.subr.bf16.mxu0 %v757_v24  ;;  %509 = vmatprep.subr.bf16.mxu1 %v759_v25  ;;  %v815_v19 = vld [vmem:[#allocation2 + $0x1e0] ss:$16 sps:$4 sm:$0xff]  }
  0x2a   :  { %vm65_vm0 = vcmp.gt.f32.partialorder %v63_v2, 0.0  ;;  %v67_v6 = vmul.f32 0.2, %v63_v2  ;;  %v66_v16 = vmul.f32 0.2, %v62_v10  ;;  %vm64_vm1 = vcmp.gt.f32.partialorder %v62_v10, 0.0 }
  0x2c   :  { %469 = vmatpush1.bf16.msra.mxu0 %v761_v26  ;;  %510 = vmatpush1.bf16.msra.mxu1 %v762_v27  ;;  %v69_v9 = vsel %vm65_vm0, %v63_v2, %v67_v6  ;;  %v68_v21 = vsel %vm64_vm1, %v62_v10, %v66_v16 }
  0x2d   :  { %470 = vmatprep.subr.bf16.mxu0 %v763_v28  ;;  %511 = vmatprep.subr.bf16.mxu1 %v765_v29  ;;  %v71_v13 = vpack.c.bf16 %v69_v9, %v69_v9  ;;  %v70_v22 = vpack.c.bf16 %v68_v21, %v68_v21 }
  0x2f   :  { %488 = vmatprep.mubr.bf16.mxu0 %v71_v13  ;;  %529 = vmatprep.mubr.bf16.mxu1 %v71_v13 }
  0x30   :  { %471 = vmatpush1.bf16.msra.mxu0 %v767_v30  ;;  %512 = vmatpush1.bf16.msra.mxu1 %v768_v31 }
  0x31   :  { %472 = vmatprep.subr.bf16.mxu0 %v769_v32  ;;  %513 = vmatprep.subr.bf16.mxu1 %v771_v33 }
  0x34   :  { %473 = vmatpush1.bf16.msra.mxu0 %v773_v34  ;;  %514 = vmatpush1.bf16.msra.mxu1 %v774_v35 }
  0x35   :  { %474 = vmatprep.subr.bf16.mxu0 %v775_v36  ;;  %515 = vmatprep.subr.bf16.mxu1 %v777_v38 }
  0x38   :  { %475 = vmatpush1.bf16.msra.mxu0 %v779_v39  ;;  %516 = vmatpush1.bf16.msra.mxu1 %v780_v40  ;;  %v844_v39 = vmov 1983009808  }
  0x39   :  { %476 = vmatprep.subr.bf16.mxu0 %v781_v41  ;;  %517 = vmatprep.subr.bf16.mxu1 %v783_v43  ;;  %v624_v40 = vunpack.c.l.s4 %v844_v39 }
  0x3c   :  { %477 = vmatpush1.bf16.msra.mxu0 %v785_v44  ;;  %518 = vmatpush1.bf16.msra.mxu1 %v786_v45 }
  0x3d   :  { %478 = vmatprep.subr.bf16.mxu0 %v787_v46  ;;  %519 = vmatprep.subr.bf16.mxu1 %v789_v49 }
  0x40   :  { %479 = vmatpush1.bf16.msra.mxu0 %v791_v54  ;;  %520 = vmatpush1.bf16.msra.mxu1 %v792_v55 }
  0x41   :  { %480 = vmatprep.subr.bf16.mxu0 %v793_v59  ;;  %521 = vmatprep.subr.bf16.mxu1 %v795_v60 }
  0x44   :  { %481 = vmatpush1.bf16.msra.mxu0 %v797_v63  ;;  %522 = vmatpush1.bf16.msra.mxu1 %v798_v0 }
  0x45   :  { %482 = vmatprep.subr.bf16.mxu0 %v799_v4  ;;  %523 = vmatprep.subr.bf16.mxu1 %v801_v5 }
  0x48   :  { %483 = vmatpush1.bf16.msra.mxu0 %v803_v7  ;;  %524 = vmatpush1.bf16.msra.mxu1 %v804_v8 }
  0x49   :  { %484 = vmatprep.subr.bf16.mxu0 %v805_v11  ;;  %525 = vmatprep.subr.bf16.mxu1 %v807_v12 }
  0x4c   :  { %485 = vmatpush1.bf16.msra.mxu0 %v809_v14  ;;  %526 = vmatpush1.bf16.msra.mxu1 %v810_v15 }
  0x4d   :  { %486 = vmatprep.subr.bf16.mxu0 %v811_v17  ;;  %527 = vmatprep.subr.bf16.mxu1 %v813_v18 }
  0x50   :  { %487 = vmatpush1.bf16.msra.mxu0 %v815_v19  ;;  %528 = vmatpush1.bf16.msra.mxu1 %v816_v20  ;;  %v625_v20 = vunpack.c.0.s8 %v624_v40 }
  0x53   :  { %489 = vmatmul.mubr.bf16.vlgmr.msra.gmra.mrb[0].mxu0 %v70_v22  ;;  %530 = vmatmul.mubr.bf16.vlgmr.msra.gmra.mrb[0].mxu1 %v70_v22 }
 0x126   :  { %v490_v23 = vpop.f32.mrb[0].mxu0  ;;  %v531_v24 = vpop.f32.mrb[0].mxu1 }
 0x127   :  { %v538_v25 = vpack.c.bf16 %v490_v23, %v490_v23  ;;  %v540_v26 = vpack.c.bf16 %v531_v24, %v531_v24  ;;  %v492_v27 = vpop.f32.mrb[1].mxu0  ;;  %v533_v28 = vpop.f32.mrb[1].mxu1 }
 0x128   :  { %v539_v29 = vpack.c.bf16 %v492_v27, %v492_v27  ;;  %v715_v30 = vpack.c.bf16 %v492_v27, %v490_v23  ;;  %v541_v31 = vpack.c.bf16 %v533_v28, %v533_v28  ;;  %v716_v32 = vpack.c.bf16 %v533_v28, %v531_v24  ;;  %v494_v33 = vpop.f32.mrb[2].mxu0  ;;  %v535_v34 = vpop.f32.mrb[2].mxu1 }
 0x129   :  { %v556_v35 = vunpack.c.l.bf16 %v538_v25  ;;  %v558_v36 = vunpack.c.l.bf16 %v540_v26  ;;  %v495_v37 = vpop.f32.mrb[3].mxu0  ;;  %v536_v38 = vpop.f32.mrb[3].mxu1  ;;  %v628_v33 = vsub.s32 %v625_v20, %v887_v42 }
 0x12a   :  { %554 = vst [vmem:[%s914_s4] sm:$0xff] %v715_v30  ;;  %v557_v41 = vunpack.c.l.bf16 %v539_v29  ;;  %555 = vst [vmem:[%s914_s4 + $0x8] sm:$0xff] %v716_v32  ;;  %v559_v43 = vunpack.c.l.bf16 %v541_v31 }
 0x12b   :  { %v560_v44 = vrot.slane %v556_v35, 4  ;;  %v584_v45 = vmul.f32 %v556_v35, %v556_v35  ;;  %v572_v46 = vrot.slane %v558_v36, 4  ;;  %v586_v47 = vmul.f32 %v558_v36, %v558_v36 }
 0x12c   :  { %v566_v48 = vrot.slane %v557_v41, 4  ;;  %v585_v49 = vmul.f32 %v557_v41, %v557_v41  ;;  %v578_v50 = vrot.slane %v559_v43, 4  ;;  %v587_v51 = vmul.f32 %v559_v43, %v559_v43 }
 0x12d   :  { %v561_v52 = vadd.f32 %v560_v44, %v556_v35  ;;  %v588_v53 = vrot.slane %v584_v45, 4  ;;  %v573_v54 = vadd.f32 %v572_v46, %v558_v36  ;;  %v600_v55 = vrot.slane %v586_v47, 4 }
 0x12e   :  { %v567_v56 = vadd.f32 %v566_v48, %v557_v41  ;;  %v594_v57 = vrot.slane %v585_v49, 4  ;;  %v579_v58 = vadd.f32 %v578_v50, %v559_v43  ;;  %v606_v59 = vrot.slane %v587_v51, 4 }
 0x12f   :  { %v562_v60 = vrot.slane %v561_v52, 2  ;;  %v589_v61 = vadd.f32 %v588_v53, %v584_v45  ;;  %v574_v62 = vrot.slane %v573_v54, 2  ;;  %v601_v63 = vadd.f32 %v600_v55, %v586_v47 }
 0x130   :  { %v568_v0 = vrot.slane %v567_v56, 2  ;;  %v595_v1 = vadd.f32 %v594_v57, %v585_v49  ;;  %v580_v2 = vrot.slane %v579_v58, 2  ;;  %v607_v3 = vadd.f32 %v606_v59, %v587_v51 }
 0x131   :  { %v563_v4 = vadd.f32 %v562_v60, %v561_v52  ;;  %v590_v5 = vrot.slane %v589_v61, 2  ;;  %v575_v6 = vadd.f32 %v574_v62, %v573_v54  ;;  %v602_v7 = vrot.slane %v601_v63, 2 }
 0x132   :  { %v569_v8 = vadd.f32 %v568_v0, %v567_v56  ;;  %v596_v9 = vrot.slane %v595_v1, 2  ;;  %v581_v10 = vadd.f32 %v580_v2, %v579_v58  ;;  %v608_v11 = vrot.slane %v607_v3, 2 }
 0x133   :  { %v564_v12 = vrot.slane %v563_v4, 1  ;;  %v591_v13 = vadd.f32 %v590_v5, %v589_v61  ;;  %v576_v14 = vrot.slane %v575_v6, 1  ;;  %v603_v15 = vadd.f32 %v602_v7, %v601_v63 }
 0x134   :  { %v570_v16 = vrot.slane %v569_v8, 1  ;;  %v597_v17 = vadd.f32 %v596_v9, %v595_v1  ;;  %v582_v18 = vrot.slane %v581_v10, 1  ;;  %v609_v19 = vadd.f32 %v608_v11, %v607_v3 }
 0x135   :  { %v592_v21 = vrot.slane %v591_v13, 1  ;;  %v604_v22 = vrot.slane %v603_v15, 1  ;;  %v565_v25 = vadd.f32 %v564_v12, %v563_v4  ;;  %v577_v27 = vadd.f32 %v576_v14, %v575_v6 }
 0x136   :  { %v598_v23 = vrot.slane %v597_v17, 1  ;;  %v610_v24 = vrot.slane %v609_v19, 1  ;;  %v571_v29 = vadd.f32 %v570_v16, %v569_v8  ;;  %v583_v31 = vadd.f32 %v582_v18, %v581_v10 }
 0x137   :  { %v593_v26 = vadd.f32 %v592_v21, %v591_v13  ;;  %v605_v28 = vadd.f32 %v604_v22, %v603_v15 }
 0x138   :  { %v599_v30 = vadd.f32 %v598_v23, %v597_v17  ;;  %v611_v32 = vadd.f32 %v610_v24, %v609_v19 }
 0x139   :  { %v613_v34 = vsel %vm612_vm2, %v565_v25, %v593_v26  ;;  %v615_v35 = vsel %vm612_vm2, %v577_v27, %v605_v28 }
 0x13a   :  { %v614_v36 = vsel %vm612_vm2, %v571_v29, %v599_v30  ;;  %v616_v37 = vsel %vm612_vm2, %v583_v31, %v611_v32 }
 0x13b   :  { %v621_v38 = vcombine.low %v613_v34, %v614_v36  ;;  %v622_v39 = vcombine.low %v615_v35, %v616_v37 }
 0x13d   :  { %v629_v40 = vrot.slane %v621_v38, %v628_v33  ;;  %v636_v41 = vrot.slane %v622_v39, %v628_v33 }
 0x13f   :  { %v637_v43 = vcombine.low %v629_v40, %v636_v41 }
 0x141   :  { %639 = vst [vmem:[%s915_s5] sm:$0xff] %v637_v43 }
 0x142   :  { %648 = vsyncpa [#allocation3], 1 }

// kernel: generator_forward.6
= control target key start
LH: loop header
LB: loop body
LE: loop exit
PB: predicated region body
PF: predicated region fallthrough
CT: control target
= control target key end

     0   :  { %11 = vsyncpa [#allocation3], 0  ;;  %s2491_s18 = smov [#allocation2]   ;;  %s2633_s0 = inlined_call_operand.vmem [shape: bf16[8,512], index: 0, kind: input, shape index: {}]   ;;  %s2634_s1 = inlined_call_operand.vmem [shape: f32[1,512], index: 1, kind: input, shape index: {}]   ;;  %s2635_s2 = inlined_call_operand.vmem [shape: f32[1,512], index: 2, kind: input, shape index: {}]   ;;  %s2636_s3 = inlined_call_operand.hbm [shape: bf16[512,1024], index: 3, kind: input, shape index: {}]   ;;  %s2637_s4 = inlined_call_operand.vmem [shape: bf16[8,1024], index: 4, kind: output, shape index: {0}]   ;;  %s2638_s5 = inlined_call_operand.vmem [shape: f32[1,2,1024], index: 5, kind: output, shape index: {1}]  }
   0x1   :  { %s23_s19 = sshll.u32 %s2491_s18, 4  ;;  %s2467_s22 = scalar_lea.hbm %s2636_s3, 32768  ;;  %s24_s19 = int_to_ptr.vmem [resolvable:$true] %s23_s19 }
   0x2   :  { %p2468_p0 = scmp.ne.s32.totalorder %s2636_s3, %s2467_s22  ;;  %p2471_p1 = scmp.lt.u32.totalorder %s2467_s22, %s2636_s3 }
   0x4   :  { %p2473_p2 = pnand %p2471_p1, %p2468_p0 }
   0x6   :  { %2476 = shalt.err (!%p2473_p2)
}
   0x7   :  { %s2477_s27 = scalar_lea.vmem %s24_s19, 32768  ;;  %p2482_p4 = scmp.lt.s32.totalorder %s24_s19, %s24_s19 }
   0x8   :  { %p2478_p3 = scmp.ne.s32.totalorder %s24_s19, %s2477_s27  ;;  %p2483_p5 = scmp.lt.s32.totalorder %s2477_s27, %s2477_s27 }
   0xa   :  { %p2484_p6 = por %p2483_p5, %p2482_p4 }
   0xc   :  { %p2485_p7 = pnand %p2484_p6, %p2478_p3 }
   0xe   :  { %2488 = shalt.err (!%p2485_p7)
}
   0xf   :  { %s2492_s28 = smov 512   ;;  %s2493_s29 = smov 32  }
  0x10   :  { %29 = dma.hbm_to_vmem [thread:$0]  %s2636_s3, 32768, %s24_s19, [#allocation3], %s2492_s28, %s2492_s28, %s2493_s29  }
  0x11   :  { %2489 = dma.done.wait [#allocation3], 32768  }
  0x12   :  { %2490 = vsyncadd [#allocation3], 4294934528  ;;  %v107_v0 = vld [vmem:[#allocation2] sm:$0xff]  ;;  %v108_v2 = vld [vmem:[#allocation2 + $0x8] sm:$0xff]  ;;  %v41_v32 = vlaneseq  ;;  %vm2119_vm4 = vcmask 1040384  }
  0x13   :  { %v111_v1 = vld [vmem:[#allocation2 + $0x20] sm:$0xff]  ;;  %v112_v4 = vld [vmem:[#allocation2 + $0x28] sm:$0xff] }
  0x14   :  { %v2184_v3 = vcombine.high %v107_v0, %v111_v1  ;;  %v2183_v5 = vcombine.low %v107_v0, %v111_v1  ;;  %v115_v6 = vld [vmem:[#allocation2 + $0x40] sm:$0xff]  ;;  %v2186_v8 = vcombine.high %v108_v2, %v112_v4  ;;  %v2185_v9 = vcombine.low %v108_v2, %v112_v4  ;;  %v116_v11 = vld [vmem:[#allocation2 + $0x48] sm:$0xff] }
  0x15   :  { %v119_v7 = vld [vmem:[#allocation2 + $0x60] sm:$0xff]  ;;  %v120_v12 = vld [vmem:[#allocation2 + $0x68] sm:$0xff]  ;;  %v2537_v41 = vshrl.u32 %v41_v32, 7 }
  0x16   :  { %v2192_v10 = vcombine.high %v115_v6, %v119_v7  ;;  %v123_v13 = vld [vmem:[#allocation2 + $0x80] sm:$0xff]  ;;  %1643 = vmatprep.subr.bf16.mxu0 %v2184_v3  ;;  %v2194_v14 = vcombine.high %v116_v11, %v120_v12  ;;  %v124_v16 = vld [vmem:[#allocation2 + $0x88] sm:$0xff]  ;;  %1725 = vmatprep.subr.bf16.mxu1 %v2186_v8  ;;  %v2191_v18 = vcombine.low %v115_v6, %v119_v7 }
  0x17   :  { %v127_v15 = vld [vmem:[#allocation2 + $0xa0] sm:$0xff]  ;;  %v128_v17 = vld [vmem:[#allocation2 + $0xa8] sm:$0xff]  ;;  %1644 = vmatpush1.bf16.msra.mxu0 %v2183_v5  ;;  %1726 = vmatpush1.bf16.msra.mxu1 %v2185_v9  ;;  %v2193_v19 = vcombine.low %v116_v11, %v120_v12  ;;  %v47_v50 = vsub.s32 1, %v2537_v41 }
  0x18   :  { %1645 = vmatprep.subr.bf16.mxu0 %v2192_v10  ;;  %v2200_v20 = vcombine.high %v123_v13, %v127_v15  ;;  %1727 = vmatprep.subr.bf16.mxu1 %v2194_v14  ;;  %v2202_v21 = vcombine.high %v124_v16, %v128_v17  ;;  %v131_v22 = vld [vmem:[#allocation2 + $0xc0] sm:$0xff]  ;;  %v132_v24 = vld [vmem:[#allocation2 + $0xc8] sm:$0xff]  ;;  %v2199_v26 = vcombine.low %v123_v13, %v127_v15 }
  0x19   :  { %v135_v23 = vld [vmem:[#allocation2 + $0xe0] sm:$0xff]  ;;  %v136_v25 = vld [vmem:[#allocation2 + $0xe8] sm:$0xff]  ;;  %v2201_v27 = vcombine.low %v124_v16, %v128_v17 }
  0x1a   :  { %v2208_v28 = vcombine.high %v131_v22, %v135_v23  ;;  %v2210_v29 = vcombine.high %v132_v24, %v136_v25  ;;  %v139_v30 = vld [vmem:[#allocation2 + $0x100] sm:$0xff]  ;;  %v140_v33 = vld [vmem:[#allocation2 + $0x108] sm:$0xff]  ;;  %v2207_v35 = vcombine.low %v131_v22, %v135_v23  ;;  %v2209_v36 = vcombine.low %v132_v24, %v136_v25 }
  0x1b   :  { %1646 = vmatpush1.bf16.msra.mxu0 %v2191_v18  ;;  %1728 = vmatpush1.bf16.msra.mxu1 %v2193_v19  ;;  %v143_v31 = vld [vmem:[#allocation2 + $0x120] sm:$0xff]  ;;  %v144_v34 = vld [vmem:[#allocation2 + $0x128] sm:$0xff] }
  0x1c   :  { %1647 = vmatprep.subr.bf16.mxu0 %v2200_v20  ;;  %1729 = vmatprep.subr.bf16.mxu1 %v2202_v21  ;;  %v2216_v37 = vcombine.high %v139_v30, %v143_v31  ;;  %v2218_v38 = vcombine.high %v140_v33, %v144_v34  ;;  %v147_v39 = vld [vmem:[#allocation2 + $0x140] sm:$0xff]  ;;  %v148_v42 = vld [vmem:[#allocation2 + $0x148] sm:$0xff]  ;;  %v2215_v44 = vcombine.low %v139_v30, %v143_v31 }
  0x1d   :  { %v151_v40 = vld [vmem:[#allocation2 + $0x160] sm:$0xff]  ;;  %v152_v43 = vld [vmem:[#allocation2 + $0x168] sm:$0xff]  ;;  %v2217_v45 = vcombine.low %v140_v33, %v144_v34 }
  0x1e   :  { %v2224_v46 = vcombine.high %v147_v39, %v151_v40  ;;  %v2226_v47 = vcombine.high %v148_v42, %v152_v43  ;;  %v155_v48 = vld [vmem:[#allocation2 + $0x180] sm:$0xff]  ;;  %v156_v51 = vld [vmem:[#allocation2 + $0x188] sm:$0xff]  ;;  %v2223_v53 = vcombine.low %v147_v39, %v151_v40  ;;  %v2225_v54 = vcombine.low %v148_v42, %v152_v43 }
  0x1f   :  { %1648 = vmatpush1.bf16.msra.mxu0 %v2199_v26  ;;  %1730 = vmatpush1.bf16.msra.mxu1 %v2201_v27  ;;  %v159_v49 = vld [vmem:[#allocation2 + $0x1a0] sm:$0xff]  ;;  %v160_v52 = vld [vmem:[#allocation2 + $0x1a8] sm:$0xff]  ;;  %v43_v42 = vsub.s32 0, %v2537_v41 }
  0x20   :  { %1649 = vmatprep.subr.bf16.mxu0 %v2208_v28  ;;  %1731 = vmatprep.subr.bf16.mxu1 %v2210_v29  ;;  %v2232_v55 = vcombine.high %v155_v48, %v159_v49  ;;  %v2543_v56 = vld [vmem:[%s2633_s0] sm:$0xff]  ;;  %v2234_v58 = vcombine.high %v156_v51, %v160_v52  ;;  %v164_v0 = vld [vmem:[#allocation2 + $0x1c8] sm:$0xff]  ;;  %v2231_v3 = vcombine.low %v155_v48, %v159_v49 }
  0x21   :  { %v2548_v57 = vld [vmem:[%s2634_s1] sm:$0xf]  ;;  %v36_v61 = vunpack.c.h.bf16 %v2543_v56  ;;  %v168_v1 = vld [vmem:[#allocation2 + $0x1e8] sm:$0xff]  ;;  %v2233_v5 = vcombine.low %v156_v51, %v160_v52  ;;  %v55_v52 = vsub.s32 3, %v2537_v41 }
  0x22   :  { %v163_v59 = vld [vmem:[#allocation2 + $0x1c0] sm:$0xff]  ;;  %v48_v62 = vrot.slane %v2548_v57, %v47_v50  ;;  %v2242_v7 = vcombine.high %v164_v0, %v168_v1  ;;  %v172_v11 = vld [vmem:[#allocation2 + $0x208] sm:$0xff]  ;;  %v2241_v15 = vcombine.low %v164_v0, %v168_v1 }
  0x23   :  { %1650 = vmatpush1.bf16.msra.mxu0 %v2207_v35  ;;  %1732 = vmatpush1.bf16.msra.mxu1 %v2209_v36  ;;  %v167_v60 = vld [vmem:[#allocation2 + $0x1e0] sm:$0xff]  ;;  %v176_v12 = vld [vmem:[#allocation2 + $0x228] sm:$0xff] }
  0x24   :  { %1651 = vmatprep.subr.bf16.mxu0 %v2216_v37  ;;  %1733 = vmatprep.subr.bf16.mxu1 %v2218_v38  ;;  %v2555_v63 = vld [vmem:[%s2635_s2] sm:$0xf]  ;;  %v62_v4 = vmul.f32 %v48_v62, %v36_v61  ;;  %v2240_v6 = vcombine.high %v163_v59, %v167_v60  ;;  %v2239_v13 = vcombine.low %v163_v59, %v167_v60  ;;  %v180_v21 = vld [vmem:[#allocation2 + $0x248] sm:$0xff] }
  0x25   :  { %v74_v2 = vrot.slane %v2555_v63, %v47_v50  ;;  %v171_v8 = vld [vmem:[#allocation2 + $0x200] sm:$0xff]  ;;  %v2250_v17 = vcombine.high %v172_v11, %v176_v12  ;;  %v184_v22 = vld [vmem:[#allocation2 + $0x268] sm:$0xff]  ;;  %v2249_v25 = vcombine.low %v172_v11, %v176_v12 }
  0x26   :  { %v175_v9 = vld [vmem:[#allocation2 + $0x220] sm:$0xff]  ;;  %v2258_v27 = vcombine.high %v180_v21, %v184_v22  ;;  %v188_v30 = vld [vmem:[#allocation2 + $0x288] sm:$0xff]  ;;  %v2257_v33 = vcombine.low %v180_v21, %v184_v22 }
  0x27   :  { %1652 = vmatpush1.bf16.msra.mxu0 %v2215_v44  ;;  %1734 = vmatpush1.bf16.msra.mxu1 %v2217_v45  ;;  %v88_v10 = vadd.f32 %v74_v2, %v62_v4  ;;  %v2248_v16 = vcombine.high %v171_v8, %v175_v9  ;;  %v179_v18 = vld [vmem:[#allocation2 + $0x240] sm:$0xff]  ;;  %v2247_v24 = vcombine.low %v171_v8, %v175_v9  ;;  %v192_v31 = vld [vmem:[#allocation2 + $0x2a8] sm:$0xff]  ;;  %v51_v45 = vsub.s32 2, %v2537_v41 }
  0x28   :  { %1653 = vmatprep.subr.bf16.mxu0 %v2224_v46  ;;  %1735 = vmatprep.subr.bf16.mxu1 %v2226_v47  ;;  %v183_v19 = vld [vmem:[#allocation2 + $0x260] sm:$0xff]  ;;  %v2266_v35 = vcombine.high %v188_v30, %v192_v31  ;;  %v196_v38 = vld [vmem:[#allocation2 + $0x2c8] sm:$0xff]  ;;  %v2265_v43 = vcombine.low %v188_v30, %v192_v31  ;;  %v70_v9 = vrot.slane %v2555_v63, %v43_v42 }
  0x29   :  { %vm92_vm0 = vcmp.gt.f32.partialorder %v88_v10, 0.0  ;;  %v96_v14 = vmul.f32 0.2, %v88_v10  ;;  %v2256_v26 = vcombine.high %v179_v18, %v183_v19  ;;  %v187_v28 = vld [vmem:[#allocation2 + $0x280] sm:$0xff]  ;;  %v2255_v32 = vcombine.low %v179_v18, %v183_v19  ;;  %v200_v39 = vld [vmem:[#allocation2 + $0x2e8] sm:$0xff] }
  0x2a   :  { %v191_v29 = vld [vmem:[#allocation2 + $0x2a0] sm:$0xff]  ;;  %v2274_v46 = vcombine.high %v196_v38, %v200_v39  ;;  %v204_v49 = vld [vmem:[#allocation2 + $0x308] sm:$0xff]  ;;  %v52_v61 = vrot.slane %v2548_v57, %v51_v45  ;;  %v78_v62 = vrot.slane %v2555_v63, %v51_v45 }
  0x2b   :  { %1654 = vmatpush1.bf16.msra.mxu0 %v2223_v53  ;;  %1736 = vmatpush1.bf16.msra.mxu1 %v2225_v54  ;;  %v100_v20 = vsel %vm92_vm0, %v88_v10, %v96_v14  ;;  %v2264_v34 = vcombine.high %v187_v28, %v191_v29  ;;  %v195_v36 = vld [vmem:[#allocation2 + $0x2c0] sm:$0xff]  ;;  %v2263_v40 = vcombine.low %v187_v28, %v191_v29  ;;  %v208_v50 = vld [vmem:[#allocation2 + $0x328] sm:$0xff] }
  0x2c   :  { %1655 = vmatprep.subr.bf16.mxu0 %v2232_v55  ;;  %1737 = vmatprep.subr.bf16.mxu1 %v2234_v58  ;;  %v2558_v23 = vpack.c.bf16 %v100_v20, %v100_v20  ;;  %v199_v37 = vld [vmem:[#allocation2 + $0x2e0] sm:$0xff]  ;;  %v34_v51 = vld [vmem:[%s2633_s0 + $0x8] sm:$0xff]  ;;  %v2273_v54 = vcombine.low %v196_v38, %v200_v39  ;;  %v35_v55 = vunpack.c.l.bf16 %v2543_v56  ;;  %v44_v58 = vrot.slane %v2548_v57, %v43_v42 }
  0x2d   :  { %v2272_v44 = vcombine.high %v195_v36, %v199_v37  ;;  %v203_v47 = vld [vmem:[#allocation2 + $0x300] sm:$0xff]  ;;  %v2271_v53 = vcombine.low %v195_v36, %v199_v37  ;;  %v37_v60 = vunpack.c.l.bf16 %v34_v51  ;;  %v2282_v0 = vcombine.high %v204_v49, %v208_v50  ;;  %v216_v4 = vld [vmem:[#allocation2 + $0x368] sm:$0xff] }
  0x2e   :  { %1675 = vmatprep.mubr.bf16.mxu0 %v2558_v23  ;;  %1757 = vmatprep.mubr.bf16.mxu1 %v2558_v23  ;;  %v207_v48 = vld [vmem:[#allocation2 + $0x320] sm:$0xff]  ;;  %v61_v8 = vmul.f32 %v44_v58, %v35_v55  ;;  %v2281_v10 = vcombine.low %v204_v49, %v208_v50  ;;  %v232_v28 = vld [vmem:[#allocation2 + $0x3e8] sm:$0xff] }
  0x2f   :  { %1656 = vmatpush1.bf16.msra.mxu0 %v2231_v3  ;;  %1738 = vmatpush1.bf16.msra.mxu1 %v2233_v5  ;;  %v2280_v59 = vcombine.high %v203_v47, %v207_v48  ;;  %v211_v1 = vld [vmem:[#allocation2 + $0x340] sm:$0xff]  ;;  %v212_v3 = vld [vmem:[#allocation2 + $0x348] sm:$0xff]  ;;  %v38_v5 = vunpack.c.h.bf16 %v34_v51  ;;  %v63_v56 = vmul.f32 %v52_v61, %v37_v60 }
  0x30   :  { %1657 = vmatprep.subr.bf16.mxu0 %v2240_v6  ;;  %1739 = vmatprep.subr.bf16.mxu1 %v2242_v7  ;;  %v215_v2 = vld [vmem:[#allocation2 + $0x360] sm:$0xff]  ;;  %v56_v6 = vrot.slane %v2548_v57, %v55_v52  ;;  %v2279_v7 = vcombine.low %v203_v47, %v207_v48  ;;  %v82_v57 = vrot.slane %v2555_v63, %v55_v52  ;;  %v236_v36 = vld [vmem:[#allocation2 + $0x408] sm:$0xff] }
  0x31   :  { %v2288_v11 = vcombine.high %v211_v1, %v215_v2  ;;  %v2574_v12 = vadd.f32 %v78_v62, %v63_v56  ;;  %v219_v14 = vld [vmem:[#allocation2 + $0x380] sm:$0xff]  ;;  %v2287_v19 = vcombine.low %v211_v1, %v215_v2  ;;  %v87_v20 = vadd.f32 %v70_v9, %v61_v8  ;;  %v240_v37 = vld [vmem:[#allocation2 + $0x428] sm:$0xff] }
  0x32   :  { %v64_v18 = vmul.f32 %v56_v6, %v38_v5  ;;  %v2289_v21 = vcombine.low %v212_v3, %v216_v4  ;;  %v243_v45 = vld [vmem:[#allocation2 + $0x440] sm:$0xff]  ;;  %v244_v48 = vld [vmem:[#allocation2 + $0x448] sm:$0xff]  ;;  %v2313_v52 = vcombine.low %v236_v36, %v240_v37 }
  0x33   :  { %1658 = vmatpush1.bf16.msra.mxu0 %v2239_v13  ;;  %1740 = vmatpush1.bf16.msra.mxu1 %v2241_v15  ;;  %v2290_v13 = vcombine.high %v212_v3, %v216_v4  ;;  %v223_v15 = vld [vmem:[#allocation2 + $0x3a0] sm:$0xff]  ;;  %v95_v31 = vmul.f32 0.2, %v87_v20  ;;  %vm91_vm1 = vcmp.gt.f32.partialorder %v87_v20, 0.0  ;;  %v248_v49 = vld [vmem:[#allocation2 + $0x468] sm:$0xff]  ;;  %vm93_vm3 = vcmp.gt.f32.partialorder %v2574_v12, 0.0 }
  0x34   :  { %1659 = vmatprep.subr.bf16.mxu0 %v2248_v16  ;;  %1741 = vmatprep.subr.bf16.mxu1 %v2250_v17  ;;  %v220_v16 = vld [vmem:[#allocation2 + $0x388] sm:$0xff]  ;;  %v2296_v22 = vcombine.high %v219_v14, %v223_v15  ;;  %v90_v29 = vadd.f32 %v82_v57, %v64_v18  ;;  %v2295_v30 = vcombine.low %v219_v14, %v223_v15  ;;  %v251_v55 = vld [vmem:[#allocation2 + $0x480] sm:$0xff] }
  0x35   :  { %v224_v17 = vld [vmem:[#allocation2 + $0x3a8] sm:$0xff]  ;;  %v255_v58 = vld [vmem:[#allocation2 + $0x4a0] sm:$0xff] }
  0x36   :  { %v2297_v63 = vcombine.low %v220_v16, %v224_v17  ;;  %v98_v38 = vmul.f32 0.2, %v90_v29  ;;  %vm94_vm2 = vcmp.gt.f32.partialorder %v90_v29, 0.0  ;;  %v252_v60 = vld [vmem:[#allocation2 + $0x488] sm:$0xff]  ;;  %v2328_v1 = vcombine.high %v251_v55, %v255_v58  ;;  %v259_v3 = vld [vmem:[#allocation2 + $0x4c0] sm:$0xff] }
  0x37   :  { %1660 = vmatpush1.bf16.msra.mxu0 %v2247_v24  ;;  %1742 = vmatpush1.bf16.msra.mxu1 %v2249_v25  ;;  %v2298_v24 = vcombine.high %v220_v16, %v224_v17  ;;  %v227_v25 = vld [vmem:[#allocation2 + $0x3c0] sm:$0xff]  ;;  %v256_v61 = vld [vmem:[#allocation2 + $0x4a8] sm:$0xff]  ;;  %v2327_v56 = vcombine.low %v251_v55, %v255_v58 }
  0x38   :  { %1661 = vmatprep.subr.bf16.mxu0 %v2256_v26  ;;  %1743 = vmatprep.subr.bf16.mxu1 %v2258_v27  ;;  %v231_v26 = vld [vmem:[#allocation2 + $0x3e0] sm:$0xff]  ;;  %v228_v27 = vld [vmem:[#allocation2 + $0x3c8] sm:$0xff]  ;;  %v102_v50 = vsel %vm94_vm2, %v90_v29, %v98_v38  ;;  %v2330_v2 = vcombine.high %v252_v60, %v256_v61 }
  0x39   :  { %v2303_v39 = vcombine.low %v227_v25, %v231_v26  ;;  %v2305_v42 = vcombine.low %v228_v27, %v232_v28  ;;  %v263_v4 = vld [vmem:[#allocation2 + $0x4e0] sm:$0xff]  ;;  %v260_v5 = vld [vmem:[#allocation2 + $0x4c8] sm:$0xff] }
  0x3a   :  { %v264_v6 = vld [vmem:[#allocation2 + $0x4e8] sm:$0xff]  ;;  %v2336_v8 = vcombine.high %v259_v3, %v263_v4  ;;  %v2335_v15 = vcombine.low %v259_v3, %v263_v4  ;;  %v275_v57 = vld [vmem:[#allocation2 + $0x540] sm:$0xff] }
  0x3b   :  { %1662 = vmatpush1.bf16.msra.mxu0 %v2255_v32  ;;  %1744 = vmatpush1.bf16.msra.mxu1 %v2257_v33  ;;  %v2304_v32 = vcombine.high %v227_v25, %v231_v26  ;;  %v2306_v33 = vcombine.high %v228_v27, %v232_v28  ;;  %v2338_v9 = vcombine.high %v260_v5, %v264_v6  ;;  %v272_v14 = vld [vmem:[#allocation2 + $0x528] sm:$0xff]  ;;  %v283_v27 = vld [vmem:[#allocation2 + $0x580] sm:$0xff] }
  0x3c   :  { %1663 = vmatprep.subr.bf16.mxu0 %v2264_v34  ;;  %1745 = vmatprep.subr.bf16.mxu1 %v2266_v35  ;;  %v235_v34 = vld [vmem:[#allocation2 + $0x400] sm:$0xff]  ;;  %v2337_v16 = vcombine.low %v260_v5, %v264_v6  ;;  %v284_v29 = vld [vmem:[#allocation2 + $0x588] sm:$0xff] }
  0x3d   :  { %v239_v35 = vld [vmem:[#allocation2 + $0x420] sm:$0xff]  ;;  %v312_v55 = vld [vmem:[#allocation2 + $0x668] sm:$0xff] }
  0x3e   :  { %v2311_v51 = vcombine.low %v235_v34, %v239_v35  ;;  %v287_v28 = vld [vmem:[#allocation2 + $0x5a0] sm:$0xff]  ;;  %v320_v3 = vld [vmem:[#allocation2 + $0x6a8] sm:$0xff] }
  0x3f   :  { %1664 = vmatpush1.bf16.msra.mxu0 %v2263_v40  ;;  %1746 = vmatpush1.bf16.msra.mxu1 %v2265_v43  ;;  %v99_v40 = vsel %vm91_vm1, %v87_v20, %v95_v31  ;;  %v2312_v43 = vcombine.high %v235_v34, %v239_v35  ;;  %v276_v20 = vld [vmem:[#allocation2 + $0x548] sm:$0xff]  ;;  %v291_v34 = vld [vmem:[#allocation2 + $0x5c0] sm:$0xff]  ;;  %v2359_v38 = vcombine.low %v283_v27, %v287_v28 }
  0x40   :  { %1665 = vmatprep.subr.bf16.mxu0 %v2272_v44  ;;  %1747 = vmatprep.subr.bf16.mxu1 %v2274_v46  ;;  %v2314_v44 = vcombine.high %v236_v36, %v240_v37  ;;  %v247_v46 = vld [vmem:[#allocation2 + $0x460] sm:$0xff]  ;;  %v2577_v47 = vpack.c.bf16 %v99_v40, %v99_v40  ;;  %v292_v36 = vld [vmem:[#allocation2 + $0x5c8] sm:$0xff] }
  0x41   :  { %v2319_v62 = vcombine.low %v243_v45, %v247_v46  ;;  %v295_v35 = vld [vmem:[#allocation2 + $0x5e0] sm:$0xff]  ;;  %v296_v37 = vld [vmem:[#allocation2 + $0x5e8] sm:$0xff] }
  0x42   :  { %v2368_v40 = vcombine.high %v291_v34, %v295_v35 }
  0x43   :  { %1666 = vmatpush1.bf16.msra.mxu0 %v2271_v53  ;;  %1748 = vmatpush1.bf16.msra.mxu1 %v2273_v54  ;;  %v2320_v53 = vcombine.high %v243_v45, %v247_v46  ;;  %v2322_v54 = vcombine.high %v244_v48, %v248_v49  ;;  %v300_v45 = vld [vmem:[#allocation2 + $0x608] sm:$0xff] }
  0x44   :  { %1667 = vmatprep.subr.bf16.mxu0 %v2280_v59  ;;  %1749 = vmatprep.subr.bf16.mxu1 %v2282_v0  ;;  %v2579_v59 = vpack.c.bf16 %v102_v50, %v102_v50  ;;  %v2321_v0 = vcombine.low %v244_v48, %v248_v49  ;;  %v304_v46 = vld [vmem:[#allocation2 + $0x628] sm:$0xff]  ;;  %v2367_v48 = vcombine.low %v291_v34, %v295_v35 }
  0x45   :  { %v2369_v49 = vcombine.low %v292_v36, %v296_v37  ;;  %v352_v34 = vld [vmem:[#allocation2 + $0x7a8] sm:$0xff] }
  0x47   :  { %1668 = vmatpush1.bf16.msra.mxu0 %v2279_v7  ;;  %1750 = vmatpush1.bf16.msra.mxu1 %v2281_v10  ;;  %v2329_v7 = vcombine.low %v252_v60, %v256_v61  ;;  %v267_v10 = vld [vmem:[#allocation2 + $0x500] sm:$0xff]  ;;  %v2377_v60 = vcombine.low %v300_v45, %v304_v46 }
  0x48   :  { %1669 = vmatprep.subr.bf16.mxu0 %v2288_v11  ;;  %1751 = vmatprep.subr.bf16.mxu1 %v2290_v13  ;;  %v271_v11 = vld [vmem:[#allocation2 + $0x520] sm:$0xff]  ;;  %v268_v13 = vld [vmem:[#allocation2 + $0x508] sm:$0xff] }
  0x49   :  { %v2344_v17 = vcombine.high %v267_v10, %v271_v11  ;;  %v2346_v18 = vcombine.high %v268_v13, %v272_v14 }
  0x4b   :  { %1670 = vmatpush1.bf16.msra.mxu0 %v2287_v19  ;;  %1752 = vmatpush1.bf16.msra.mxu1 %v2289_v21  ;;  %v279_v19 = vld [vmem:[#allocation2 + $0x560] sm:$0xff]  ;;  %v280_v21 = vld [vmem:[#allocation2 + $0x568] sm:$0xff] }
  0x4c   :  { %1671 = vmatprep.subr.bf16.mxu0 %v2296_v22  ;;  %1753 = vmatprep.subr.bf16.mxu1 %v2298_v24  ;;  %v2343_v22 = vcombine.low %v267_v10, %v271_v11  ;;  %v2345_v24 = vcombine.low %v268_v13, %v272_v14  ;;  %v2352_v25 = vcombine.high %v275_v57, %v279_v19  ;;  %v328_v10 = vld [vmem:[#allocation2 + $0x6e8] sm:$0xff] }
  0x4d   :  { %v2354_v26 = vcombine.high %v276_v20, %v280_v21  ;;  %v2351_v31 = vcombine.low %v275_v57, %v279_v19  ;;  %v336_v57 = vld [vmem:[#allocation2 + $0x728] sm:$0xff] }
  0x4f   :  { %1672 = vmatpush1.bf16.msra.mxu0 %v2295_v30  ;;  %1754 = vmatpush1.bf16.msra.mxu1 %v2297_v63  ;;  %v288_v30 = vld [vmem:[#allocation2 + $0x5a8] sm:$0xff]  ;;  %v2353_v63 = vcombine.low %v276_v20, %v280_v21 }
  0x50   :  { %1673 = vmatprep.subr.bf16.mxu0 %v2304_v32  ;;  %1755 = vmatprep.subr.bf16.mxu1 %v2306_v33  ;;  %v2360_v32 = vcombine.high %v283_v27, %v287_v28  ;;  %v2362_v33 = vcombine.high %v284_v29, %v288_v30  ;;  %v344_v27 = vld [vmem:[#allocation2 + $0x768] sm:$0xff] }
  0x53   :  { %1674 = vmatpush1.bf16.msra.mxu0 %v2303_v39  ;;  %1756 = vmatpush1.bf16.msra.mxu1 %v2305_v42  ;;  %v2361_v39 = vcombine.low %v284_v29, %v288_v30  ;;  %v2370_v42 = vcombine.high %v292_v36, %v296_v37 }
  0x54   :  { %1684 = vmatprep.subr.bf16.mxu0 %v2312_v43  ;;  %1766 = vmatprep.subr.bf16.mxu1 %v2314_v44  ;;  %v299_v43 = vld [vmem:[#allocation2 + $0x600] sm:$0xff] }
  0x55   :  { %v303_v44 = vld [vmem:[#allocation2 + $0x620] sm:$0xff] }
  0x56   :  { %1676 = vmatmul.mubr.bf16.vlgmr.msra.gmra.mrb[0].mxu0 %v2577_v47  ;;  %1758 = vmatmul.mubr.bf16.vlgmr.msra.gmra.mrb[0].mxu1 %v2577_v47  ;;  %v2376_v50 = vcombine.high %v299_v43, %v303_v44  ;;  %v2375_v58 = vcombine.low %v299_v43, %v303_v44  ;;  %v360_v43 = vld [vmem:[#allocation2 + $0x7e8] sm:$0xff] }
  0x57   :  { %1685 = vmatpush1.bf16.msra.mxu0 %v2311_v51  ;;  %1767 = vmatpush1.bf16.msra.mxu1 %v2313_v52  ;;  %v2378_v51 = vcombine.high %v300_v45, %v304_v46  ;;  %v307_v52 = vld [vmem:[#allocation2 + $0x640] sm:$0xff]  ;;  %v97_v45 = vmul.f32 0.2, %v2574_v12 }
  0x58   :  { %1686 = vmatprep.subr.bf16.mxu0 %v2320_v53  ;;  %1768 = vmatprep.subr.bf16.mxu1 %v2322_v54  ;;  %v311_v53 = vld [vmem:[#allocation2 + $0x660] sm:$0xff]  ;;  %v308_v54 = vld [vmem:[#allocation2 + $0x648] sm:$0xff] }
  0x59   :  { %1716 = vmatprep.mubr.bf16.mxu0 %v2579_v59  ;;  %1798 = vmatprep.mubr.bf16.mxu1 %v2579_v59  ;;  %v2384_v61 = vcombine.high %v307_v52, %v311_v53  ;;  %v2383_v4 = vcombine.low %v307_v52, %v311_v53  ;;  %v2385_v5 = vcombine.low %v308_v54, %v312_v55  ;;  %v110_v52 = vld [vmem:[#allocation2 + $0x18] sm:$0xff] }
  0x5a   :  { %v114_v53 = vld [vmem:[#allocation2 + $0x38] sm:$0xff] }
  0x5b   :  { %1687 = vmatpush1.bf16.msra.mxu0 %v2319_v62  ;;  %1769 = vmatpush1.bf16.msra.mxu1 %v2321_v0  ;;  %v2386_v62 = vcombine.high %v308_v54, %v312_v55  ;;  %v315_v0 = vld [vmem:[#allocation2 + $0x680] sm:$0xff]  ;;  %v101_v55 = vsel %vm93_vm3, %v2574_v12, %v97_v45 }
  0x5c   :  { %1688 = vmatprep.subr.bf16.mxu0 %v2328_v1  ;;  %1770 = vmatprep.subr.bf16.mxu1 %v2330_v2  ;;  %v319_v1 = vld [vmem:[#allocation2 + $0x6a0] sm:$0xff]  ;;  %v316_v2 = vld [vmem:[#allocation2 + $0x688] sm:$0xff] }
  0x5d   :  { %v2392_v6 = vcombine.high %v315_v0, %v319_v1  ;;  %v2391_v11 = vcombine.low %v315_v0, %v319_v1  ;;  %v2393_v13 = vcombine.low %v316_v2, %v320_v3  ;;  %v121_v0 = vld [vmem:[#allocation2 + $0x70] sm:$0xff]  ;;  %v2588_v1 = vpack.c.bf16 %v101_v55, %v101_v55 }
  0x5e   :  { %v173_v55 = vld [vmem:[#allocation2 + $0x210] sm:$0xff] }
  0x5f   :  { %1689 = vmatpush1.bf16.msra.mxu0 %v2327_v56  ;;  %1771 = vmatpush1.bf16.msra.mxu1 %v2329_v7  ;;  %v2394_v56 = vcombine.high %v316_v2, %v320_v3  ;;  %v323_v7 = vld [vmem:[#allocation2 + $0x6c0] sm:$0xff]  ;;  %v118_v2 = vld [vmem:[#allocation2 + $0x58] sm:$0xff] }
  0x60   :  { %1690 = vmatprep.subr.bf16.mxu0 %v2336_v8  ;;  %1772 = vmatprep.subr.bf16.mxu1 %v2338_v9  ;;  %v327_v8 = vld [vmem:[#allocation2 + $0x6e0] sm:$0xff]  ;;  %v324_v9 = vld [vmem:[#allocation2 + $0x6c8] sm:$0xff]  ;;  %v122_v3 = vld [vmem:[#allocation2 + $0x78] sm:$0xff] }
  0x61   :  { %v2400_v14 = vcombine.high %v323_v7, %v327_v8  ;;  %v2399_v19 = vcombine.low %v323_v7, %v327_v8  ;;  %v2401_v20 = vcombine.low %v324_v9, %v328_v10  ;;  %v2198_v12 = vcombine.high %v118_v2, %v122_v3  ;;  %v129_v7 = vld [vmem:[#allocation2 + $0xb0] sm:$0xff]  ;;  %v126_v8 = vld [vmem:[#allocation2 + $0x98] sm:$0xff] }
  0x63   :  { %1691 = vmatpush1.bf16.msra.mxu0 %v2335_v15  ;;  %1773 = vmatpush1.bf16.msra.mxu1 %v2337_v16  ;;  %v2402_v15 = vcombine.high %v324_v9, %v328_v10  ;;  %v331_v16 = vld [vmem:[#allocation2 + $0x700] sm:$0xff]  ;;  %v130_v9 = vld [vmem:[#allocation2 + $0xb8] sm:$0xff] }
  0x64   :  { %1692 = vmatprep.subr.bf16.mxu0 %v2344_v17  ;;  %1774 = vmatprep.subr.bf16.mxu1 %v2346_v18  ;;  %v335_v17 = vld [vmem:[#allocation2 + $0x720] sm:$0xff]  ;;  %v332_v18 = vld [vmem:[#allocation2 + $0x708] sm:$0xff] }
  0x65   :  { %v2408_v21 = vcombine.high %v331_v16, %v335_v17  ;;  %v2407_v28 = vcombine.low %v331_v16, %v335_v17  ;;  %v2409_v29 = vcombine.low %v332_v18, %v336_v57  ;;  %v137_v16 = vld [vmem:[#allocation2 + $0xf0] sm:$0xff]  ;;  %v134_v17 = vld [vmem:[#allocation2 + $0xd8] sm:$0xff] }
  0x67   :  { %1693 = vmatpush1.bf16.msra.mxu0 %v2343_v22  ;;  %1775 = vmatpush1.bf16.msra.mxu1 %v2345_v24  ;;  %v2410_v22 = vcombine.high %v332_v18, %v336_v57  ;;  %v339_v24 = vld [vmem:[#allocation2 + $0x740] sm:$0xff]  ;;  %v138_v18 = vld [vmem:[#allocation2 + $0xf8] sm:$0xff] }
  0x68   :  { %1694 = vmatprep.subr.bf16.mxu0 %v2352_v25  ;;  %1776 = vmatprep.subr.bf16.mxu1 %v2354_v26  ;;  %v343_v25 = vld [vmem:[#allocation2 + $0x760] sm:$0xff]  ;;  %v340_v26 = vld [vmem:[#allocation2 + $0x748] sm:$0xff] }
  0x69   :  { %v2416_v30 = vcombine.high %v339_v24, %v343_v25  ;;  %v2415_v35 = vcombine.low %v339_v24, %v343_v25  ;;  %v2417_v36 = vcombine.low %v340_v26, %v344_v27  ;;  %v145_v24 = vld [vmem:[#allocation2 + $0x130] sm:$0xff]  ;;  %v142_v25 = vld [vmem:[#allocation2 + $0x118] sm:$0xff] }
  0x6b   :  { %1695 = vmatpush1.bf16.msra.mxu0 %v2351_v31  ;;  %1777 = vmatpush1.bf16.msra.mxu1 %v2353_v63  ;;  %v2418_v31 = vcombine.high %v340_v26, %v344_v27  ;;  %v347_v63 = vld [vmem:[#allocation2 + $0x780] sm:$0xff]  ;;  %v146_v26 = vld [vmem:[#allocation2 + $0x138] sm:$0xff] }
  0x6c   :  { %1696 = vmatprep.subr.bf16.mxu0 %v2360_v32  ;;  %1778 = vmatprep.subr.bf16.mxu1 %v2362_v33  ;;  %v351_v32 = vld [vmem:[#allocation2 + $0x7a0] sm:$0xff]  ;;  %v348_v33 = vld [vmem:[#allocation2 + $0x788] sm:$0xff] }
  0x6d   :  { %v2424_v37 = vcombine.high %v347_v63, %v351_v32  ;;  %v2423_v44 = vcombine.low %v347_v63, %v351_v32  ;;  %v2425_v46 = vcombine.low %v348_v33, %v352_v34  ;;  %v150_v63 = vld [vmem:[#allocation2 + $0x158] sm:$0xff] }
  0x6e   :  { %v154_v32 = vld [vmem:[#allocation2 + $0x178] sm:$0xff] }
  0x6f   :  { %1697 = vmatpush1.bf16.msra.mxu0 %v2359_v38  ;;  %1779 = vmatpush1.bf16.msra.mxu1 %v2361_v39  ;;  %v2426_v38 = vcombine.high %v348_v33, %v352_v34  ;;  %v355_v39 = vld [vmem:[#allocation2 + $0x7c0] sm:$0xff]  ;;  %v2221_v34 = vcombine.low %v142_v25, %v146_v26 }
  0x70   :  { %1698 = vmatprep.subr.bf16.mxu0 %v2368_v40  ;;  %1780 = vmatprep.subr.bf16.mxu1 %v2370_v42  ;;  %v359_v40 = vld [vmem:[#allocation2 + $0x7e0] sm:$0xff]  ;;  %v356_v42 = vld [vmem:[#allocation2 + $0x7c8] sm:$0xff] }
  0x71   :  { %v2431_v54 = vcombine.low %v355_v39, %v359_v40 }
  0x73   :  { %1699 = vmatpush1.bf16.msra.mxu0 %v2367_v48  ;;  %1781 = vmatpush1.bf16.msra.mxu1 %v2369_v49  ;;  %v2432_v48 = vcombine.high %v355_v39, %v359_v40  ;;  %v2434_v49 = vcombine.high %v356_v42, %v360_v43  ;;  %v158_v39 = vld [vmem:[#allocation2 + $0x198] sm:$0xff] }
  0x74   :  { %1700 = vmatprep.subr.bf16.mxu0 %v2376_v50  ;;  %1782 = vmatprep.subr.bf16.mxu1 %v2378_v51  ;;  %v109_v50 = vld [vmem:[#allocation2 + $0x10] sm:$0xff]  ;;  %v162_v40 = vld [vmem:[#allocation2 + $0x1b8] sm:$0xff] }
  0x75   :  { %v113_v51 = vld [vmem:[#allocation2 + $0x30] sm:$0xff]  ;;  %v2238_v45 = vcombine.high %v158_v39, %v162_v40 }
  0x77   :  { %1701 = vmatpush1.bf16.msra.mxu0 %v2375_v58  ;;  %1783 = vmatpush1.bf16.msra.mxu1 %v2377_v60  ;;  %v2433_v58 = vcombine.low %v356_v42, %v360_v43  ;;  %v2188_v60 = vcombine.high %v109_v50, %v113_v51  ;;  %v2229_v43 = vcombine.low %v150_v63, %v154_v32 }
  0x78   :  { %1702 = vmatprep.subr.bf16.mxu0 %v2384_v61  ;;  %1784 = vmatprep.subr.bf16.mxu1 %v2386_v62  ;;  %v2190_v61 = vcombine.high %v110_v52, %v114_v53  ;;  %v117_v62 = vld [vmem:[#allocation2 + $0x50] sm:$0xff] }
  0x79   :  { %v2195_v10 = vcombine.low %v117_v62, %v121_v0 }
  0x7b   :  { %1703 = vmatpush1.bf16.msra.mxu0 %v2383_v4  ;;  %1785 = vmatpush1.bf16.msra.mxu1 %v2385_v5  ;;  %v2187_v4 = vcombine.low %v109_v50, %v113_v51  ;;  %v2189_v5 = vcombine.low %v110_v52, %v114_v53  ;;  %v170_v50 = vld [vmem:[#allocation2 + $0x1f8] sm:$0xff]  ;;  %v2237_v52 = vcombine.low %v158_v39, %v162_v40 }
  0x7c   :  { %1704 = vmatprep.subr.bf16.mxu0 %v2392_v6  ;;  %1786 = vmatprep.subr.bf16.mxu1 %v2394_v56  ;;  %v2196_v6 = vcombine.high %v117_v62, %v121_v0  ;;  %v125_v56 = vld [vmem:[#allocation2 + $0x90] sm:$0xff] }
  0x7d   :  { %v2203_v57 = vcombine.low %v125_v56, %v129_v7 }
  0x7f   :  { %1705 = vmatpush1.bf16.msra.mxu0 %v2391_v11  ;;  %1787 = vmatpush1.bf16.msra.mxu1 %v2393_v13  ;;  %v2197_v11 = vcombine.low %v118_v2, %v122_v3  ;;  %v2204_v13 = vcombine.high %v125_v56, %v129_v7 }
  0x80   :  { %1706 = vmatprep.subr.bf16.mxu0 %v2400_v14  ;;  %1788 = vmatprep.subr.bf16.mxu1 %v2402_v15  ;;  %v2206_v14 = vcombine.high %v126_v8, %v130_v9  ;;  %v133_v15 = vld [vmem:[#allocation2 + $0xd0] sm:$0xff] }
  0x81   :  { %v2211_v27 = vcombine.low %v133_v15, %v137_v16 }
  0x83   :  { %1707 = vmatpush1.bf16.msra.mxu0 %v2399_v19  ;;  %1789 = vmatpush1.bf16.msra.mxu1 %v2401_v20  ;;  %v2205_v19 = vcombine.low %v126_v8, %v130_v9  ;;  %v2212_v20 = vcombine.high %v133_v15, %v137_v16 }
  0x84   :  { %1708 = vmatprep.subr.bf16.mxu0 %v2408_v21  ;;  %1790 = vmatprep.subr.bf16.mxu1 %v2410_v22  ;;  %v2214_v21 = vcombine.high %v134_v17, %v138_v18  ;;  %v141_v22 = vld [vmem:[#allocation2 + $0x110] sm:$0xff] }
  0x85   :  { %v2219_v33 = vcombine.low %v141_v22, %v145_v24 }
  0x87   :  { %1709 = vmatpush1.bf16.msra.mxu0 %v2407_v28  ;;  %1791 = vmatpush1.bf16.msra.mxu1 %v2409_v29  ;;  %v2213_v28 = vcombine.low %v134_v17, %v138_v18  ;;  %v2220_v29 = vcombine.high %v141_v22, %v145_v24 }
  0x88   :  { %1710 = vmatprep.subr.bf16.mxu0 %v2416_v30  ;;  %1792 = vmatprep.subr.bf16.mxu1 %v2418_v31  ;;  %v149_v30 = vld [vmem:[#allocation2 + $0x150] sm:$0xff] }
  0x89   :  { %v153_v31 = vld [vmem:[#allocation2 + $0x170] sm:$0xff] }
  0x8a   :  { %v2227_v42 = vcombine.low %v149_v30, %v153_v31 }
  0x8b   :  { %1711 = vmatpush1.bf16.msra.mxu0 %v2415_v35  ;;  %1793 = vmatpush1.bf16.msra.mxu1 %v2417_v36  ;;  %v2228_v35 = vcombine.high %v149_v30, %v153_v31  ;;  %v2230_v36 = vcombine.high %v150_v63, %v154_v32 }
  0x8c   :  { %1712 = vmatprep.subr.bf16.mxu0 %v2424_v37  ;;  %1794 = vmatprep.subr.bf16.mxu1 %v2426_v38  ;;  %v157_v37 = vld [vmem:[#allocation2 + $0x190] sm:$0xff] }
  0x8d   :  { %v161_v38 = vld [vmem:[#allocation2 + $0x1b0] sm:$0xff] }
  0x8e   :  { %v2235_v51 = vcombine.low %v157_v37, %v161_v38 }
  0x8f   :  { %1713 = vmatpush1.bf16.msra.mxu0 %v2423_v44  ;;  %1795 = vmatpush1.bf16.msra.mxu1 %v2425_v46  ;;  %v2236_v44 = vcombine.high %v157_v37, %v161_v38  ;;  %v165_v46 = vld [vmem:[#allocation2 + $0x1d0] sm:$0xff] }
  0x90   :  { %1714 = vmatprep.subr.bf16.mxu0 %v2432_v48  ;;  %1796 = vmatprep.subr.bf16.mxu1 %v2434_v49  ;;  %v169_v48 = vld [vmem:[#allocation2 + $0x1f0] sm:$0xff]  ;;  %v166_v49 = vld [vmem:[#allocation2 + $0x1d8] sm:$0xff] }
  0x91   :  { %v2244_v53 = vcombine.high %v165_v46, %v169_v48  ;;  %v2243_v62 = vcombine.low %v165_v46, %v169_v48  ;;  %v2245_v0 = vcombine.low %v166_v49, %v170_v50 }
  0x93   :  { %1715 = vmatpush1.bf16.msra.mxu0 %v2431_v54  ;;  %1797 = vmatpush1.bf16.msra.mxu1 %v2433_v58  ;;  %v2246_v54 = vcombine.high %v166_v49, %v170_v50  ;;  %v177_v58 = vld [vmem:[#allocation2 + $0x230] sm:$0xff] }
  0x94   :  { %1807 = vmatprep.subr.bf16.mxu0 %v2188_v60  ;;  %1889 = vmatprep.subr.bf16.mxu1 %v2190_v61  ;;  %v174_v60 = vld [vmem:[#allocation2 + $0x218] sm:$0xff]  ;;  %v2252_v2 = vcombine.high %v173_v55, %v177_v58  ;;  %v2251_v56 = vcombine.low %v173_v55, %v177_v58 }
  0x95   :  { %v178_v61 = vld [vmem:[#allocation2 + $0x238] sm:$0xff] }
  0x96   :  { %1717 = vmatmul.mubr.bf16.vlgmr.msra.gmra.mrb[0].mxu0 %v2588_v1  ;;  %1799 = vmatmul.mubr.bf16.vlgmr.msra.gmra.mrb[0].mxu1 %v2588_v1  ;;  %v2254_v3 = vcombine.high %v174_v60, %v178_v61  ;;  %v2253_v7 = vcombine.low %v174_v60, %v178_v61 }
  0x97   :  { %1808 = vmatpush1.bf16.msra.mxu0 %v2187_v4  ;;  %1890 = vmatpush1.bf16.msra.mxu1 %v2189_v5  ;;  %v181_v4 = vld [vmem:[#allocation2 + $0x250] sm:$0xff] }
  0x98   :  { %1809 = vmatprep.subr.bf16.mxu0 %v2196_v6  ;;  %1891 = vmatprep.subr.bf16.mxu1 %v2198_v12  ;;  %v185_v5 = vld [vmem:[#allocation2 + $0x270] sm:$0xff]  ;;  %v182_v6 = vld [vmem:[#allocation2 + $0x258] sm:$0xff] }
  0x99   :  { %1839 = vmatprep.mubr.bf16.mxu0 %v2558_v23  ;;  %1921 = vmatprep.mubr.bf16.mxu1 %v2558_v23  ;;  %v2222_v23 = vcombine.high %v142_v25, %v146_v26  ;;  %v186_v12 = vld [vmem:[#allocation2 + $0x278] sm:$0xff]  ;;  %v2260_v8 = vcombine.high %v181_v4, %v185_v5  ;;  %v2259_v15 = vcombine.low %v181_v4, %v185_v5 }
  0x9a   :  { %v2262_v9 = vcombine.high %v182_v6, %v186_v12  ;;  %v2261_v16 = vcombine.low %v182_v6, %v186_v12 }
  0x9b   :  { %1810 = vmatpush1.bf16.msra.mxu0 %v2195_v10  ;;  %1892 = vmatpush1.bf16.msra.mxu1 %v2197_v11  ;;  %v189_v10 = vld [vmem:[#allocation2 + $0x290] sm:$0xff] }
  0x9c   :  { %1811 = vmatprep.subr.bf16.mxu0 %v2204_v13  ;;  %1893 = vmatprep.subr.bf16.mxu1 %v2206_v14  ;;  %v193_v11 = vld [vmem:[#allocation2 + $0x2b0] sm:$0xff]  ;;  %v190_v13 = vld [vmem:[#allocation2 + $0x298] sm:$0xff] }
  0x9d   :  { %v194_v14 = vld [vmem:[#allocation2 + $0x2b8] sm:$0xff]  ;;  %v2268_v17 = vcombine.high %v189_v10, %v193_v11  ;;  %v2267_v22 = vcombine.low %v189_v10, %v193_v11 }
  0x9e   :  { %v2270_v18 = vcombine.high %v190_v13, %v194_v14  ;;  %v2269_v24 = vcombine.low %v190_v13, %v194_v14 }
  0x9f   :  { %1812 = vmatpush1.bf16.msra.mxu0 %v2203_v57  ;;  %1894 = vmatpush1.bf16.msra.mxu1 %v2205_v19  ;;  %v197_v57 = vld [vmem:[#allocation2 + $0x2d0] sm:$0xff] }
  0xa0   :  { %1813 = vmatprep.subr.bf16.mxu0 %v2212_v20  ;;  %1895 = vmatprep.subr.bf16.mxu1 %v2214_v21  ;;  %v201_v19 = vld [vmem:[#allocation2 + $0x2f0] sm:$0xff]  ;;  %v198_v20 = vld [vmem:[#allocation2 + $0x2d8] sm:$0xff] }
  0xa1   :  { %v202_v21 = vld [vmem:[#allocation2 + $0x2f8] sm:$0xff]  ;;  %v2276_v25 = vcombine.high %v197_v57, %v201_v19  ;;  %v2275_v30 = vcombine.low %v197_v57, %v201_v19 }
  0xa2   :  { %v2278_v26 = vcombine.high %v198_v20, %v202_v21  ;;  %v2277_v31 = vcombine.low %v198_v20, %v202_v21 }
  0xa3   :  { %1814 = vmatpush1.bf16.msra.mxu0 %v2211_v27  ;;  %1896 = vmatpush1.bf16.msra.mxu1 %v2213_v28  ;;  %v205_v27 = vld [vmem:[#allocation2 + $0x310] sm:$0xff] }
  0xa4   :  { %1815 = vmatprep.subr.bf16.mxu0 %v2220_v29  ;;  %1897 = vmatprep.subr.bf16.mxu1 %v2222_v23  ;;  %v209_v28 = vld [vmem:[#allocation2 + $0x330] sm:$0xff]  ;;  %v206_v29 = vld [vmem:[#allocation2 + $0x318] sm:$0xff] }
  0xa5   :  { %v210_v23 = vld [vmem:[#allocation2 + $0x338] sm:$0xff]  ;;  %v2284_v63 = vcombine.high %v205_v27, %v209_v28  ;;  %v2283_v37 = vcombine.low %v205_v27, %v209_v28 }
  0xa6   :  { %v2286_v32 = vcombine.high %v206_v29, %v210_v23  ;;  %v2285_v38 = vcombine.low %v206_v29, %v210_v23  ;;  %v269_v23 = vld [vmem:[#allocation2 + $0x510] sm:$0xff] }
  0xa7   :  { %1816 = vmatpush1.bf16.msra.mxu0 %v2219_v33  ;;  %1898 = vmatpush1.bf16.msra.mxu1 %v2221_v34  ;;  %v213_v33 = vld [vmem:[#allocation2 + $0x350] sm:$0xff] }
  0xa8   :  { %1817 = vmatprep.subr.bf16.mxu0 %v2228_v35  ;;  %1899 = vmatprep.subr.bf16.mxu1 %v2230_v36  ;;  %v217_v34 = vld [vmem:[#allocation2 + $0x370] sm:$0xff]  ;;  %v214_v35 = vld [vmem:[#allocation2 + $0x358] sm:$0xff] }
  0xa9   :  { %v218_v36 = vld [vmem:[#allocation2 + $0x378] sm:$0xff]  ;;  %v2292_v39 = vcombine.high %v213_v33, %v217_v34  ;;  %v2291_v46 = vcombine.low %v213_v33, %v217_v34 }
  0xaa   :  { %v2294_v40 = vcombine.high %v214_v35, %v218_v36  ;;  %v2293_v48 = vcombine.low %v214_v35, %v218_v36  ;;  %v277_v35 = vld [vmem:[#allocation2 + $0x550] sm:$0xff] }
  0xab   :  { %1818 = vmatpush1.bf16.msra.mxu0 %v2227_v42  ;;  %1900 = vmatpush1.bf16.msra.mxu1 %v2229_v43  ;;  %v221_v42 = vld [vmem:[#allocation2 + $0x390] sm:$0xff] }
  0xac   :  { %1819 = vmatprep.subr.bf16.mxu0 %v2236_v44  ;;  %1901 = vmatprep.subr.bf16.mxu1 %v2238_v45  ;;  %v225_v43 = vld [vmem:[#allocation2 + $0x3b0] sm:$0xff]  ;;  %v222_v44 = vld [vmem:[#allocation2 + $0x398] sm:$0xff] }
  0xad   :  { %v226_v45 = vld [vmem:[#allocation2 + $0x3b8] sm:$0xff]  ;;  %v2300_v49 = vcombine.high %v221_v42, %v225_v43  ;;  %v2299_v55 = vcombine.low %v221_v42, %v225_v43  ;;  %v281_v36 = vld [vmem:[#allocation2 + $0x570] sm:$0xff] }
  0xae   :  { %v2302_v50 = vcombine.high %v222_v44, %v226_v45  ;;  %v2301_v58 = vcombine.low %v222_v44, %v226_v45  ;;  %v2356_v42 = vcombine.high %v277_v35, %v281_v36  ;;  %v285_v44 = vld [vmem:[#allocation2 + $0x590] sm:$0xff] }
  0xaf   :  { %1820 = vmatpush1.bf16.msra.mxu0 %v2235_v51  ;;  %1902 = vmatpush1.bf16.msra.mxu1 %v2237_v52  ;;  %v229_v51 = vld [vmem:[#allocation2 + $0x3d0] sm:$0xff] }
  0xb0   :  { %1821 = vmatprep.subr.bf16.mxu0 %v2244_v53  ;;  %1903 = vmatprep.subr.bf16.mxu1 %v2246_v54  ;;  %v233_v52 = vld [vmem:[#allocation2 + $0x3f0] sm:$0xff]  ;;  %v230_v53 = vld [vmem:[#allocation2 + $0x3d8] sm:$0xff] }
  0xb1   :  { %v234_v54 = vld [vmem:[#allocation2 + $0x3f8] sm:$0xff]  ;;  %v2308_v60 = vcombine.high %v229_v51, %v233_v52  ;;  %v2307_v4 = vcombine.low %v229_v51, %v233_v52  ;;  %v289_v45 = vld [vmem:[#allocation2 + $0x5b0] sm:$0xff] }
  0xb2   :  { %v2310_v61 = vcombine.high %v230_v53, %v234_v54  ;;  %v2309_v5 = vcombine.low %v230_v53, %v234_v54  ;;  %v2364_v51 = vcombine.high %v285_v44, %v289_v45  ;;  %v293_v53 = vld [vmem:[#allocation2 + $0x5d0] sm:$0xff] }
  0xb3   :  { %1822 = vmatpush1.bf16.msra.mxu0 %v2243_v62  ;;  %1904 = vmatpush1.bf16.msra.mxu1 %v2245_v0  ;;  %v237_v62 = vld [vmem:[#allocation2 + $0x410] sm:$0xff] }
  0xb4   :  { %1823 = vmatprep.subr.bf16.mxu0 %v2252_v2  ;;  %1905 = vmatprep.subr.bf16.mxu1 %v2254_v3  ;;  %v241_v0 = vld [vmem:[#allocation2 + $0x430] sm:$0xff]  ;;  %v238_v2 = vld [vmem:[#allocation2 + $0x418] sm:$0xff] }
  0xb5   :  { %v242_v3 = vld [vmem:[#allocation2 + $0x438] sm:$0xff]  ;;  %v2316_v6 = vcombine.high %v237_v62, %v241_v0  ;;  %v2315_v10 = vcombine.low %v237_v62, %v241_v0  ;;  %v297_v54 = vld [vmem:[#allocation2 + $0x5f0] sm:$0xff] }
  0xb6   :  { %v2318_v12 = vcombine.high %v238_v2, %v242_v3  ;;  %v2317_v11 = vcombine.low %v238_v2, %v242_v3  ;;  %v2372_v62 = vcombine.high %v293_v53, %v297_v54  ;;  %v301_v2 = vld [vmem:[#allocation2 + $0x610] sm:$0xff] }
  0xb7   :  { %1824 = vmatpush1.bf16.msra.mxu0 %v2251_v56  ;;  %1906 = vmatpush1.bf16.msra.mxu1 %v2253_v7  ;;  %v245_v56 = vld [vmem:[#allocation2 + $0x450] sm:$0xff] }
  0xb8   :  { %1825 = vmatprep.subr.bf16.mxu0 %v2260_v8  ;;  %1907 = vmatprep.subr.bf16.mxu1 %v2262_v9  ;;  %v249_v7 = vld [vmem:[#allocation2 + $0x470] sm:$0xff]  ;;  %v246_v8 = vld [vmem:[#allocation2 + $0x458] sm:$0xff] }
  0xb9   :  { %v250_v9 = vld [vmem:[#allocation2 + $0x478] sm:$0xff]  ;;  %v2324_v13 = vcombine.high %v245_v56, %v249_v7  ;;  %v2323_v57 = vcombine.low %v245_v56, %v249_v7  ;;  %v305_v3 = vld [vmem:[#allocation2 + $0x630] sm:$0xff] }
  0xba   :  { %v2326_v14 = vcombine.high %v246_v8, %v250_v9  ;;  %v2325_v19 = vcombine.low %v246_v8, %v250_v9  ;;  %v2380_v56 = vcombine.high %v301_v2, %v305_v3  ;;  %v309_v8 = vld [vmem:[#allocation2 + $0x650] sm:$0xff] }
  0xbb   :  { %1826 = vmatpush1.bf16.msra.mxu0 %v2259_v15  ;;  %1908 = vmatpush1.bf16.msra.mxu1 %v2261_v16  ;;  %v253_v15 = vld [vmem:[#allocation2 + $0x490] sm:$0xff] }
  0xbc   :  { %1827 = vmatprep.subr.bf16.mxu0 %v2268_v17  ;;  %1909 = vmatprep.subr.bf16.mxu1 %v2270_v18  ;;  %v257_v16 = vld [vmem:[#allocation2 + $0x4b0] sm:$0xff]  ;;  %v254_v17 = vld [vmem:[#allocation2 + $0x498] sm:$0xff] }
  0xbd   :  { %v258_v18 = vld [vmem:[#allocation2 + $0x4b8] sm:$0xff]  ;;  %v2332_v20 = vcombine.high %v253_v15, %v257_v16  ;;  %v2331_v27 = vcombine.low %v253_v15, %v257_v16  ;;  %v313_v9 = vld [vmem:[#allocation2 + $0x670] sm:$0xff] }
  0xbe   :  { %v2334_v21 = vcombine.high %v254_v17, %v258_v18  ;;  %v2388_v15 = vcombine.high %v309_v8, %v313_v9 }
  0xbf   :  { %1828 = vmatpush1.bf16.msra.mxu0 %v2267_v22  ;;  %1910 = vmatpush1.bf16.msra.mxu1 %v2269_v24  ;;  %v261_v22 = vld [vmem:[#allocation2 + $0x4d0] sm:$0xff] }
  0xc0   :  { %1829 = vmatprep.subr.bf16.mxu0 %v2276_v25  ;;  %1911 = vmatprep.subr.bf16.mxu1 %v2278_v26  ;;  %v265_v24 = vld [vmem:[#allocation2 + $0x4f0] sm:$0xff]  ;;  %v262_v25 = vld [vmem:[#allocation2 + $0x4d8] sm:$0xff] }
  0xc1   :  { %v266_v26 = vld [vmem:[#allocation2 + $0x4f8] sm:$0xff]  ;;  %v2340_v28 = vcombine.high %v261_v22, %v265_v24 }
  0xc2   :  { %v2342_v29 = vcombine.high %v262_v25, %v266_v26  ;;  %v2341_v33 = vcombine.low %v262_v25, %v266_v26  ;;  %v325_v25 = vld [vmem:[#allocation2 + $0x6d0] sm:$0xff] }
  0xc3   :  { %1830 = vmatpush1.bf16.msra.mxu0 %v2275_v30  ;;  %1912 = vmatpush1.bf16.msra.mxu1 %v2277_v31  ;;  %v273_v30 = vld [vmem:[#allocation2 + $0x530] sm:$0xff]  ;;  %v270_v31 = vld [vmem:[#allocation2 + $0x518] sm:$0xff] }
  0xc4   :  { %1831 = vmatprep.subr.bf16.mxu0 %v2284_v63  ;;  %1913 = vmatprep.subr.bf16.mxu1 %v2286_v32  ;;  %v274_v63 = vld [vmem:[#allocation2 + $0x538] sm:$0xff]  ;;  %v2339_v32 = vcombine.low %v261_v22, %v265_v24  ;;  %v2348_v34 = vcombine.high %v269_v23, %v273_v30  ;;  %v329_v26 = vld [vmem:[#allocation2 + $0x6f0] sm:$0xff] }
  0xc7   :  { %1832 = vmatpush1.bf16.msra.mxu0 %v2283_v37  ;;  %1914 = vmatpush1.bf16.msra.mxu1 %v2285_v38  ;;  %v278_v37 = vld [vmem:[#allocation2 + $0x558] sm:$0xff] }
  0xc8   :  { %1833 = vmatprep.subr.bf16.mxu0 %v2292_v39  ;;  %1915 = vmatprep.subr.bf16.mxu1 %v2294_v40  ;;  %v282_v38 = vld [vmem:[#allocation2 + $0x578] sm:$0xff]  ;;  %v2347_v39 = vcombine.low %v269_v23, %v273_v30  ;;  %v2349_v40 = vcombine.low %v270_v31, %v274_v63  ;;  %v2404_v23 = vcombine.high %v325_v25, %v329_v26 }
  0xc9   :  { %v2358_v43 = vcombine.high %v278_v37, %v282_v38 }
  0xcb   :  { %1834 = vmatpush1.bf16.msra.mxu0 %v2291_v46  ;;  %1916 = vmatpush1.bf16.msra.mxu1 %v2293_v48  ;;  %v286_v46 = vld [vmem:[#allocation2 + $0x598] sm:$0xff] }
  0xcc   :  { %1835 = vmatprep.subr.bf16.mxu0 %v2300_v49  ;;  %1917 = vmatprep.subr.bf16.mxu1 %v2302_v50  ;;  %v290_v48 = vld [vmem:[#allocation2 + $0x5b8] sm:$0xff]  ;;  %v2355_v49 = vcombine.low %v277_v35, %v281_v36  ;;  %v2357_v50 = vcombine.low %v278_v37, %v282_v38  ;;  %v341_v37 = vld [vmem:[#allocation2 + $0x750] sm:$0xff] }
  0xcd   :  { %v2366_v52 = vcombine.high %v286_v46, %v290_v48  ;;  %v345_v38 = vld [vmem:[#allocation2 + $0x770] sm:$0xff] }
  0xcf   :  { %1836 = vmatpush1.bf16.msra.mxu0 %v2299_v55  ;;  %1918 = vmatpush1.bf16.msra.mxu1 %v2301_v58  ;;  %v294_v55 = vld [vmem:[#allocation2 + $0x5d8] sm:$0xff] }
  0xd0   :  { %1837 = vmatprep.subr.bf16.mxu0 %v2308_v60  ;;  %1919 = vmatprep.subr.bf16.mxu1 %v2310_v61  ;;  %v298_v58 = vld [vmem:[#allocation2 + $0x5f8] sm:$0xff]  ;;  %v2363_v60 = vcombine.low %v285_v44, %v289_v45  ;;  %v2365_v61 = vcombine.low %v286_v46, %v290_v48  ;;  %v2420_v44 = vcombine.high %v341_v37, %v345_v38  ;;  %v349_v46 = vld [vmem:[#allocation2 + $0x790] sm:$0xff] }
  0xd1   :  { %v2374_v0 = vcombine.high %v294_v55, %v298_v58  ;;  %v353_v48 = vld [vmem:[#allocation2 + $0x7b0] sm:$0xff] }
  0xd3   :  { %1838 = vmatpush1.bf16.msra.mxu0 %v2307_v4  ;;  %1920 = vmatpush1.bf16.msra.mxu1 %v2309_v5  ;;  %v302_v4 = vld [vmem:[#allocation2 + $0x618] sm:$0xff] }
  0xd4   :  { %1848 = vmatprep.subr.bf16.mxu0 %v2316_v6  ;;  %1930 = vmatprep.subr.bf16.mxu1 %v2318_v12  ;;  %v306_v5 = vld [vmem:[#allocation2 + $0x638] sm:$0xff]  ;;  %v2371_v6 = vcombine.low %v293_v53, %v297_v54  ;;  %v2373_v12 = vcombine.low %v294_v55, %v298_v58  ;;  %v2428_v53 = vcombine.high %v349_v46, %v353_v48  ;;  %v357_v55 = vld [vmem:[#allocation2 + $0x7d0] sm:$0xff] }
  0xd5   :  { %v2382_v7 = vcombine.high %v302_v4, %v306_v5  ;;  %v361_v58 = vld [vmem:[#allocation2 + $0x7f0] sm:$0xff] }
  0xd6   :  { %1840 = vmatmul.mubr.bf16.vlgmr.msra.gmra.mrb[4].mxu0 %v2577_v47  ;;  %1922 = vmatmul.mubr.bf16.vlgmr.msra.gmra.mrb[4].mxu1 %v2577_v47  ;;  %v2333_v47 = vcombine.low %v254_v17, %v258_v18  ;;  %v317_v17 = vld [vmem:[#allocation2 + $0x690] sm:$0xff] }
  0xd7   :  { %1849 = vmatpush1.bf16.msra.mxu0 %v2315_v10  ;;  %1931 = vmatpush1.bf16.msra.mxu1 %v2317_v11  ;;  %v310_v10 = vld [vmem:[#allocation2 + $0x658] sm:$0xff]  ;;  %v321_v18 = vld [vmem:[#allocation2 + $0x6b0] sm:$0xff] }
  0xd8   :  { %1850 = vmatprep.subr.bf16.mxu0 %v2324_v13  ;;  %1932 = vmatprep.subr.bf16.mxu1 %v2326_v14  ;;  %v314_v11 = vld [vmem:[#allocation2 + $0x678] sm:$0xff]  ;;  %v2379_v13 = vcombine.low %v301_v2, %v305_v3  ;;  %v2381_v14 = vcombine.low %v302_v4, %v306_v5  ;;  %v2396_v22 = vcombine.high %v317_v17, %v321_v18 }
  0xd9   :  { %1880 = vmatprep.mubr.bf16.mxu0 %v2579_v59  ;;  %1962 = vmatprep.mubr.bf16.mxu1 %v2579_v59  ;;  %v2350_v59 = vcombine.high %v270_v31, %v274_v63  ;;  %v2390_v16 = vcombine.high %v310_v10, %v314_v11  ;;  %v333_v31 = vld [vmem:[#allocation2 + $0x710] sm:$0xff]  ;;  %v2436_v2 = vcombine.high %v357_v55, %v361_v58 }
  0xda   :  { %v337_v63 = vld [vmem:[#allocation2 + $0x730] sm:$0xff]  ;;  %v2435_v4 = vcombine.low %v357_v55, %v361_v58 }
  0xdb   :  { %1851 = vmatpush1.bf16.msra.mxu0 %v2323_v57  ;;  %1933 = vmatpush1.bf16.msra.mxu1 %v2325_v19  ;;  %v318_v57 = vld [vmem:[#allocation2 + $0x698] sm:$0xff]  ;;  %v2412_v35 = vcombine.high %v333_v31, %v337_v63 }
  0xdc   :  { %1852 = vmatprep.subr.bf16.mxu0 %v2332_v20  ;;  %1934 = vmatprep.subr.bf16.mxu1 %v2334_v21  ;;  %v322_v19 = vld [vmem:[#allocation2 + $0x6b8] sm:$0xff]  ;;  %v2387_v20 = vcombine.low %v309_v8, %v313_v9  ;;  %v2389_v21 = vcombine.low %v310_v10, %v314_v11 }
  0xdd   :  { %v2398_v24 = vcombine.high %v318_v57, %v322_v19 }
  0xdf   :  { %1853 = vmatpush1.bf16.msra.mxu0 %v2331_v27  ;;  %1935 = vmatpush1.bf16.msra.mxu1 %v2333_v47  ;;  %v326_v27 = vld [vmem:[#allocation2 + $0x6d8] sm:$0xff] }
  0xe0   :  { %1854 = vmatprep.subr.bf16.mxu0 %v2340_v28  ;;  %1936 = vmatprep.subr.bf16.mxu1 %v2342_v29  ;;  %v330_v47 = vld [vmem:[#allocation2 + $0x6f8] sm:$0xff]  ;;  %v2395_v28 = vcombine.low %v317_v17, %v321_v18  ;;  %v2397_v29 = vcombine.low %v318_v57, %v322_v19 }
  0xe1   :  { %v2406_v30 = vcombine.high %v326_v27, %v330_v47 }
  0xe3   :  { %1855 = vmatpush1.bf16.msra.mxu0 %v2339_v32  ;;  %1937 = vmatpush1.bf16.msra.mxu1 %v2341_v33  ;;  %v334_v32 = vld [vmem:[#allocation2 + $0x718] sm:$0xff] }
  0xe4   :  { %1856 = vmatprep.subr.bf16.mxu0 %v2348_v34  ;;  %1938 = vmatprep.subr.bf16.mxu1 %v2350_v59  ;;  %v338_v33 = vld [vmem:[#allocation2 + $0x738] sm:$0xff]  ;;  %v2403_v34 = vcombine.low %v325_v25, %v329_v26  ;;  %v2405_v59 = vcombine.low %v326_v27, %v330_v47 }
  0xe5   :  { %v2414_v36 = vcombine.high %v334_v32, %v338_v33 }
  0xe7   :  { %1857 = vmatpush1.bf16.msra.mxu0 %v2347_v39  ;;  %1939 = vmatpush1.bf16.msra.mxu1 %v2349_v40  ;;  %v342_v39 = vld [vmem:[#allocation2 + $0x758] sm:$0xff] }
  0xe8   :  { %1858 = vmatprep.subr.bf16.mxu0 %v2356_v42  ;;  %1940 = vmatprep.subr.bf16.mxu1 %v2358_v43  ;;  %v346_v40 = vld [vmem:[#allocation2 + $0x778] sm:$0xff]  ;;  %v2411_v42 = vcombine.low %v333_v31, %v337_v63  ;;  %v2413_v43 = vcombine.low %v334_v32, %v338_v33 }
  0xe9   :  { %v2422_v45 = vcombine.high %v342_v39, %v346_v40 }
  0xeb   :  { %1859 = vmatpush1.bf16.msra.mxu0 %v2355_v49  ;;  %1941 = vmatpush1.bf16.msra.mxu1 %v2357_v50  ;;  %v350_v49 = vld [vmem:[#allocation2 + $0x798] sm:$0xff] }
  0xec   :  { %1860 = vmatprep.subr.bf16.mxu0 %v2364_v51  ;;  %1942 = vmatprep.subr.bf16.mxu1 %v2366_v52  ;;  %v354_v50 = vld [vmem:[#allocation2 + $0x7b8] sm:$0xff]  ;;  %v2419_v51 = vcombine.low %v341_v37, %v345_v38  ;;  %v2421_v52 = vcombine.low %v342_v39, %v346_v40 }
  0xed   :  { %v2430_v54 = vcombine.high %v350_v49, %v354_v50 }
  0xef   :  { %1861 = vmatpush1.bf16.msra.mxu0 %v2363_v60  ;;  %1943 = vmatpush1.bf16.msra.mxu1 %v2365_v61  ;;  %v358_v60 = vld [vmem:[#allocation2 + $0x7d8] sm:$0xff] }
  0xf0   :  { %1862 = vmatprep.subr.bf16.mxu0 %v2372_v62  ;;  %1944 = vmatprep.subr.bf16.mxu1 %v2374_v0  ;;  %v362_v61 = vld [vmem:[#allocation2 + $0x7f8] sm:$0xff]  ;;  %v2427_v62 = vcombine.low %v349_v46, %v353_v48  ;;  %v2429_v0 = vcombine.low %v350_v49, %v354_v50 }
  0xf1   :  { %v2438_v3 = vcombine.high %v358_v60, %v362_v61  ;;  %v2437_v5 = vcombine.low %v358_v60, %v362_v61 }
  0xf3   :  { %1863 = vmatpush1.bf16.msra.mxu0 %v2371_v6  ;;  %1945 = vmatpush1.bf16.msra.mxu1 %v2373_v12 }
  0xf4   :  { %1864 = vmatprep.subr.bf16.mxu0 %v2380_v56  ;;  %1946 = vmatprep.subr.bf16.mxu1 %v2382_v7 }
  0xf7   :  { %1865 = vmatpush1.bf16.msra.mxu0 %v2379_v13  ;;  %1947 = vmatpush1.bf16.msra.mxu1 %v2381_v14 }
  0xf8   :  { %1866 = vmatprep.subr.bf16.mxu0 %v2388_v15  ;;  %1948 = vmatprep.subr.bf16.mxu1 %v2390_v16 }
  0xfb   :  { %1867 = vmatpush1.bf16.msra.mxu0 %v2387_v20  ;;  %1949 = vmatpush1.bf16.msra.mxu1 %v2389_v21 }
  0xfc   :  { %1868 = vmatprep.subr.bf16.mxu0 %v2396_v22  ;;  %1950 = vmatprep.subr.bf16.mxu1 %v2398_v24  ;;  %v2494_v22 = vmov 1983009808  }
  0xfd   :  { %v2139_v24 = vunpack.c.l.s4 %v2494_v22 }
  0xff   :  { %1869 = vmatpush1.bf16.msra.mxu0 %v2395_v28  ;;  %1951 = vmatpush1.bf16.msra.mxu1 %v2397_v29 }
 0x100   :  { %1870 = vmatprep.subr.bf16.mxu0 %v2404_v23  ;;  %1952 = vmatprep.subr.bf16.mxu1 %v2406_v30 }
 0x103   :  { %1871 = vmatpush1.bf16.msra.mxu0 %v2403_v34  ;;  %1953 = vmatpush1.bf16.msra.mxu1 %v2405_v59 }
 0x104   :  { %1872 = vmatprep.subr.bf16.mxu0 %v2412_v35  ;;  %1954 = vmatprep.subr.bf16.mxu1 %v2414_v36 }
 0x107   :  { %1873 = vmatpush1.bf16.msra.mxu0 %v2411_v42  ;;  %1955 = vmatpush1.bf16.msra.mxu1 %v2413_v43 }
 0x108   :  { %1874 = vmatprep.subr.bf16.mxu0 %v2420_v44  ;;  %1956 = vmatprep.subr.bf16.mxu1 %v2422_v45 }
 0x10b   :  { %1875 = vmatpush1.bf16.msra.mxu0 %v2419_v51  ;;  %1957 = vmatpush1.bf16.msra.mxu1 %v2421_v52 }
 0x10c   :  { %1876 = vmatprep.subr.bf16.mxu0 %v2428_v53  ;;  %1958 = vmatprep.subr.bf16.mxu1 %v2430_v54 }
 0x10f   :  { %1877 = vmatpush1.bf16.msra.mxu0 %v2427_v62  ;;  %1959 = vmatpush1.bf16.msra.mxu1 %v2429_v0 }
 0x110   :  { %1878 = vmatprep.subr.bf16.mxu0 %v2436_v2  ;;  %1960 = vmatprep.subr.bf16.mxu1 %v2438_v3  ;;  %v2140_v2 = vunpack.c.0.s8 %v2139_v24 }
 0x113   :  { %1879 = vmatpush1.bf16.msra.mxu0 %v2435_v4  ;;  %1961 = vmatpush1.bf16.msra.mxu1 %v2437_v5 }
 0x116   :  { %1881 = vmatmul.mubr.bf16.vlgmr.msra.gmra.mrb[4].mxu0 %v2588_v1  ;;  %1963 = vmatmul.mubr.bf16.vlgmr.msra.gmra.mrb[4].mxu1 %v2588_v1 }
 0x169   :  { %v1718_v6 = vpop.f32.mrb[0].mxu0  ;;  %v1800_v56 = vpop.f32.mrb[0].mxu1 }
 0x16a   :  { %v1971_v12 = vpack.c.bf16 %v1718_v6, %v1718_v6  ;;  %v1720_v7 = vpop.f32.mrb[1].mxu0  ;;  %v1973_v8 = vpack.c.bf16 %v1800_v56, %v1800_v56  ;;  %v1802_v11 = vpop.f32.mrb[1].mxu1 }
 0x16b   :  { %v1972_v9 = vpack.c.bf16 %v1720_v7, %v1720_v7  ;;  %v2443_v10 = vpack.c.bf16 %v1720_v7, %v1718_v6  ;;  %v1722_v13 = vpop.f32.mrb[2].mxu0  ;;  %v1974_v15 = vpack.c.bf16 %v1802_v11, %v1802_v11  ;;  %v2444_v16 = vpack.c.bf16 %v1802_v11, %v1800_v56  ;;  %v1804_v17 = vpop.f32.mrb[2].mxu1 }
 0x16c   :  { %v2007_v14 = vunpack.c.l.bf16 %v1971_v12  ;;  %v1723_v18 = vpop.f32.mrb[3].mxu0  ;;  %v2009_v57 = vunpack.c.l.bf16 %v1973_v8  ;;  %v1805_v19 = vpop.f32.mrb[3].mxu1 }
 0x16d   :  { %2003 = vst [vmem:[%s2637_s4] sm:$0xff] %v2443_v10  ;;  %v2008_v1 = vunpack.c.l.bf16 %v1972_v9  ;;  %2004 = vst [vmem:[%s2637_s4 + $0x8] sm:$0xff] %v2444_v16  ;;  %v2010_v25 = vunpack.c.l.bf16 %v1974_v15 }
 0x16e   :  { %v2015_v20 = vrot.slane %v2007_v14, 4  ;;  %v2063_v21 = vmul.f32 %v2007_v14, %v2007_v14  ;;  %v2027_v26 = vrot.slane %v2009_v57, 4  ;;  %v2065_v27 = vmul.f32 %v2009_v57, %v2009_v57 }
 0x16f   :  { %v2021_v47 = vrot.slane %v2008_v1, 4  ;;  %v2064_v28 = vmul.f32 %v2008_v1, %v2008_v1  ;;  %v2033_v30 = vrot.slane %v2010_v25, 4  ;;  %v2066_v31 = vmul.f32 %v2010_v25, %v2010_v25 }
 0x170   :  { %v2016_v29 = vadd.f32 %v2015_v20, %v2007_v14  ;;  %v2071_v23 = vrot.slane %v2063_v21, 4  ;;  %v2028_v63 = vadd.f32 %v2027_v26, %v2009_v57  ;;  %v2083_v32 = vrot.slane %v2065_v27, 4 }
 0x171   :  { %v2022_v33 = vadd.f32 %v2021_v47, %v2008_v1  ;;  %v2077_v34 = vrot.slane %v2064_v28, 4  ;;  %v2034_v36 = vadd.f32 %v2033_v30, %v2010_v25  ;;  %v2089_v37 = vrot.slane %v2066_v31, 4 }
 0x172   :  { %v2017_v59 = vrot.slane %v2016_v29, 2  ;;  %v2072_v35 = vadd.f32 %v2071_v23, %v2063_v21  ;;  %v2029_v38 = vrot.slane %v2028_v63, 2  ;;  %v2084_v39 = vadd.f32 %v2083_v32, %v2065_v27 }
 0x173   :  { %v2023_v40 = vrot.slane %v2022_v33, 2  ;;  %v2078_v42 = vadd.f32 %v2077_v34, %v2064_v28  ;;  %v2035_v45 = vrot.slane %v2034_v36, 2  ;;  %v2090_v46 = vadd.f32 %v2089_v37, %v2066_v31 }
 0x174   :  { %v2018_v43 = vadd.f32 %v2017_v59, %v2016_v29  ;;  %v2073_v44 = vrot.slane %v2072_v35, 2  ;;  %v2030_v48 = vadd.f32 %v2029_v38, %v2028_v63  ;;  %v2085_v49 = vrot.slane %v2084_v39, 2 }
 0x175   :  { %v2024_v50 = vadd.f32 %v2023_v40, %v2022_v33  ;;  %v2079_v51 = vrot.slane %v2078_v42, 2  ;;  %v2036_v54 = vadd.f32 %v2035_v45, %v2034_v36  ;;  %v2091_v55 = vrot.slane %v2090_v46, 2 }
 0x176   :  { %v2019_v52 = vrot.slane %v2018_v43, 1  ;;  %v2074_v53 = vadd.f32 %v2073_v44, %v2072_v35  ;;  %v2031_v58 = vrot.slane %v2030_v48, 1  ;;  %v2086_v60 = vadd.f32 %v2085_v49, %v2084_v39 }
 0x177   :  { %v2025_v61 = vrot.slane %v2024_v50, 1  ;;  %v2080_v62 = vadd.f32 %v2079_v51, %v2078_v42  ;;  %v2037_v3 = vrot.slane %v2036_v54, 1  ;;  %v2092_v4 = vadd.f32 %v2091_v55, %v2090_v46 }
 0x178   :  { %v2075_v0 = vrot.slane %v2074_v53, 1  ;;  %v2087_v5 = vrot.slane %v2086_v60, 1  ;;  %v2020_v12 = vadd.f32 %v2019_v52, %v2018_v43  ;;  %v2032_v8 = vadd.f32 %v2031_v58, %v2030_v48 }
 0x179   :  { %v2081_v6 = vrot.slane %v2080_v62, 1  ;;  %v2093_v7 = vrot.slane %v2092_v4, 1  ;;  %v2026_v10 = vadd.f32 %v2025_v61, %v2024_v50  ;;  %v2608_v14 = vsub.s32 %v2140_v2, %v2537_v41 }
 0x17a   :  { %v2076_v56 = vadd.f32 %v2075_v0, %v2074_v53  ;;  %v2088_v9 = vadd.f32 %v2087_v5, %v2086_v60  ;;  %v2038_v15 = vadd.f32 %v2037_v3, %v2036_v54 }
 0x17b   :  { %v2082_v11 = vadd.f32 %v2081_v6, %v2080_v62  ;;  %v2094_v16 = vadd.f32 %v2093_v7, %v2092_v4 }
 0x17c   :  { %v2120_v13 = vsel %vm2119_vm4, %v2020_v12, %v2076_v56  ;;  %v2122_v17 = vsel %vm2119_vm4, %v2032_v8, %v2088_v9 }
 0x17d   :  { %v2121_v18 = vsel %vm2119_vm4, %v2026_v10, %v2082_v11  ;;  %v2123_v1 = vsel %vm2119_vm4, %v2038_v15, %v2094_v16 }
 0x17e   :  { %v2136_v57 = vcombine.low %v2120_v13, %v2121_v18  ;;  %v2137_v19 = vcombine.low %v2122_v17, %v2123_v1 }
 0x180   :  { %v2144_v20 = vrot.slane %v2136_v57, %v2608_v14  ;;  %v2151_v21 = vrot.slane %v2137_v19, %v2608_v14 }
 0x182   :  { %v2152_v22 = vcombine.low %v2144_v20, %v2151_v21 }
 0x184   :  { %2172 = vst [vmem:[%s2638_s5] sm:$0xff] %v2152_v22 }
 0x1e9   :  { %v1882_v41 = vpop.f32.mrb[4].mxu0  ;;  %v1964_v25 = vpop.f32.mrb[4].mxu1 }
 0x1ea   :  { %v1975_v24 = vpack.c.bf16 %v1882_v41, %v1882_v41  ;;  %v1884_v26 = vpop.f32.mrb[5].mxu0  ;;  %v1977_v27 = vpack.c.bf16 %v1964_v25, %v1964_v25  ;;  %v1966_v29 = vpop.f32.mrb[5].mxu1 }
 0x1eb   :  { %v1976_v47 = vpack.c.bf16 %v1884_v26, %v1884_v26  ;;  %v2445_v28 = vpack.c.bf16 %v1884_v26, %v1882_v41  ;;  %v1886_v23 = vpop.f32.mrb[6].mxu0  ;;  %v1978_v31 = vpack.c.bf16 %v1966_v29, %v1966_v29  ;;  %v2446_v63 = vpack.c.bf16 %v1966_v29, %v1964_v25  ;;  %v1968_v32 = vpop.f32.mrb[6].mxu1 }
 0x1ec   :  { %v2011_v30 = vunpack.c.l.bf16 %v1975_v24  ;;  %v1887_v33 = vpop.f32.mrb[7].mxu0  ;;  %v2013_v34 = vunpack.c.l.bf16 %v1977_v27  ;;  %v1969_v35 = vpop.f32.mrb[7].mxu1 }
 0x1ed   :  { %2005 = vst [vmem:[%s2637_s4 + $0x10] sm:$0xff] %v2445_v28  ;;  %v2012_v59 = vunpack.c.l.bf16 %v1976_v47  ;;  %2006 = vst [vmem:[%s2637_s4 + $0x18] sm:$0xff] %v2446_v63  ;;  %v2014_v38 = vunpack.c.l.bf16 %v1978_v31 }
 0x1ee   :  { %v2039_v36 = vrot.slane %v2011_v30, 4  ;;  %v2067_v37 = vmul.f32 %v2011_v30, %v2011_v30  ;;  %v2051_v39 = vrot.slane %v2013_v34, 4  ;;  %v2069_v40 = vmul.f32 %v2013_v34, %v2013_v34 }
 0x1ef   :  { %v2045_v42 = vrot.slane %v2012_v59, 4  ;;  %v2068_v43 = vmul.f32 %v2012_v59, %v2012_v59  ;;  %v2057_v46 = vrot.slane %v2014_v38, 4  ;;  %v2070_v48 = vmul.f32 %v2014_v38, %v2014_v38 }
 0x1f0   :  { %v2040_v44 = vadd.f32 %v2039_v36, %v2011_v30  ;;  %v2095_v45 = vrot.slane %v2067_v37, 4  ;;  %v2052_v49 = vadd.f32 %v2051_v39, %v2013_v34  ;;  %v2107_v50 = vrot.slane %v2069_v40, 4 }
 0x1f1   :  { %v2046_v51 = vadd.f32 %v2045_v42, %v2012_v59  ;;  %v2101_v52 = vrot.slane %v2068_v43, 4  ;;  %v2058_v55 = vadd.f32 %v2057_v46, %v2014_v38  ;;  %v2113_v58 = vrot.slane %v2070_v48, 4 }
 0x1f2   :  { %v2041_v53 = vrot.slane %v2040_v44, 2  ;;  %v2096_v54 = vadd.f32 %v2095_v45, %v2067_v37  ;;  %v2053_v60 = vrot.slane %v2052_v49, 2  ;;  %v2108_v61 = vadd.f32 %v2107_v50, %v2069_v40 }
 0x1f3   :  { %v2047_v62 = vrot.slane %v2046_v51, 2  ;;  %v2102_v0 = vadd.f32 %v2101_v52, %v2068_v43  ;;  %v2059_v4 = vrot.slane %v2058_v55, 2  ;;  %v2114_v5 = vadd.f32 %v2113_v58, %v2070_v48 }
 0x1f4   :  { %v2042_v2 = vadd.f32 %v2041_v53, %v2040_v44  ;;  %v2097_v3 = vrot.slane %v2096_v54, 2  ;;  %v2054_v6 = vadd.f32 %v2053_v60, %v2052_v49  ;;  %v2109_v12 = vrot.slane %v2108_v61, 2 }
 0x1f5   :  { %v2048_v56 = vadd.f32 %v2047_v62, %v2046_v51  ;;  %v2103_v7 = vrot.slane %v2102_v0, 2  ;;  %v2060_v10 = vadd.f32 %v2059_v4, %v2058_v55  ;;  %v2115_v11 = vrot.slane %v2114_v5, 2 }
 0x1f6   :  { %v2043_v8 = vrot.slane %v2042_v2, 1  ;;  %v2098_v9 = vadd.f32 %v2097_v3, %v2096_v54  ;;  %v2055_v13 = vrot.slane %v2054_v6, 1  ;;  %v2110_v15 = vadd.f32 %v2109_v12, %v2108_v61 }
 0x1f7   :  { %v2049_v16 = vrot.slane %v2048_v56, 1  ;;  %v2104_v17 = vadd.f32 %v2103_v7, %v2102_v0  ;;  %v2061_v57 = vrot.slane %v2060_v10, 1  ;;  %v2116_v1 = vadd.f32 %v2115_v11, %v2114_v5 }
 0x1f8   :  { %v2099_v18 = vrot.slane %v2098_v9, 1  ;;  %v2111_v19 = vrot.slane %v2110_v15, 1  ;;  %v2044_v21 = vadd.f32 %v2043_v8, %v2042_v2  ;;  %v2056_v24 = vadd.f32 %v2055_v13, %v2054_v6 }
 0x1f9   :  { %v2105_v20 = vrot.slane %v2104_v17, 1  ;;  %v2117_v41 = vrot.slane %v2116_v1, 1  ;;  %v2050_v26 = vadd.f32 %v2049_v16, %v2048_v56  ;;  %v2062_v28 = vadd.f32 %v2061_v57, %v2060_v10 }
 0x1fa   :  { %v2100_v22 = vadd.f32 %v2099_v18, %v2098_v9  ;;  %v2112_v25 = vadd.f32 %v2111_v19, %v2110_v15 }
 0x1fb   :  { %v2106_v27 = vadd.f32 %v2105_v20, %v2104_v17  ;;  %v2118_v29 = vadd.f32 %v2117_v41, %v2116_v1 }
 0x1fc   :  { %v2124_v47 = vsel %vm2119_vm4, %v2044_v21, %v2100_v22  ;;  %v2126_v23 = vsel %vm2119_vm4, %v2056_v24, %v2112_v25 }
 0x1fd   :  { %v2125_v30 = vsel %vm2119_vm4, %v2050_v26, %v2106_v27  ;;  %v2127_v63 = vsel %vm2119_vm4, %v2062_v28, %v2118_v29 }
 0x1fe   :  { %v2153_v31 = vcombine.low %v2124_v47, %v2125_v30  ;;  %v2154_v32 = vcombine.low %v2126_v23, %v2127_v63 }
 0x200   :  { %v2161_v33 = vrot.slane %v2153_v31, %v2608_v14  ;;  %v2168_v34 = vrot.slane %v2154_v32, %v2608_v14 }
 0x202   :  { %v2169_v59 = vcombine.low %v2161_v33, %v2168_v34 }
 0x204   :  { %2173 = vst [vmem:[%s2638_s5 + $0x8] sm:$0xff] %v2169_v59 }
 0x205   :  { %2182 = vsyncpa [#allocation3], 1 }

// kernel: generator_forward.7
= control target key start
LH: loop header
LB: loop body
LE: loop exit
PB: predicated region body
PF: predicated region fallthrough
CT: control target
= control target key end

     0   :  { %v36_v37 = vlaneseq  ;;  %s6541_s0 = inlined_call_operand.vmem [shape: bf16[8,1024], index: 0, kind: input, shape index: {}]   ;;  %s6542_s1 = inlined_call_operand.vmem [shape: f32[1,1024], index: 1, kind: input, shape index: {}]   ;;  %s6543_s2 = inlined_call_operand.vmem [shape: f32[1,1024], index: 2, kind: input, shape index: {}]   ;;  %s6544_s3 = inlined_call_operand.vmem [shape: bf16[1024,784], index: 3, kind: input, shape index: {}]   ;;  %s6545_s4 = inlined_call_operand.vmem [shape: f32[1,784], index: 4, kind: input, shape index: {}]   ;;  %s6546_s5 = inlined_call_operand.hbm [shape: bf16[8,784], index: 5, kind: output, shape index: {}]  }
   0x1   :  { %v4311_v0 = vld [vmem:[%s6544_s3 + $0x4] ss:$28 sps:$4 sm:$0xff]   ;;  %v4317_v4 = vld [vmem:[%s6544_s3 + $0x3c] ss:$28 sps:$4 sm:$0xff]   ;;  %v4323_v8 = vld [vmem:[%s6544_s3 + $0x74] ss:$28 sps:$4 sm:$0xff]  }
   0x2   :  { %v4313_v1 = vld [vmem:[%s6544_s3 + $0x384] ss:$28 sps:$4 sm:$0xff]   ;;  %3019 = vmatprep.subr.bf16.mxu1 %v4311_v0  ;;  %v4319_v5 = vld [vmem:[%s6544_s3 + $0x3bc] ss:$28 sps:$4 sm:$0xff]   ;;  %v4325_v9 = vld [vmem:[%s6544_s3 + $0x3f4] ss:$28 sps:$4 sm:$0xff]  }
   0x3   :  { %v4315_v2 = vld [vmem:[%s6544_s3] ss:$28 sps:$4 sm:$0xff]   ;;  %3060 = vmatprep.subr.bf16.mxu0 %v4313_v1  ;;  %v4321_v6 = vld [vmem:[%s6544_s3 + $0x38] ss:$28 sps:$4 sm:$0xff]   ;;  %v4327_v10 = vld [vmem:[%s6544_s3 + $0x70] ss:$28 sps:$4 sm:$0xff]  }
   0x4   :  { %v4316_v3 = vld [vmem:[%s6544_s3 + $0x380] ss:$28 sps:$4 sm:$0xff]   ;;  %3020 = vmatpush1.bf16.msra.mxu1 %v4315_v2  ;;  %v4322_v7 = vld [vmem:[%s6544_s3 + $0x3b8] ss:$28 sps:$4 sm:$0xff]   ;;  %v4328_v11 = vld [vmem:[%s6544_s3 + $0x3f0] ss:$28 sps:$4 sm:$0xff]  }
   0x5   :  { %3061 = vmatpush1.bf16.msra.mxu0 %v4316_v3  ;;  %3021 = vmatprep.subr.bf16.mxu1 %v4317_v4  ;;  %v4329_v12 = vld [vmem:[%s6544_s3 + $0xac] ss:$28 sps:$4 sm:$0xff]   ;;  %v4335_v16 = vld [vmem:[%s6544_s3 + $0xe4] ss:$28 sps:$4 sm:$0xff]   ;;  %v4341_v20 = vld [vmem:[%s6544_s3 + $0x11c] ss:$28 sps:$4 sm:$0xff]  }
   0x6   :  { %3062 = vmatprep.subr.bf16.mxu0 %v4319_v5  ;;  %v4331_v13 = vld [vmem:[%s6544_s3 + $0x42c] ss:$28 sps:$4 sm:$0xff]   ;;  %v4337_v17 = vld [vmem:[%s6544_s3 + $0x464] ss:$28 sps:$4 sm:$0xff]   ;;  %v4343_v21 = vld [vmem:[%s6544_s3 + $0x49c] ss:$28 sps:$4 sm:$0xff]  }
   0x7   :  { %v4333_v14 = vld [vmem:[%s6544_s3 + $0xa8] ss:$28 sps:$4 sm:$0xff]   ;;  %v4339_v18 = vld [vmem:[%s6544_s3 + $0xe0] ss:$28 sps:$4 sm:$0xff]   ;;  %v4345_v22 = vld [vmem:[%s6544_s3 + $0x118] ss:$28 sps:$4 sm:$0xff]  }
   0x8   :  { %3022 = vmatpush1.bf16.msra.mxu1 %v4321_v6  ;;  %v4334_v15 = vld [vmem:[%s6544_s3 + $0x428] ss:$28 sps:$4 sm:$0xff]   ;;  %v4340_v19 = vld [vmem:[%s6544_s3 + $0x460] ss:$28 sps:$4 sm:$0xff]   ;;  %v4346_v23 = vld [vmem:[%s6544_s3 + $0x498] ss:$28 sps:$4 sm:$0xff]  }
   0x9   :  { %3063 = vmatpush1.bf16.msra.mxu0 %v4322_v7  ;;  %3023 = vmatprep.subr.bf16.mxu1 %v4323_v8  ;;  %v4347_v24 = vld [vmem:[%s6544_s3 + $0x154] ss:$28 sps:$4 sm:$0xff]   ;;  %v4353_v28 = vld [vmem:[%s6544_s3 + $0x18c] ss:$28 sps:$4 sm:$0xff]   ;;  %v4359_v32 = vld [vmem:[%s6544_s3 + $0x1c4] ss:$28 sps:$4 sm:$0xff]  }
   0xa   :  { %3064 = vmatprep.subr.bf16.mxu0 %v4325_v9  ;;  %v4349_v25 = vld [vmem:[%s6544_s3 + $0x4d4] ss:$28 sps:$4 sm:$0xff]   ;;  %v4355_v29 = vld [vmem:[%s6544_s3 + $0x50c] ss:$28 sps:$4 sm:$0xff]   ;;  %v4361_v33 = vld [vmem:[%s6544_s3 + $0x544] ss:$28 sps:$4 sm:$0xff]  }
   0xb   :  { %v4351_v26 = vld [vmem:[%s6544_s3 + $0x150] ss:$28 sps:$4 sm:$0xff]   ;;  %v4357_v30 = vld [vmem:[%s6544_s3 + $0x188] ss:$28 sps:$4 sm:$0xff]   ;;  %v4363_v34 = vld [vmem:[%s6544_s3 + $0x1c0] ss:$28 sps:$4 sm:$0xff]  }
   0xc   :  { %3024 = vmatpush1.bf16.msra.mxu1 %v4327_v10  ;;  %v4352_v27 = vld [vmem:[%s6544_s3 + $0x4d0] ss:$28 sps:$4 sm:$0xff]   ;;  %v4358_v31 = vld [vmem:[%s6544_s3 + $0x508] ss:$28 sps:$4 sm:$0xff]   ;;  %v4364_v35 = vld [vmem:[%s6544_s3 + $0x540] ss:$28 sps:$4 sm:$0xff]  }
   0xd   :  { %3065 = vmatpush1.bf16.msra.mxu0 %v4328_v11  ;;  %3025 = vmatprep.subr.bf16.mxu1 %v4329_v12  ;;  %v4365_v36 = vld [vmem:[%s6544_s3 + $0x1fc] ss:$28 sps:$4 sm:$0xff]   ;;  %v4371_v41 = vld [vmem:[%s6544_s3 + $0x234] ss:$28 sps:$4 sm:$0xff]   ;;  %v5143_v42 = vshrl.u32 %v36_v37, 7  ;;  %v22_v53 = vld [vmem:[%s6541_s0] sm:$0xff] }
   0xe   :  { %3066 = vmatprep.subr.bf16.mxu0 %v4331_v13  ;;  %v4367_v38 = vld [vmem:[%s6544_s3 + $0x57c] ss:$28 sps:$4 sm:$0xff]   ;;  %v4373_v43 = vld [vmem:[%s6544_s3 + $0x5b4] ss:$28 sps:$4 sm:$0xff]   ;;  %v4377_v46 = vld [vmem:[%s6544_s3 + $0x26c] ss:$28 sps:$4 sm:$0xff]   ;;  %v27_v55 = vunpack.c.h.bf16 %v22_v53  ;;  %v26_v58 = vunpack.c.l.bf16 %v22_v53 }
   0xf   :  { %v4369_v39 = vld [vmem:[%s6544_s3 + $0x1f8] ss:$28 sps:$4 sm:$0xff]   ;;  %v4375_v44 = vld [vmem:[%s6544_s3 + $0x230] ss:$28 sps:$4 sm:$0xff]   ;;  %v5158_v47 = vsub.s32 1, %v5143_v42  ;;  %v5161_v48 = vsub.s32 0, %v5143_v42 }
  0x10   :  { %3026 = vmatpush1.bf16.msra.mxu1 %v4333_v14  ;;  %v4370_v40 = vld [vmem:[%s6544_s3 + $0x578] ss:$28 sps:$4 sm:$0xff]   ;;  %v4376_v45 = vld [vmem:[%s6544_s3 + $0x5b0] ss:$28 sps:$4 sm:$0xff]   ;;  %v5167_v50 = vsub.s32 3, %v5143_v42  ;;  %v5179_v54 = vsub.s32 2, %v5143_v42 }
  0x11   :  { %3067 = vmatpush1.bf16.msra.mxu0 %v4334_v15  ;;  %3027 = vmatprep.subr.bf16.mxu1 %v4335_v16  ;;  %v4379_v49 = vld [vmem:[%s6544_s3 + $0x5ec] ss:$28 sps:$4 sm:$0xff]   ;;  %v5184_v56 = vld [vmem:[%s6542_s1] sm:$0xff]  ;;  %v4389_v12 = vld [vmem:[%s6544_s3 + $0x2dc] ss:$28 sps:$4 sm:$0xff]  }
  0x12   :  { %3068 = vmatprep.subr.bf16.mxu0 %v4337_v17  ;;  %v4381_v51 = vld [vmem:[%s6544_s3 + $0x268] ss:$28 sps:$4 sm:$0xff]   ;;  %v43_v61 = vrot.slane %v5184_v56, %v5158_v47  ;;  %v39_v63 = vrot.slane %v5184_v56, %v5161_v48  ;;  %v51_v2 = vrot.slane %v5184_v56, %v5167_v50  ;;  %v47_v6 = vrot.slane %v5184_v56, %v5179_v54  ;;  %v4387_v7 = vld [vmem:[%s6544_s3 + $0x2a0] ss:$28 sps:$4 sm:$0xff]  }
  0x13   :  { %v4382_v52 = vld [vmem:[%s6544_s3 + $0x5e8] ss:$28 sps:$4 sm:$0xff]   ;;  %v4388_v8 = vld [vmem:[%s6544_s3 + $0x620] ss:$28 sps:$4 sm:$0xff]  }
  0x14   :  { %3028 = vmatpush1.bf16.msra.mxu1 %v4339_v18  ;;  %v5189_v57 = vld [vmem:[%s6543_s2] sm:$0xff]  ;;  %v23_v59 = vld [vmem:[%s6541_s0 + $0x8] sm:$0xff]  ;;  %v77_v5 = vmul.f32 %v43_v61, %v27_v55  ;;  %v76_v9 = vmul.f32 %v39_v63, %v26_v58  ;;  %v4391_v16 = vld [vmem:[%s6544_s3 + $0x65c] ss:$28 sps:$4 sm:$0xff]  }
  0x15   :  { %3069 = vmatpush1.bf16.msra.mxu0 %v4340_v19  ;;  %3029 = vmatprep.subr.bf16.mxu1 %v4341_v20  ;;  %v4383_v60 = vld [vmem:[%s6544_s3 + $0x2a4] ss:$28 sps:$4 sm:$0xff]   ;;  %v93_v62 = vrot.slane %v5189_v57, %v5158_v47  ;;  %v29_v0 = vunpack.c.h.bf16 %v23_v59  ;;  %v101_v3 = vrot.slane %v5189_v57, %v5167_v50  ;;  %v28_v4 = vunpack.c.l.bf16 %v23_v59  ;;  %v4393_v19 = vld [vmem:[%s6544_s3 + $0x2d8] ss:$28 sps:$4 sm:$0xff]  }
  0x16   :  { %3070 = vmatprep.subr.bf16.mxu0 %v4343_v21  ;;  %v4385_v1 = vld [vmem:[%s6544_s3 + $0x624] ss:$28 sps:$4 sm:$0xff]   ;;  %v89_v10 = vrot.slane %v5189_v57, %v5161_v48  ;;  %v97_v15 = vrot.slane %v5189_v57, %v5179_v54  ;;  %v4394_v21 = vld [vmem:[%s6544_s3 + $0x658] ss:$28 sps:$4 sm:$0xff]  }
  0x17   :  { %v79_v11 = vmul.f32 %v51_v2, %v29_v0  ;;  %v127_v13 = vadd.f32 %v93_v62, %v77_v5  ;;  %v78_v14 = vmul.f32 %v47_v6, %v28_v4  ;;  %v4415_v53 = vld [vmem:[%s6544_s3 + $0x73c] ss:$28 sps:$4 sm:$0xff]   ;;  %v4418_v55 = vld [vmem:[%s6544_s3 + $0x44] ss:$28 sps:$4 sm:$0xff]   ;;  %v4419_v62 = vld [vmem:[%s6544_s3 + $0x770] ss:$28 sps:$4 sm:$0xff]  }
  0x18   :  { %3030 = vmatpush1.bf16.msra.mxu1 %v4345_v22  ;;  %v4395_v22 = vld [vmem:[%s6544_s3 + $0x314] ss:$28 sps:$4 sm:$0xff]   ;;  %v4416_v59 = vld [vmem:[%s6544_s3 + $0x40] ss:$28 sps:$4 sm:$0xff]   ;;  %v4427_v0 = vld [vmem:[%s6544_s3 + $0x7ac] ss:$28 sps:$4 sm:$0xff]  }
  0x19   :  { %3071 = vmatpush1.bf16.msra.mxu0 %v4346_v23  ;;  %3031 = vmatprep.subr.bf16.mxu1 %v4347_v24  ;;  %v129_v17 = vadd.f32 %v101_v3, %v79_v11  ;;  %vm135_vm0 = vcmp.gt.f32.partialorder %v127_v13, 0.0  ;;  %v143_v18 = vmul.f32 0.2, %v127_v13  ;;  %v126_v24 = vadd.f32 %v89_v10, %v76_v9  ;;  %v4413_v58 = vld [vmem:[%s6544_s3 + $0x738] ss:$28 sps:$4 sm:$0xff]  }
  0x1a   :  { %3072 = vmatprep.subr.bf16.mxu0 %v4349_v25  ;;  %v128_v25 = vadd.f32 %v97_v15, %v78_v14  ;;  %v4424_v61 = vld [vmem:[%s6544_s3 + $0x7c] ss:$28 sps:$4 sm:$0xff]   ;;  %v4425_v2 = vld [vmem:[%s6544_s3 + $0x7a8] ss:$28 sps:$4 sm:$0xff]   ;;  %v4428_v3 = vld [vmem:[%s6544_s3 + $0xb0] ss:$28 sps:$4 sm:$0xff]  }
  0x1b   :  { %vm137_vm1 = vcmp.gt.f32.partialorder %v129_v17, 0.0  ;;  %v145_v20 = vmul.f32 0.2, %v129_v17  ;;  %v151_v23 = vsel %vm135_vm0, %v127_v13, %v143_v18  ;;  %vm134_vm2 = vcmp.gt.f32.partialorder %v126_v24, 0.0  ;;  %v4422_v63 = vld [vmem:[%s6544_s3 + $0x78] ss:$28 sps:$4 sm:$0xff]  }
  0x1c   :  { %3032 = vmatpush1.bf16.msra.mxu1 %v4351_v26  ;;  %v4397_v26 = vld [vmem:[%s6544_s3 + $0x694] ss:$28 sps:$4 sm:$0xff]   ;;  %vm136_vm3 = vcmp.gt.f32.partialorder %v128_v25, 0.0  ;;  %v4433_v4 = vld [vmem:[%s6544_s3 + $0x7e4] ss:$28 sps:$4 sm:$0xff]   ;;  %v5348_v11 = vsub.s32 5, %v5143_v42 }
  0x1d   :  { %3073 = vmatpush1.bf16.msra.mxu0 %v4352_v27  ;;  %3033 = vmatprep.subr.bf16.mxu1 %v4353_v28  ;;  %v5240_v27 = vpack.c.bf16 %v151_v23, %v151_v23  ;;  %v153_v28 = vsel %vm137_vm1, %v129_v17, %v145_v20  ;;  %v4436_v5 = vld [vmem:[%s6544_s3 + $0xec] ss:$28 sps:$4 sm:$0xff]   ;;  %v4431_v6 = vld [vmem:[%s6544_s3 + $0x7e0] ss:$28 sps:$4 sm:$0xff]   ;;  %v4437_v10 = vld [vmem:[%s6544_s3 + $0x818] ss:$28 sps:$4 sm:$0xff]  }
  0x1e   :  { %3074 = vmatprep.subr.bf16.mxu0 %v4355_v29  ;;  %v4399_v29 = vld [vmem:[%s6544_s3 + $0x310] ss:$28 sps:$4 sm:$0xff]   ;;  %v4442_v9 = vld [vmem:[%s6544_s3 + $0x124] ss:$28 sps:$4 sm:$0xff]   ;;  %v4448_v15 = vld [vmem:[%s6544_s3 + $0x15c] ss:$28 sps:$4 sm:$0xff]   ;;  %v59_v17 = vrot.slane %v5184_v56, %v5348_v11 }
  0x1f   :  { %3051 = vmatprep.mubr.bf16.mxu1 %v5240_v27  ;;  %v4440_v13 = vld [vmem:[%s6544_s3 + $0x120] ss:$28 sps:$4 sm:$0xff]   ;;  %v4445_v14 = vld [vmem:[%s6544_s3 + $0x854] ss:$28 sps:$4 sm:$0xff]  }
  0x20   :  { %3034 = vmatpush1.bf16.msra.mxu1 %v4357_v30  ;;  %v4400_v30 = vld [vmem:[%s6544_s3 + $0x690] ss:$28 sps:$4 sm:$0xff]  }
  0x21   :  { %3075 = vmatpush1.bf16.msra.mxu0 %v4358_v31  ;;  %3035 = vmatprep.subr.bf16.mxu1 %v4359_v32  ;;  %v5248_v31 = vpack.c.bf16 %v153_v28, %v153_v28  ;;  %v4401_v32 = vld [vmem:[%s6544_s3 + $0x34c] ss:$28 sps:$4 sm:$0xff]   ;;  %v24_v20 = vld [vmem:[%s6541_s0 + $0x10] sm:$0xff] }
  0x22   :  { %3076 = vmatprep.subr.bf16.mxu0 %v4361_v33  ;;  %v66_v33 = vsub.s32 7, %v5143_v42  ;;  %v31_v23 = vunpack.c.h.bf16 %v24_v20 }
  0x23   :  { %3092 = vmatprep.mubr.bf16.mxu0 %v5248_v31 }
  0x24   :  { %3036 = vmatpush1.bf16.msra.mxu1 %v4363_v34  ;;  %v142_v34 = vmul.f32 0.2, %v126_v24  ;;  %v5259_v37 = vrot.slane %v5184_v56, %v66_v33  ;;  %v81_v28 = vmul.f32 %v59_v17, %v31_v23  ;;  %v4502_v17 = vld [vmem:[%s6544_s3 + $0x354] ss:$28 sps:$4 sm:$0xff]   ;;  %v4503_v23 = vld [vmem:[%s6544_s3 + $0xa80] ss:$28 sps:$4 sm:$0xff]  }
  0x25   :  { %3077 = vmatpush1.bf16.msra.mxu0 %v4364_v35  ;;  %3037 = vmatprep.subr.bf16.mxu1 %v4365_v36  ;;  %v144_v35 = vmul.f32 0.2, %v128_v25  ;;  %v4403_v36 = vld [vmem:[%s6544_s3 + $0x6cc] ss:$28 sps:$4 sm:$0xff]  }
  0x26   :  { %3078 = vmatprep.subr.bf16.mxu0 %v4367_v38  ;;  %v5262_v38 = vrot.slane %v5189_v57, %v66_v33  ;;  %v4457_v33 = vld [vmem:[%s6544_s3 + $0x8c4] ss:$28 sps:$4 sm:$0xff]  }
  0x28   :  { %3038 = vmatpush1.bf16.msra.mxu1 %v4369_v39  ;;  %v4405_v39 = vld [vmem:[%s6544_s3 + $0x348] ss:$28 sps:$4 sm:$0xff]  }
  0x29   :  { %3079 = vmatpush1.bf16.msra.mxu0 %v4370_v40  ;;  %3039 = vmatprep.subr.bf16.mxu1 %v4371_v41  ;;  %v4406_v40 = vld [vmem:[%s6544_s3 + $0x6c8] ss:$28 sps:$4 sm:$0xff]   ;;  %v150_v41 = vsel %vm134_vm2, %v126_v24, %v142_v34  ;;  %v109_v24 = vrot.slane %v5189_v57, %v5348_v11 }
  0x2a   :  { %3080 = vmatprep.subr.bf16.mxu0 %v4373_v43  ;;  %v152_v43 = vsel %vm136_vm3, %v128_v25, %v144_v35  ;;  %v30_v25 = vunpack.c.l.bf16 %v24_v20  ;;  %v4460_v34 = vld [vmem:[%s6544_s3 + $0x1cc] ss:$28 sps:$4 sm:$0xff]  }
  0x2b   :  { %v131_v35 = vadd.f32 %v109_v24, %v81_v28  ;;  %v4511_v28 = vld [vmem:[%s6544_s3 + $0xabc] ss:$28 sps:$4 sm:$0xff]  }
  0x2c   :  { %3040 = vmatpush1.bf16.msra.mxu1 %v4375_v44  ;;  %v4409_v44 = vld [vmem:[%s6544_s3 + $0x704] ss:$28 sps:$4 sm:$0xff]  }
  0x2d   :  { %3081 = vmatpush1.bf16.msra.mxu0 %v4376_v45  ;;  %3041 = vmatprep.subr.bf16.mxu1 %v4377_v46  ;;  %v4412_v45 = vld [vmem:[%s6544_s3 + $0xc] ss:$28 sps:$4 sm:$0xff]   ;;  %v5277_v46 = vpack.c.bf16 %v150_v41, %v150_v41  ;;  %vm139_vm4 = vcmp.gt.f32.partialorder %v131_v35, 0.0 }
  0x2e   :  { %3082 = vmatprep.subr.bf16.mxu0 %v4379_v49  ;;  %v4407_v49 = vld [vmem:[%s6544_s3 + $0x700] ss:$28 sps:$4 sm:$0xff]   ;;  %v4458_v41 = vld [vmem:[%s6544_s3 + $0x1c8] ss:$28 sps:$4 sm:$0xff]  }
  0x30   :  { %3042 = vmatpush1.bf16.msra.mxu1 %v4381_v51  ;;  %v5282_v51 = vpack.c.bf16 %v152_v43, %v152_v43  ;;  %v4463_v43 = vld [vmem:[%s6544_s3 + $0x8fc] ss:$28 sps:$4 sm:$0xff]  }
  0x31   :  { %3083 = vmatpush1.bf16.msra.mxu0 %v4382_v52  ;;  %3043 = vmatprep.subr.bf16.mxu1 %v4383_v60  ;;  %v4410_v52 = vld [vmem:[%s6544_s3 + $0x8] ss:$28 sps:$4 sm:$0xff]   ;;  %v4421_v60 = vld [vmem:[%s6544_s3 + $0x774] ss:$28 sps:$4 sm:$0xff]  }
  0x32   :  { %3084 = vmatprep.subr.bf16.mxu0 %v4385_v1  ;;  %v4430_v1 = vld [vmem:[%s6544_s3 + $0xb4] ss:$28 sps:$4 sm:$0xff]  }
  0x34   :  { %3044 = vmatpush1.bf16.msra.mxu1 %v4387_v7  ;;  %v4434_v7 = vld [vmem:[%s6544_s3 + $0xe8] ss:$28 sps:$4 sm:$0xff]  }
  0x35   :  { %3085 = vmatpush1.bf16.msra.mxu0 %v4388_v8  ;;  %3045 = vmatprep.subr.bf16.mxu1 %v4389_v12  ;;  %v4439_v8 = vld [vmem:[%s6544_s3 + $0x81c] ss:$28 sps:$4 sm:$0xff]   ;;  %v5351_v12 = vsub.s32 4, %v5143_v42 }
  0x36   :  { %3086 = vmatprep.subr.bf16.mxu0 %v4391_v16  ;;  %v4443_v16 = vld [vmem:[%s6544_s3 + $0x850] ss:$28 sps:$4 sm:$0xff]  }
  0x37   :  { %v55_v18 = vrot.slane %v5184_v56, %v5351_v12 }
  0x38   :  { %3046 = vmatpush1.bf16.msra.mxu1 %v4393_v19  ;;  %v4446_v19 = vld [vmem:[%s6544_s3 + $0x158] ss:$28 sps:$4 sm:$0xff]  }
  0x39   :  { %3087 = vmatpush1.bf16.msra.mxu0 %v4394_v21  ;;  %3047 = vmatprep.subr.bf16.mxu1 %v4395_v22  ;;  %v4451_v21 = vld [vmem:[%s6544_s3 + $0x88c] ss:$28 sps:$4 sm:$0xff]   ;;  %v4454_v22 = vld [vmem:[%s6544_s3 + $0x194] ss:$28 sps:$4 sm:$0xff]  }
  0x3a   :  { %3088 = vmatprep.subr.bf16.mxu0 %v4397_v26  ;;  %v105_v26 = vrot.slane %v5189_v57, %v5351_v12 }
  0x3c   :  { %3048 = vmatpush1.bf16.msra.mxu1 %v4399_v29  ;;  %v80_v29 = vmul.f32 %v55_v18, %v30_v25  ;;  %v4497_v18 = vld [vmem:[%s6544_s3 + $0xa48] ss:$28 sps:$4 sm:$0xff]   ;;  %v5507_v25 = vsub.s32 6, %v5143_v42  ;;  %v4509_v42 = vld [vmem:[%s6544_s3 + $0xab8] ss:$28 sps:$4 sm:$0xff]  }
  0x3d   :  { %3089 = vmatpush1.bf16.msra.mxu0 %v4400_v30  ;;  %3049 = vmatprep.subr.bf16.mxu1 %v4401_v32  ;;  %v4449_v30 = vld [vmem:[%s6544_s3 + $0x888] ss:$28 sps:$4 sm:$0xff]   ;;  %v4452_v32 = vld [vmem:[%s6544_s3 + $0x190] ss:$28 sps:$4 sm:$0xff]  }
  0x3e   :  { %3090 = vmatprep.subr.bf16.mxu0 %v4403_v36  ;;  %v5397_v36 = vadd.f32 %v105_v26, %v80_v29  ;;  %v4506_v26 = vld [vmem:[%s6544_s3 + $0x388] ss:$28 sps:$4 sm:$0xff]  }
  0x3f   :  { %v4514_v29 = vld [vmem:[%s6544_s3 + $0x3c4] ss:$28 sps:$4 sm:$0xff]  }
  0x40   :  { %3050 = vmatpush1.bf16.msra.mxu1 %v4405_v39  ;;  %v4455_v39 = vld [vmem:[%s6544_s3 + $0x8c0] ss:$28 sps:$4 sm:$0xff]   ;;  %vm138_vm5 = vcmp.gt.f32.partialorder %v5397_v36, 0.0 }
  0x41   :  { %3091 = vmatpush1.bf16.msra.mxu0 %v4406_v40  ;;  %3183 = vmatprep.subr.bf16.mxu1 %v4412_v45  ;;  %v147_v40 = vmul.f32 0.2, %v131_v35 }
  0x42   :  { %3101 = vmatprep.subr.bf16.mxu0 %v4409_v44  ;;  %v4466_v44 = vld [vmem:[%s6544_s3 + $0x204] ss:$28 sps:$4 sm:$0xff]  }
  0x43   :  { %3052 = vmatmul.mubr.bf16.vlgmr.msra.gmra.mrb[0].mxu1 %v5277_v46  ;;  %v155_v45 = vsel %vm139_vm4, %v131_v35, %v147_v40 }
  0x44   :  { %3093 = vmatmul.mubr.bf16.vlgmr.msra.gmra.mrb[0].mxu0 %v5282_v51  ;;  %3184 = vmatpush1.bf16.msra.mxu1 %v4410_v52  ;;  %v4461_v52 = vld [vmem:[%s6544_s3 + $0x8f8] ss:$28 sps:$4 sm:$0xff]  }
  0x45   :  { %3102 = vmatpush1.bf16.msra.mxu0 %v4407_v49  ;;  %3185 = vmatprep.subr.bf16.mxu1 %v4418_v55  ;;  %v5411_v49 = vpack.c.bf16 %v155_v45, %v155_v45  ;;  %v4469_v55 = vld [vmem:[%s6544_s3 + $0x934] ss:$28 sps:$4 sm:$0xff]  }
  0x46   :  { %3103 = vmatprep.subr.bf16.mxu0 %v4415_v53  ;;  %3215 = vmatprep.mubr.bf16.mxu1 %v5240_v27  ;;  %v4464_v53 = vld [vmem:[%s6544_s3 + $0x200] ss:$28 sps:$4 sm:$0xff]  }
  0x47   :  { %3133 = vmatprep.mubr.bf16.mxu0 %v5411_v49 }
  0x48   :  { %3186 = vmatpush1.bf16.msra.mxu1 %v4416_v59  ;;  %v4467_v59 = vld [vmem:[%s6544_s3 + $0x930] ss:$28 sps:$4 sm:$0xff]  }
  0x49   :  { %3104 = vmatpush1.bf16.msra.mxu0 %v4413_v58  ;;  %3187 = vmatprep.subr.bf16.mxu1 %v4424_v61  ;;  %v4472_v58 = vld [vmem:[%s6544_s3 + $0x23c] ss:$28 sps:$4 sm:$0xff]   ;;  %v4475_v61 = vld [vmem:[%s6544_s3 + $0x96c] ss:$28 sps:$4 sm:$0xff]  }
  0x4a   :  { %3105 = vmatprep.subr.bf16.mxu0 %v4421_v60  ;;  %v4470_v60 = vld [vmem:[%s6544_s3 + $0x238] ss:$28 sps:$4 sm:$0xff]  }
  0x4c   :  { %3188 = vmatpush1.bf16.msra.mxu1 %v4422_v63  ;;  %v4473_v63 = vld [vmem:[%s6544_s3 + $0x968] ss:$28 sps:$4 sm:$0xff]  }
  0x4d   :  { %3106 = vmatpush1.bf16.msra.mxu0 %v4419_v62  ;;  %3189 = vmatprep.subr.bf16.mxu1 %v4430_v1  ;;  %v4478_v62 = vld [vmem:[%s6544_s3 + $0x274] ss:$28 sps:$4 sm:$0xff]   ;;  %v4481_v1 = vld [vmem:[%s6544_s3 + $0x9a4] ss:$28 sps:$4 sm:$0xff]  }
  0x4e   :  { %3107 = vmatprep.subr.bf16.mxu0 %v4427_v0  ;;  %v4476_v0 = vld [vmem:[%s6544_s3 + $0x270] ss:$28 sps:$4 sm:$0xff]  }
  0x50   :  { %3190 = vmatpush1.bf16.msra.mxu1 %v4428_v3  ;;  %v4479_v3 = vld [vmem:[%s6544_s3 + $0x9a0] ss:$28 sps:$4 sm:$0xff]  }
  0x51   :  { %3108 = vmatpush1.bf16.msra.mxu0 %v4425_v2  ;;  %3191 = vmatprep.subr.bf16.mxu1 %v4436_v5  ;;  %v4484_v2 = vld [vmem:[%s6544_s3 + $0x2ac] ss:$28 sps:$4 sm:$0xff]   ;;  %v4487_v5 = vld [vmem:[%s6544_s3 + $0x9dc] ss:$28 sps:$4 sm:$0xff]  }
  0x52   :  { %3109 = vmatprep.subr.bf16.mxu0 %v4433_v4  ;;  %v4482_v4 = vld [vmem:[%s6544_s3 + $0x2a8] ss:$28 sps:$4 sm:$0xff]  }
  0x54   :  { %3192 = vmatpush1.bf16.msra.mxu1 %v4434_v7  ;;  %v4485_v7 = vld [vmem:[%s6544_s3 + $0x9d8] ss:$28 sps:$4 sm:$0xff]  }
  0x55   :  { %3110 = vmatpush1.bf16.msra.mxu0 %v4431_v6  ;;  %3193 = vmatprep.subr.bf16.mxu1 %v4442_v9  ;;  %v4490_v6 = vld [vmem:[%s6544_s3 + $0x2e4] ss:$28 sps:$4 sm:$0xff]   ;;  %v4493_v9 = vld [vmem:[%s6544_s3 + $0xa14] ss:$28 sps:$4 sm:$0xff]  }
  0x56   :  { %3111 = vmatprep.subr.bf16.mxu0 %v4439_v8  ;;  %v4488_v8 = vld [vmem:[%s6544_s3 + $0x2e0] ss:$28 sps:$4 sm:$0xff]  }
  0x58   :  { %3194 = vmatpush1.bf16.msra.mxu1 %v4440_v13  ;;  %v4491_v13 = vld [vmem:[%s6544_s3 + $0xa10] ss:$28 sps:$4 sm:$0xff]  }
  0x59   :  { %3112 = vmatpush1.bf16.msra.mxu0 %v4437_v10  ;;  %3195 = vmatprep.subr.bf16.mxu1 %v4448_v15  ;;  %v4496_v10 = vld [vmem:[%s6544_s3 + $0x31c] ss:$28 sps:$4 sm:$0xff]   ;;  %v146_v15 = vmul.f32 0.2, %v5397_v36 }
  0x5a   :  { %3113 = vmatprep.subr.bf16.mxu0 %v4445_v14  ;;  %v4494_v14 = vld [vmem:[%s6544_s3 + $0x318] ss:$28 sps:$4 sm:$0xff]  }
  0x5b   :  { %v154_v20 = vsel %vm138_vm5, %v5397_v36, %v146_v15  ;;  %v4556_v15 = vld [vmem:[%s6544_s3 + $0x54c] ss:$28 sps:$4 sm:$0xff]  }
  0x5c   :  { %3196 = vmatpush1.bf16.msra.mxu1 %v4446_v19  ;;  %v4500_v19 = vld [vmem:[%s6544_s3 + $0x350] ss:$28 sps:$4 sm:$0xff]   ;;  %v5504_v24 = vpack.c.bf16 %v154_v20, %v154_v20  ;;  %v4557_v20 = vld [vmem:[%s6544_s3 + $0xc78] ss:$28 sps:$4 sm:$0xff]  }
  0x5d   :  { %3114 = vmatpush1.bf16.msra.mxu0 %v4443_v16  ;;  %3197 = vmatprep.subr.bf16.mxu1 %v4454_v22  ;;  %v4499_v16 = vld [vmem:[%s6544_s3 + $0xa4c] ss:$28 sps:$4 sm:$0xff]  }
  0x5e   :  { %3115 = vmatprep.subr.bf16.mxu0 %v4451_v21  ;;  %v4505_v21 = vld [vmem:[%s6544_s3 + $0xa84] ss:$28 sps:$4 sm:$0xff]   ;;  %v4508_v22 = vld [vmem:[%s6544_s3 + $0x38c] ss:$28 sps:$4 sm:$0xff]  }
  0x60   :  { %3198 = vmatpush1.bf16.msra.mxu1 %v4452_v32  ;;  %v4512_v32 = vld [vmem:[%s6544_s3 + $0x3c0] ss:$28 sps:$4 sm:$0xff]  }
  0x61   :  { %3116 = vmatpush1.bf16.msra.mxu0 %v4449_v30  ;;  %3199 = vmatprep.subr.bf16.mxu1 %v4460_v34  ;;  %v63_v30 = vrot.slane %v5184_v56, %v5507_v25  ;;  %v4517_v34 = vld [vmem:[%s6544_s3 + $0xaf4] ss:$28 sps:$4 sm:$0xff]   ;;  %v4520_v56 = vld [vmem:[%s6544_s3 + $0x3fc] ss:$28 sps:$4 sm:$0xff]  }
  0x62   :  { %3117 = vmatprep.subr.bf16.mxu0 %v4457_v33  ;;  %v25_v33 = vld [vmem:[%s6541_s0 + $0x18] sm:$0xff] }
  0x63   :  { %v33_v35 = vunpack.c.h.bf16 %v25_v33  ;;  %v32_v36 = vunpack.c.l.bf16 %v25_v33  ;;  %v4577_v33 = vld [vmem:[%s6544_s3 + $0xd24] ss:$28 sps:$4 sm:$0xff]  }
  0x64   :  { %3200 = vmatpush1.bf16.msra.mxu1 %v4458_v41 }
  0x65   :  { %3118 = vmatpush1.bf16.msra.mxu0 %v4455_v39  ;;  %3201 = vmatprep.subr.bf16.mxu1 %v4466_v44  ;;  %v113_v39 = vrot.slane %v5189_v57, %v5507_v25  ;;  %v83_v40 = vmul.f32 %v5259_v37, %v33_v35  ;;  %v82_v41 = vmul.f32 %v63_v30, %v32_v36  ;;  %v4518_v44 = vld [vmem:[%s6544_s3 + $0x3f8] ss:$28 sps:$4 sm:$0xff]   ;;  %v4523_v57 = vld [vmem:[%s6544_s3 + $0xb2c] ss:$28 sps:$4 sm:$0xff]  }
  0x66   :  { %3119 = vmatprep.subr.bf16.mxu0 %v4463_v43  ;;  %v4515_v43 = vld [vmem:[%s6544_s3 + $0xaf0] ss:$28 sps:$4 sm:$0xff]   ;;  %v4569_v30 = vld [vmem:[%s6544_s3 + $0xce8] ss:$28 sps:$4 sm:$0xff]   ;;  %v4583_v36 = vld [vmem:[%s6544_s3 + $0xd5c] ss:$28 sps:$4 sm:$0xff]  }
  0x67   :  { %v4526_v37 = vld [vmem:[%s6544_s3 + $0x434] ss:$28 sps:$4 sm:$0xff]   ;;  %v133_v45 = vadd.f32 %v5262_v38, %v83_v40  ;;  %v4529_v38 = vld [vmem:[%s6544_s3 + $0xb64] ss:$28 sps:$4 sm:$0xff]  }
  0x68   :  { %3202 = vmatpush1.bf16.msra.mxu1 %v4464_v53  ;;  %v4521_v53 = vld [vmem:[%s6544_s3 + $0xb28] ss:$28 sps:$4 sm:$0xff]   ;;  %v4581_v40 = vld [vmem:[%s6544_s3 + $0xd58] ss:$28 sps:$4 sm:$0xff]  }
  0x69   :  { %3120 = vmatpush1.bf16.msra.mxu0 %v4461_v52  ;;  %3203 = vmatprep.subr.bf16.mxu1 %v4472_v58  ;;  %v5554_v52 = vadd.f32 %v113_v39, %v82_v41  ;;  %vm141_vm6 = vcmp.gt.f32.partialorder %v133_v45, 0.0  ;;  %v4524_v58 = vld [vmem:[%s6544_s3 + $0x430] ss:$28 sps:$4 sm:$0xff]   ;;  %v4578_v35 = vld [vmem:[%s6544_s3 + $0x628] ss:$28 sps:$4 sm:$0xff]  }
  0x6a   :  { %3121 = vmatprep.subr.bf16.mxu0 %v4469_v55  ;;  %v149_v55 = vmul.f32 0.2, %v133_v45  ;;  %v4586_v39 = vld [vmem:[%s6544_s3 + $0x664] ss:$28 sps:$4 sm:$0xff]  }
  0x6b   :  { %v4584_v41 = vld [vmem:[%s6544_s3 + $0x660] ss:$28 sps:$4 sm:$0xff]   ;;  %vm140_vm7 = vcmp.gt.f32.partialorder %v5554_v52, 0.0 }
  0x6c   :  { %3204 = vmatpush1.bf16.msra.mxu1 %v4470_v60  ;;  %v157_v60 = vsel %vm141_vm6, %v133_v45, %v149_v55  ;;  %v148_v45 = vmul.f32 0.2, %v5554_v52  ;;  %v4598_v55 = vld [vmem:[%s6544_s3 + $0x6d4] ss:$28 sps:$4 sm:$0xff]  }
  0x6d   :  { %3122 = vmatpush1.bf16.msra.mxu0 %v4467_v59  ;;  %3205 = vmatprep.subr.bf16.mxu1 %v4478_v62  ;;  %v4532_v59 = vld [vmem:[%s6544_s3 + $0x46c] ss:$28 sps:$4 sm:$0xff]   ;;  %v4527_v62 = vld [vmem:[%s6544_s3 + $0xb60] ss:$28 sps:$4 sm:$0xff]  }
  0x6e   :  { %3123 = vmatprep.subr.bf16.mxu0 %v4475_v61  ;;  %v5568_v61 = vpack.c.bf16 %v157_v60, %v157_v60  ;;  %v4601_v60 = vld [vmem:[%s6544_s3 + $0x70c] ss:$28 sps:$4 sm:$0xff]  }
  0x70   :  { %3206 = vmatpush1.bf16.msra.mxu1 %v4476_v0  ;;  %v4535_v0 = vld [vmem:[%s6544_s3 + $0xb9c] ss:$28 sps:$4 sm:$0xff]  }
  0x71   :  { %3124 = vmatpush1.bf16.msra.mxu0 %v4473_v63  ;;  %3207 = vmatprep.subr.bf16.mxu1 %v4484_v2  ;;  %v4530_v63 = vld [vmem:[%s6544_s3 + $0x468] ss:$28 sps:$4 sm:$0xff]   ;;  %v4533_v2 = vld [vmem:[%s6544_s3 + $0xb98] ss:$28 sps:$4 sm:$0xff]  }
  0x72   :  { %3125 = vmatprep.subr.bf16.mxu0 %v4481_v1  ;;  %v4538_v1 = vld [vmem:[%s6544_s3 + $0x4a4] ss:$28 sps:$4 sm:$0xff]  }
  0x74   :  { %3208 = vmatpush1.bf16.msra.mxu1 %v4482_v4  ;;  %v4541_v4 = vld [vmem:[%s6544_s3 + $0xbd4] ss:$28 sps:$4 sm:$0xff]  }
  0x75   :  { %3126 = vmatpush1.bf16.msra.mxu0 %v4479_v3  ;;  %3209 = vmatprep.subr.bf16.mxu1 %v4490_v6  ;;  %v4536_v3 = vld [vmem:[%s6544_s3 + $0x4a0] ss:$28 sps:$4 sm:$0xff]   ;;  %v4539_v6 = vld [vmem:[%s6544_s3 + $0xbd0] ss:$28 sps:$4 sm:$0xff]  }
  0x76   :  { %3127 = vmatprep.subr.bf16.mxu0 %v4487_v5  ;;  %v4544_v5 = vld [vmem:[%s6544_s3 + $0x4dc] ss:$28 sps:$4 sm:$0xff]  }
  0x78   :  { %3210 = vmatpush1.bf16.msra.mxu1 %v4488_v8  ;;  %v4547_v8 = vld [vmem:[%s6544_s3 + $0xc0c] ss:$28 sps:$4 sm:$0xff]  }
  0x79   :  { %3128 = vmatpush1.bf16.msra.mxu0 %v4485_v7  ;;  %3211 = vmatprep.subr.bf16.mxu1 %v4496_v10  ;;  %v4542_v7 = vld [vmem:[%s6544_s3 + $0x4d8] ss:$28 sps:$4 sm:$0xff]   ;;  %v4545_v10 = vld [vmem:[%s6544_s3 + $0xc08] ss:$28 sps:$4 sm:$0xff]  }
  0x7a   :  { %3129 = vmatprep.subr.bf16.mxu0 %v4493_v9  ;;  %v4550_v9 = vld [vmem:[%s6544_s3 + $0x514] ss:$28 sps:$4 sm:$0xff]  }
  0x7c   :  { %3212 = vmatpush1.bf16.msra.mxu1 %v4494_v14  ;;  %v4553_v14 = vld [vmem:[%s6544_s3 + $0xc44] ss:$28 sps:$4 sm:$0xff]  }
  0x7d   :  { %3130 = vmatpush1.bf16.msra.mxu0 %v4491_v13  ;;  %3213 = vmatprep.subr.bf16.mxu1 %v4502_v17  ;;  %v4548_v13 = vld [vmem:[%s6544_s3 + $0x510] ss:$28 sps:$4 sm:$0xff]   ;;  %v4554_v17 = vld [vmem:[%s6544_s3 + $0x548] ss:$28 sps:$4 sm:$0xff]  }
  0x7e   :  { %3131 = vmatprep.subr.bf16.mxu0 %v4499_v16  ;;  %v4551_v16 = vld [vmem:[%s6544_s3 + $0xc40] ss:$28 sps:$4 sm:$0xff]  }
  0x80   :  { %3214 = vmatpush1.bf16.msra.mxu1 %v4500_v19  ;;  %v4562_v19 = vld [vmem:[%s6544_s3 + $0x584] ss:$28 sps:$4 sm:$0xff]  }
  0x81   :  { %3132 = vmatpush1.bf16.msra.mxu0 %v4497_v18  ;;  %3224 = vmatprep.subr.bf16.mxu1 %v4508_v22  ;;  %v4559_v18 = vld [vmem:[%s6544_s3 + $0xc7c] ss:$28 sps:$4 sm:$0xff]   ;;  %v4565_v22 = vld [vmem:[%s6544_s3 + $0xcb4] ss:$28 sps:$4 sm:$0xff]  }
  0x82   :  { %3142 = vmatprep.subr.bf16.mxu0 %v4505_v21  ;;  %v4560_v21 = vld [vmem:[%s6544_s3 + $0x580] ss:$28 sps:$4 sm:$0xff]  }
  0x83   :  { %3216 = vmatmul.mubr.bf16.vlgmr.msra.gmra.mrb[4].mxu1 %v5277_v46 }
  0x84   :  { %3134 = vmatmul.mubr.bf16.vlgmr.msra.gmra.mrb[0].mxu0 %v5504_v24  ;;  %3225 = vmatpush1.bf16.msra.mxu1 %v4506_v26  ;;  %v4563_v26 = vld [vmem:[%s6544_s3 + $0xcb0] ss:$28 sps:$4 sm:$0xff]  }
  0x85   :  { %3143 = vmatpush1.bf16.msra.mxu0 %v4503_v23  ;;  %3226 = vmatprep.subr.bf16.mxu1 %v4514_v29  ;;  %v4568_v23 = vld [vmem:[%s6544_s3 + $0x5bc] ss:$28 sps:$4 sm:$0xff]   ;;  %v4571_v29 = vld [vmem:[%s6544_s3 + $0xcec] ss:$28 sps:$4 sm:$0xff]  }
  0x86   :  { %3144 = vmatprep.subr.bf16.mxu0 %v4511_v28  ;;  %3256 = vmatprep.mubr.bf16.mxu1 %v5248_v31  ;;  %v4566_v28 = vld [vmem:[%s6544_s3 + $0x5b8] ss:$28 sps:$4 sm:$0xff]  }
  0x87   :  { %3174 = vmatprep.mubr.bf16.mxu0 %v5568_v61 }
  0x88   :  { %3227 = vmatpush1.bf16.msra.mxu1 %v4512_v32  ;;  %v4572_v32 = vld [vmem:[%s6544_s3 + $0x5f0] ss:$28 sps:$4 sm:$0xff]  }
  0x89   :  { %3145 = vmatpush1.bf16.msra.mxu0 %v4509_v42  ;;  %3228 = vmatprep.subr.bf16.mxu1 %v4520_v56  ;;  %v4574_v42 = vld [vmem:[%s6544_s3 + $0x5f4] ss:$28 sps:$4 sm:$0xff]   ;;  %v4575_v56 = vld [vmem:[%s6544_s3 + $0xd20] ss:$28 sps:$4 sm:$0xff]  }
  0x8a   :  { %3146 = vmatprep.subr.bf16.mxu0 %v4517_v34  ;;  %v4580_v34 = vld [vmem:[%s6544_s3 + $0x62c] ss:$28 sps:$4 sm:$0xff]  }
  0x8c   :  { %3229 = vmatpush1.bf16.msra.mxu1 %v4518_v44  ;;  %v4592_v44 = vld [vmem:[%s6544_s3 + $0x69c] ss:$28 sps:$4 sm:$0xff]  }
  0x8d   :  { %3147 = vmatpush1.bf16.msra.mxu0 %v4515_v43  ;;  %3230 = vmatprep.subr.bf16.mxu1 %v4526_v37  ;;  %v4589_v43 = vld [vmem:[%s6544_s3 + $0xd94] ss:$28 sps:$4 sm:$0xff]  }
  0x8e   :  { %3148 = vmatprep.subr.bf16.mxu0 %v4523_v57  ;;  %v4587_v57 = vld [vmem:[%s6544_s3 + $0xd90] ss:$28 sps:$4 sm:$0xff]   ;;  %v4590_v37 = vld [vmem:[%s6544_s3 + $0x698] ss:$28 sps:$4 sm:$0xff]  }
  0x90   :  { %3231 = vmatpush1.bf16.msra.mxu1 %v4524_v58  ;;  %v4593_v58 = vld [vmem:[%s6544_s3 + $0xdc8] ss:$28 sps:$4 sm:$0xff]  }
  0x91   :  { %3149 = vmatpush1.bf16.msra.mxu0 %v4521_v53  ;;  %3232 = vmatprep.subr.bf16.mxu1 %v4532_v59  ;;  %v4595_v53 = vld [vmem:[%s6544_s3 + $0xdcc] ss:$28 sps:$4 sm:$0xff]   ;;  %v156_v59 = vsel %vm140_vm7, %v5554_v52, %v148_v45  ;;  %v4662_v45 = vld [vmem:[%s6544_s3 + $0x240] ss:$28 sps:$4 sm:$0xff]  }
  0x92   :  { %3150 = vmatprep.subr.bf16.mxu0 %v4529_v38  ;;  %v4596_v38 = vld [vmem:[%s6544_s3 + $0x6d0] ss:$28 sps:$4 sm:$0xff]  }
  0x93   :  { %v4602_v52 = vld [vmem:[%s6544_s3 + $0x10] ss:$28 sps:$4 sm:$0xff]  }
  0x94   :  { %3233 = vmatpush1.bf16.msra.mxu1 %v4530_v63  ;;  %v5718_v63 = vpack.c.bf16 %v156_v59, %v156_v59  ;;  %v4673_v59 = vld [vmem:[%s6544_s3 + $0x9ac] ss:$28 sps:$4 sm:$0xff]  }
  0x95   :  { %3151 = vmatpush1.bf16.msra.mxu0 %v4527_v62  ;;  %3234 = vmatprep.subr.bf16.mxu1 %v4538_v1  ;;  %v4604_v62 = vld [vmem:[%s6544_s3 + $0x14] ss:$28 sps:$4 sm:$0xff]   ;;  %v4607_v1 = vld [vmem:[%s6544_s3 + $0x744] ss:$28 sps:$4 sm:$0xff]  }
  0x96   :  { %3152 = vmatprep.subr.bf16.mxu0 %v4535_v0  ;;  %v4599_v0 = vld [vmem:[%s6544_s3 + $0x708] ss:$28 sps:$4 sm:$0xff]  }
  0x98   :  { %3235 = vmatpush1.bf16.msra.mxu1 %v4536_v3  ;;  %v4605_v3 = vld [vmem:[%s6544_s3 + $0x740] ss:$28 sps:$4 sm:$0xff]  }
  0x99   :  { %3153 = vmatpush1.bf16.msra.mxu0 %v4533_v2  ;;  %3236 = vmatprep.subr.bf16.mxu1 %v4544_v5  ;;  %v4610_v2 = vld [vmem:[%s6544_s3 + $0x4c] ss:$28 sps:$4 sm:$0xff]   ;;  %v4613_v5 = vld [vmem:[%s6544_s3 + $0x77c] ss:$28 sps:$4 sm:$0xff]  }
  0x9a   :  { %3154 = vmatprep.subr.bf16.mxu0 %v4541_v4  ;;  %v4608_v4 = vld [vmem:[%s6544_s3 + $0x48] ss:$28 sps:$4 sm:$0xff]  }
  0x9c   :  { %3237 = vmatpush1.bf16.msra.mxu1 %v4542_v7  ;;  %v4611_v7 = vld [vmem:[%s6544_s3 + $0x778] ss:$28 sps:$4 sm:$0xff]  }
  0x9d   :  { %3155 = vmatpush1.bf16.msra.mxu0 %v4539_v6  ;;  %3238 = vmatprep.subr.bf16.mxu1 %v4550_v9  ;;  %v4616_v6 = vld [vmem:[%s6544_s3 + $0x84] ss:$28 sps:$4 sm:$0xff]   ;;  %v4619_v9 = vld [vmem:[%s6544_s3 + $0x7b4] ss:$28 sps:$4 sm:$0xff]  }
  0x9e   :  { %3156 = vmatprep.subr.bf16.mxu0 %v4547_v8  ;;  %v4614_v8 = vld [vmem:[%s6544_s3 + $0x80] ss:$28 sps:$4 sm:$0xff]  }
  0xa0   :  { %3239 = vmatpush1.bf16.msra.mxu1 %v4548_v13  ;;  %v4617_v13 = vld [vmem:[%s6544_s3 + $0x7b0] ss:$28 sps:$4 sm:$0xff]  }
  0xa1   :  { %3157 = vmatpush1.bf16.msra.mxu0 %v4545_v10  ;;  %3240 = vmatprep.subr.bf16.mxu1 %v4556_v15  ;;  %v4622_v10 = vld [vmem:[%s6544_s3 + $0xbc] ss:$28 sps:$4 sm:$0xff]   ;;  %v4625_v15 = vld [vmem:[%s6544_s3 + $0x7ec] ss:$28 sps:$4 sm:$0xff]  }
  0xa2   :  { %3158 = vmatprep.subr.bf16.mxu0 %v4553_v14  ;;  %v4620_v14 = vld [vmem:[%s6544_s3 + $0xb8] ss:$28 sps:$4 sm:$0xff]  }
  0xa4   :  { %3241 = vmatpush1.bf16.msra.mxu1 %v4554_v17  ;;  %v4623_v17 = vld [vmem:[%s6544_s3 + $0x7e8] ss:$28 sps:$4 sm:$0xff]  }
  0xa5   :  { %3159 = vmatpush1.bf16.msra.mxu0 %v4551_v16  ;;  %3242 = vmatprep.subr.bf16.mxu1 %v4562_v19  ;;  %v4628_v16 = vld [vmem:[%s6544_s3 + $0xf4] ss:$28 sps:$4 sm:$0xff]   ;;  %v4631_v19 = vld [vmem:[%s6544_s3 + $0x824] ss:$28 sps:$4 sm:$0xff]  }
  0xa6   :  { %3160 = vmatprep.subr.bf16.mxu0 %v4559_v18  ;;  %v4626_v18 = vld [vmem:[%s6544_s3 + $0xf0] ss:$28 sps:$4 sm:$0xff]  }
  0xa8   :  { %3243 = vmatpush1.bf16.msra.mxu1 %v4560_v21  ;;  %v4629_v21 = vld [vmem:[%s6544_s3 + $0x820] ss:$28 sps:$4 sm:$0xff]  }
  0xa9   :  { %3161 = vmatpush1.bf16.msra.mxu0 %v4557_v20  ;;  %3244 = vmatprep.subr.bf16.mxu1 %v4568_v23  ;;  %v4634_v20 = vld [vmem:[%s6544_s3 + $0x12c] ss:$28 sps:$4 sm:$0xff]   ;;  %v4637_v23 = vld [vmem:[%s6544_s3 + $0x85c] ss:$28 sps:$4 sm:$0xff]  }
  0xaa   :  { %3162 = vmatprep.subr.bf16.mxu0 %v4565_v22  ;;  %v4632_v22 = vld [vmem:[%s6544_s3 + $0x128] ss:$28 sps:$4 sm:$0xff]  }
  0xac   :  { %3245 = vmatpush1.bf16.msra.mxu1 %v4566_v28  ;;  %v4635_v28 = vld [vmem:[%s6544_s3 + $0x858] ss:$28 sps:$4 sm:$0xff]  }
  0xad   :  { %3163 = vmatpush1.bf16.msra.mxu0 %v4563_v26  ;;  %3246 = vmatprep.subr.bf16.mxu1 %v4574_v42  ;;  %v4640_v26 = vld [vmem:[%s6544_s3 + $0x164] ss:$28 sps:$4 sm:$0xff]   ;;  %v4643_v42 = vld [vmem:[%s6544_s3 + $0x894] ss:$28 sps:$4 sm:$0xff]  }
  0xae   :  { %3164 = vmatprep.subr.bf16.mxu0 %v4571_v29  ;;  %v4638_v29 = vld [vmem:[%s6544_s3 + $0x160] ss:$28 sps:$4 sm:$0xff]  }
  0xb0   :  { %3247 = vmatpush1.bf16.msra.mxu1 %v4572_v32  ;;  %v4641_v32 = vld [vmem:[%s6544_s3 + $0x890] ss:$28 sps:$4 sm:$0xff]  }
  0xb1   :  { %3165 = vmatpush1.bf16.msra.mxu0 %v4569_v30  ;;  %3248 = vmatprep.subr.bf16.mxu1 %v4580_v34  ;;  %v4646_v30 = vld [vmem:[%s6544_s3 + $0x19c] ss:$28 sps:$4 sm:$0xff]   ;;  %v4649_v34 = vld [vmem:[%s6544_s3 + $0x8cc] ss:$28 sps:$4 sm:$0xff]  }
  0xb2   :  { %3166 = vmatprep.subr.bf16.mxu0 %v4577_v33  ;;  %v4644_v33 = vld [vmem:[%s6544_s3 + $0x198] ss:$28 sps:$4 sm:$0xff]  }
  0xb4   :  { %3249 = vmatpush1.bf16.msra.mxu1 %v4578_v35  ;;  %v4647_v35 = vld [vmem:[%s6544_s3 + $0x8c8] ss:$28 sps:$4 sm:$0xff]  }
  0xb5   :  { %3167 = vmatpush1.bf16.msra.mxu0 %v4575_v56  ;;  %3250 = vmatprep.subr.bf16.mxu1 %v4586_v39  ;;  %v4652_v56 = vld [vmem:[%s6544_s3 + $0x1d4] ss:$28 sps:$4 sm:$0xff]   ;;  %v4655_v39 = vld [vmem:[%s6544_s3 + $0x904] ss:$28 sps:$4 sm:$0xff]  }
  0xb6   :  { %3168 = vmatprep.subr.bf16.mxu0 %v4583_v36  ;;  %v4650_v36 = vld [vmem:[%s6544_s3 + $0x1d0] ss:$28 sps:$4 sm:$0xff]  }
  0xb8   :  { %3251 = vmatpush1.bf16.msra.mxu1 %v4584_v41  ;;  %v4653_v41 = vld [vmem:[%s6544_s3 + $0x900] ss:$28 sps:$4 sm:$0xff]  }
  0xb9   :  { %3169 = vmatpush1.bf16.msra.mxu0 %v4581_v40  ;;  %3252 = vmatprep.subr.bf16.mxu1 %v4592_v44  ;;  %v4658_v40 = vld [vmem:[%s6544_s3 + $0x20c] ss:$28 sps:$4 sm:$0xff]   ;;  %v4661_v44 = vld [vmem:[%s6544_s3 + $0x93c] ss:$28 sps:$4 sm:$0xff]  }
  0xba   :  { %3170 = vmatprep.subr.bf16.mxu0 %v4589_v43  ;;  %v4656_v43 = vld [vmem:[%s6544_s3 + $0x208] ss:$28 sps:$4 sm:$0xff]  }
  0xbc   :  { %3253 = vmatpush1.bf16.msra.mxu1 %v4590_v37  ;;  %v4659_v37 = vld [vmem:[%s6544_s3 + $0x938] ss:$28 sps:$4 sm:$0xff]  }
  0xbd   :  { %3171 = vmatpush1.bf16.msra.mxu0 %v4587_v57  ;;  %3254 = vmatprep.subr.bf16.mxu1 %v4598_v55  ;;  %v4664_v57 = vld [vmem:[%s6544_s3 + $0x244] ss:$28 sps:$4 sm:$0xff]   ;;  %v4670_v55 = vld [vmem:[%s6544_s3 + $0x27c] ss:$28 sps:$4 sm:$0xff]  }
  0xbe   :  { %3172 = vmatprep.subr.bf16.mxu0 %v4595_v53  ;;  %v4667_v53 = vld [vmem:[%s6544_s3 + $0x974] ss:$28 sps:$4 sm:$0xff]  }
  0xc0   :  { %3255 = vmatpush1.bf16.msra.mxu1 %v4596_v38  ;;  %v4668_v38 = vld [vmem:[%s6544_s3 + $0x278] ss:$28 sps:$4 sm:$0xff]  }
  0xc1   :  { %3173 = vmatpush1.bf16.msra.mxu0 %v4593_v58  ;;  %3265 = vmatprep.subr.bf16.mxu1 %v4601_v60  ;;  %v4665_v58 = vld [vmem:[%s6544_s3 + $0x970] ss:$28 sps:$4 sm:$0xff]  }
  0xc2   :  { %3347 = vmatprep.subr.bf16.mxu0 %v4604_v62  ;;  %v4676_v60 = vld [vmem:[%s6544_s3 + $0x2b4] ss:$28 sps:$4 sm:$0xff]   ;;  %v4671_v62 = vld [vmem:[%s6544_s3 + $0x9a8] ss:$28 sps:$4 sm:$0xff]  }
  0xc3   :  { %3257 = vmatmul.mubr.bf16.vlgmr.msra.gmra.mrb[4].mxu1 %v5282_v51 }
  0xc4   :  { %3175 = vmatmul.mubr.bf16.vlgmr.msra.gmra.mrb[0].mxu0 %v5718_v63  ;;  %3266 = vmatpush1.bf16.msra.mxu1 %v4599_v0  ;;  %v4674_v0 = vld [vmem:[%s6544_s3 + $0x2b0] ss:$28 sps:$4 sm:$0xff]  }
  0xc5   :  { %3348 = vmatpush1.bf16.msra.mxu0 %v4602_v52  ;;  %3267 = vmatprep.subr.bf16.mxu1 %v4607_v1  ;;  %v4679_v52 = vld [vmem:[%s6544_s3 + $0x9e4] ss:$28 sps:$4 sm:$0xff]   ;;  %v4682_v1 = vld [vmem:[%s6544_s3 + $0x2ec] ss:$28 sps:$4 sm:$0xff]  }
  0xc6   :  { %3349 = vmatprep.subr.bf16.mxu0 %v4610_v2  ;;  %3297 = vmatprep.mubr.bf16.mxu1 %v5411_v49  ;;  %v4677_v2 = vld [vmem:[%s6544_s3 + $0x9e0] ss:$28 sps:$4 sm:$0xff]  }
  0xc7   :  { %3379 = vmatprep.mubr.bf16.mxu0 %v5240_v27 }
  0xc8   :  { %3268 = vmatpush1.bf16.msra.mxu1 %v4605_v3  ;;  %v4680_v3 = vld [vmem:[%s6544_s3 + $0x2e8] ss:$28 sps:$4 sm:$0xff]  }
  0xc9   :  { %3350 = vmatpush1.bf16.msra.mxu0 %v4608_v4  ;;  %3269 = vmatprep.subr.bf16.mxu1 %v4613_v5  ;;  %v4685_v4 = vld [vmem:[%s6544_s3 + $0xa1c] ss:$28 sps:$4 sm:$0xff]   ;;  %v4688_v5 = vld [vmem:[%s6544_s3 + $0x324] ss:$28 sps:$4 sm:$0xff]  }
  0xca   :  { %3351 = vmatprep.subr.bf16.mxu0 %v4616_v6  ;;  %v4683_v6 = vld [vmem:[%s6544_s3 + $0xa18] ss:$28 sps:$4 sm:$0xff]  }
  0xcc   :  { %3270 = vmatpush1.bf16.msra.mxu1 %v4611_v7  ;;  %v4686_v7 = vld [vmem:[%s6544_s3 + $0x320] ss:$28 sps:$4 sm:$0xff]  }
  0xcd   :  { %3352 = vmatpush1.bf16.msra.mxu0 %v4614_v8  ;;  %3271 = vmatprep.subr.bf16.mxu1 %v4619_v9  ;;  %v4691_v8 = vld [vmem:[%s6544_s3 + $0xa54] ss:$28 sps:$4 sm:$0xff]   ;;  %v4694_v9 = vld [vmem:[%s6544_s3 + $0x35c] ss:$28 sps:$4 sm:$0xff]  }
  0xce   :  { %3353 = vmatprep.subr.bf16.mxu0 %v4622_v10  ;;  %v4689_v10 = vld [vmem:[%s6544_s3 + $0xa50] ss:$28 sps:$4 sm:$0xff]  }
  0xd0   :  { %3272 = vmatpush1.bf16.msra.mxu1 %v4617_v13  ;;  %v4692_v13 = vld [vmem:[%s6544_s3 + $0x358] ss:$28 sps:$4 sm:$0xff]  }
  0xd1   :  { %3354 = vmatpush1.bf16.msra.mxu0 %v4620_v14  ;;  %3273 = vmatprep.subr.bf16.mxu1 %v4625_v15  ;;  %v4697_v14 = vld [vmem:[%s6544_s3 + $0xa8c] ss:$28 sps:$4 sm:$0xff]   ;;  %v4700_v15 = vld [vmem:[%s6544_s3 + $0x394] ss:$28 sps:$4 sm:$0xff]  }
  0xd2   :  { %3355 = vmatprep.subr.bf16.mxu0 %v4628_v16  ;;  %v4695_v16 = vld [vmem:[%s6544_s3 + $0xa88] ss:$28 sps:$4 sm:$0xff]  }
  0xd4   :  { %3274 = vmatpush1.bf16.msra.mxu1 %v4623_v17  ;;  %v4698_v17 = vld [vmem:[%s6544_s3 + $0x390] ss:$28 sps:$4 sm:$0xff]  }
  0xd5   :  { %3356 = vmatpush1.bf16.msra.mxu0 %v4626_v18  ;;  %3275 = vmatprep.subr.bf16.mxu1 %v4631_v19  ;;  %v4703_v18 = vld [vmem:[%s6544_s3 + $0xac4] ss:$28 sps:$4 sm:$0xff]   ;;  %v4706_v19 = vld [vmem:[%s6544_s3 + $0x3cc] ss:$28 sps:$4 sm:$0xff]  }
  0xd6   :  { %3357 = vmatprep.subr.bf16.mxu0 %v4634_v20  ;;  %v4701_v20 = vld [vmem:[%s6544_s3 + $0xac0] ss:$28 sps:$4 sm:$0xff]  }
  0xd8   :  { %3276 = vmatpush1.bf16.msra.mxu1 %v4629_v21  ;;  %v4704_v21 = vld [vmem:[%s6544_s3 + $0x3c8] ss:$28 sps:$4 sm:$0xff]  }
  0xd9   :  { %3358 = vmatpush1.bf16.msra.mxu0 %v4632_v22  ;;  %3277 = vmatprep.subr.bf16.mxu1 %v4637_v23  ;;  %v4709_v22 = vld [vmem:[%s6544_s3 + $0xafc] ss:$28 sps:$4 sm:$0xff]   ;;  %v4712_v23 = vld [vmem:[%s6544_s3 + $0x404] ss:$28 sps:$4 sm:$0xff]  }
  0xda   :  { %3359 = vmatprep.subr.bf16.mxu0 %v4640_v26  ;;  %v4707_v26 = vld [vmem:[%s6544_s3 + $0xaf8] ss:$28 sps:$4 sm:$0xff]  }
  0xdc   :  { %3278 = vmatpush1.bf16.msra.mxu1 %v4635_v28  ;;  %v4710_v28 = vld [vmem:[%s6544_s3 + $0x400] ss:$28 sps:$4 sm:$0xff]  }
  0xdd   :  { %3360 = vmatpush1.bf16.msra.mxu0 %v4638_v29  ;;  %3279 = vmatprep.subr.bf16.mxu1 %v4643_v42  ;;  %v4715_v29 = vld [vmem:[%s6544_s3 + $0xb34] ss:$28 sps:$4 sm:$0xff]   ;;  %v4718_v42 = vld [vmem:[%s6544_s3 + $0x43c] ss:$28 sps:$4 sm:$0xff]  }
  0xde   :  { %3361 = vmatprep.subr.bf16.mxu0 %v4646_v30  ;;  %v4713_v30 = vld [vmem:[%s6544_s3 + $0xb30] ss:$28 sps:$4 sm:$0xff]  }
  0xe0   :  { %3280 = vmatpush1.bf16.msra.mxu1 %v4641_v32  ;;  %v4716_v32 = vld [vmem:[%s6544_s3 + $0x438] ss:$28 sps:$4 sm:$0xff]  }
  0xe1   :  { %3362 = vmatpush1.bf16.msra.mxu0 %v4644_v33  ;;  %3281 = vmatprep.subr.bf16.mxu1 %v4649_v34  ;;  %v4721_v33 = vld [vmem:[%s6544_s3 + $0xb6c] ss:$28 sps:$4 sm:$0xff]   ;;  %v4724_v34 = vld [vmem:[%s6544_s3 + $0x474] ss:$28 sps:$4 sm:$0xff]  }
  0xe2   :  { %3363 = vmatprep.subr.bf16.mxu0 %v4652_v56  ;;  %v4719_v56 = vld [vmem:[%s6544_s3 + $0xb68] ss:$28 sps:$4 sm:$0xff]  }
  0xe4   :  { %3282 = vmatpush1.bf16.msra.mxu1 %v4647_v35  ;;  %v4722_v35 = vld [vmem:[%s6544_s3 + $0x470] ss:$28 sps:$4 sm:$0xff]  }
  0xe5   :  { %3364 = vmatpush1.bf16.msra.mxu0 %v4650_v36  ;;  %3283 = vmatprep.subr.bf16.mxu1 %v4655_v39  ;;  %v4727_v36 = vld [vmem:[%s6544_s3 + $0xba4] ss:$28 sps:$4 sm:$0xff]   ;;  %v4730_v39 = vld [vmem:[%s6544_s3 + $0x4ac] ss:$28 sps:$4 sm:$0xff]  }
  0xe6   :  { %3365 = vmatprep.subr.bf16.mxu0 %v4658_v40  ;;  %v4725_v40 = vld [vmem:[%s6544_s3 + $0xba0] ss:$28 sps:$4 sm:$0xff]  }
  0xe8   :  { %3284 = vmatpush1.bf16.msra.mxu1 %v4653_v41  ;;  %v4728_v41 = vld [vmem:[%s6544_s3 + $0x4a8] ss:$28 sps:$4 sm:$0xff]  }
  0xe9   :  { %3366 = vmatpush1.bf16.msra.mxu0 %v4656_v43  ;;  %3285 = vmatprep.subr.bf16.mxu1 %v4661_v44  ;;  %v4733_v43 = vld [vmem:[%s6544_s3 + $0xbdc] ss:$28 sps:$4 sm:$0xff]   ;;  %v4736_v44 = vld [vmem:[%s6544_s3 + $0x4e4] ss:$28 sps:$4 sm:$0xff]  }
  0xea   :  { %3367 = vmatprep.subr.bf16.mxu0 %v4664_v57 }
  0xec   :  { %3286 = vmatpush1.bf16.msra.mxu1 %v4659_v37  ;;  %v4731_v37 = vld [vmem:[%s6544_s3 + $0xbd8] ss:$28 sps:$4 sm:$0xff]  }
  0xed   :  { %3368 = vmatpush1.bf16.msra.mxu0 %v4662_v45  ;;  %3287 = vmatprep.subr.bf16.mxu1 %v4667_v53  ;;  %v4734_v53 = vld [vmem:[%s6544_s3 + $0x4e0] ss:$28 sps:$4 sm:$0xff]  }
  0xee   :  { %3369 = vmatprep.subr.bf16.mxu0 %v4670_v55 }
  0xf0   :  { %3288 = vmatpush1.bf16.msra.mxu1 %v4665_v58  ;;  %v4739_v58 = vld [vmem:[%s6544_s3 + $0xc14] ss:$28 sps:$4 sm:$0xff]  }
  0xf1   :  { %3370 = vmatpush1.bf16.msra.mxu0 %v4668_v38  ;;  %3289 = vmatprep.subr.bf16.mxu1 %v4673_v59  ;;  %v4742_v38 = vld [vmem:[%s6544_s3 + $0x51c] ss:$28 sps:$4 sm:$0xff]  }
  0xf2   :  { %3371 = vmatprep.subr.bf16.mxu0 %v4676_v60  ;;  %v4737_v60 = vld [vmem:[%s6544_s3 + $0xc10] ss:$28 sps:$4 sm:$0xff]  }
  0xf4   :  { %3290 = vmatpush1.bf16.msra.mxu1 %v4671_v62  ;;  %v4740_v62 = vld [vmem:[%s6544_s3 + $0x518] ss:$28 sps:$4 sm:$0xff]  }
  0xf5   :  { %3372 = vmatpush1.bf16.msra.mxu0 %v4674_v0  ;;  %3291 = vmatprep.subr.bf16.mxu1 %v4679_v52  ;;  %v4745_v0 = vld [vmem:[%s6544_s3 + $0xc4c] ss:$28 sps:$4 sm:$0xff]   ;;  %v4748_v52 = vld [vmem:[%s6544_s3 + $0x554] ss:$28 sps:$4 sm:$0xff]  }
  0xf6   :  { %3373 = vmatprep.subr.bf16.mxu0 %v4682_v1  ;;  %v4743_v1 = vld [vmem:[%s6544_s3 + $0xc48] ss:$28 sps:$4 sm:$0xff]  }
  0xf8   :  { %3292 = vmatpush1.bf16.msra.mxu1 %v4677_v2  ;;  %v4746_v2 = vld [vmem:[%s6544_s3 + $0x550] ss:$28 sps:$4 sm:$0xff]  }
  0xf9   :  { %3374 = vmatpush1.bf16.msra.mxu0 %v4680_v3  ;;  %3293 = vmatprep.subr.bf16.mxu1 %v4685_v4  ;;  %v4751_v3 = vld [vmem:[%s6544_s3 + $0xc84] ss:$28 sps:$4 sm:$0xff]   ;;  %v4754_v4 = vld [vmem:[%s6544_s3 + $0x58c] ss:$28 sps:$4 sm:$0xff]  }
  0xfa   :  { %3375 = vmatprep.subr.bf16.mxu0 %v4688_v5  ;;  %v4749_v5 = vld [vmem:[%s6544_s3 + $0xc80] ss:$28 sps:$4 sm:$0xff]  }
  0xfc   :  { %3294 = vmatpush1.bf16.msra.mxu1 %v4683_v6  ;;  %v4752_v6 = vld [vmem:[%s6544_s3 + $0x588] ss:$28 sps:$4 sm:$0xff]  }
  0xfd   :  { %3376 = vmatpush1.bf16.msra.mxu0 %v4686_v7  ;;  %3295 = vmatprep.subr.bf16.mxu1 %v4691_v8  ;;  %v4757_v7 = vld [vmem:[%s6544_s3 + $0xcbc] ss:$28 sps:$4 sm:$0xff]   ;;  %v4760_v8 = vld [vmem:[%s6544_s3 + $0x5c4] ss:$28 sps:$4 sm:$0xff]  }
  0xfe   :  { %3377 = vmatprep.subr.bf16.mxu0 %v4694_v9  ;;  %v4755_v9 = vld [vmem:[%s6544_s3 + $0xcb8] ss:$28 sps:$4 sm:$0xff]  }
 0x100   :  { %3296 = vmatpush1.bf16.msra.mxu1 %v4689_v10  ;;  %v4758_v10 = vld [vmem:[%s6544_s3 + $0x5c0] ss:$28 sps:$4 sm:$0xff]  }
 0x101   :  { %3378 = vmatpush1.bf16.msra.mxu0 %v4692_v13  ;;  %3306 = vmatprep.subr.bf16.mxu1 %v4697_v14  ;;  %v4763_v13 = vld [vmem:[%s6544_s3 + $0xcf4] ss:$28 sps:$4 sm:$0xff]   ;;  %v4766_v14 = vld [vmem:[%s6544_s3 + $0x5fc] ss:$28 sps:$4 sm:$0xff]  }
 0x102   :  { %3388 = vmatprep.subr.bf16.mxu0 %v4700_v15  ;;  %v4761_v15 = vld [vmem:[%s6544_s3 + $0xcf0] ss:$28 sps:$4 sm:$0xff]  }
 0x103   :  { %3298 = vmatmul.mubr.bf16.vlgmr.msra.gmra.mrb[4].mxu1 %v5504_v24 }
 0x104   :  { %3380 = vmatmul.mubr.bf16.vlgmr.msra.gmra.mrb[4].mxu0 %v5277_v46  ;;  %3307 = vmatpush1.bf16.msra.mxu1 %v4695_v16  ;;  %v4764_v16 = vld [vmem:[%s6544_s3 + $0x5f8] ss:$28 sps:$4 sm:$0xff]  }
 0x105   :  { %3389 = vmatpush1.bf16.msra.mxu0 %v4698_v17  ;;  %3308 = vmatprep.subr.bf16.mxu1 %v4703_v18  ;;  %v4769_v17 = vld [vmem:[%s6544_s3 + $0xd2c] ss:$28 sps:$4 sm:$0xff]   ;;  %v4772_v18 = vld [vmem:[%s6544_s3 + $0x634] ss:$28 sps:$4 sm:$0xff]  }
 0x106   :  { %3390 = vmatprep.subr.bf16.mxu0 %v4706_v19  ;;  %3338 = vmatprep.mubr.bf16.mxu1 %v5568_v61  ;;  %v4767_v19 = vld [vmem:[%s6544_s3 + $0xd28] ss:$28 sps:$4 sm:$0xff]  }
 0x107   :  { %3420 = vmatprep.mubr.bf16.mxu0 %v5248_v31 }
 0x108   :  { %3309 = vmatpush1.bf16.msra.mxu1 %v4701_v20  ;;  %v4770_v20 = vld [vmem:[%s6544_s3 + $0x630] ss:$28 sps:$4 sm:$0xff]  }
 0x109   :  { %3391 = vmatpush1.bf16.msra.mxu0 %v4704_v21  ;;  %3310 = vmatprep.subr.bf16.mxu1 %v4709_v22  ;;  %v4775_v21 = vld [vmem:[%s6544_s3 + $0xd64] ss:$28 sps:$4 sm:$0xff]   ;;  %v4778_v22 = vld [vmem:[%s6544_s3 + $0x66c] ss:$28 sps:$4 sm:$0xff]  }
 0x10a   :  { %3392 = vmatprep.subr.bf16.mxu0 %v4712_v23  ;;  %v4773_v23 = vld [vmem:[%s6544_s3 + $0xd60] ss:$28 sps:$4 sm:$0xff]  }
 0x10c   :  { %3311 = vmatpush1.bf16.msra.mxu1 %v4707_v26  ;;  %v4776_v26 = vld [vmem:[%s6544_s3 + $0x668] ss:$28 sps:$4 sm:$0xff]  }
 0x10d   :  { %3393 = vmatpush1.bf16.msra.mxu0 %v4710_v28  ;;  %3312 = vmatprep.subr.bf16.mxu1 %v4715_v29  ;;  %v4781_v28 = vld [vmem:[%s6544_s3 + $0xd9c] ss:$28 sps:$4 sm:$0xff]   ;;  %v4784_v29 = vld [vmem:[%s6544_s3 + $0x6a4] ss:$28 sps:$4 sm:$0xff]  }
 0x10e   :  { %3394 = vmatprep.subr.bf16.mxu0 %v4718_v42  ;;  %v4779_v42 = vld [vmem:[%s6544_s3 + $0xd98] ss:$28 sps:$4 sm:$0xff]  }
 0x110   :  { %3313 = vmatpush1.bf16.msra.mxu1 %v4713_v30  ;;  %v4782_v30 = vld [vmem:[%s6544_s3 + $0x6a0] ss:$28 sps:$4 sm:$0xff]  }
 0x111   :  { %3395 = vmatpush1.bf16.msra.mxu0 %v4716_v32  ;;  %3314 = vmatprep.subr.bf16.mxu1 %v4721_v33  ;;  %v4787_v32 = vld [vmem:[%s6544_s3 + $0xdd4] ss:$28 sps:$4 sm:$0xff]   ;;  %v4790_v33 = vld [vmem:[%s6544_s3 + $0x6dc] ss:$28 sps:$4 sm:$0xff]  }
 0x112   :  { %3396 = vmatprep.subr.bf16.mxu0 %v4724_v34  ;;  %v4785_v34 = vld [vmem:[%s6544_s3 + $0xdd0] ss:$28 sps:$4 sm:$0xff]  }
 0x114   :  { %3315 = vmatpush1.bf16.msra.mxu1 %v4719_v56  ;;  %v4788_v56 = vld [vmem:[%s6544_s3 + $0x6d8] ss:$28 sps:$4 sm:$0xff]  }
 0x115   :  { %3397 = vmatpush1.bf16.msra.mxu0 %v4722_v35  ;;  %3316 = vmatprep.subr.bf16.mxu1 %v4727_v36  ;;  %v4793_v35 = vld [vmem:[%s6544_s3 + $0x714] ss:$28 sps:$4 sm:$0xff]  }
 0x116   :  { %3398 = vmatprep.subr.bf16.mxu0 %v4730_v39  ;;  %v5992_v57 = vpop.f32.mrb[0].mxu1  ;;  %v4794_v36 = vld [vmem:[%s6544_s3 + $0x1d8] ss:$28 sps:$4 sm:$0xff]   ;;  %v4791_v39 = vld [vmem:[%s6544_s3 + $0x710] ss:$28 sps:$4 sm:$0xff]  }
 0x117   :  { %v5997_v45 = vpop.f32.mrb[1].mxu1 }
 0x118   :  { %v3057_v55 = vpop.f32.mrb[2].mxu1  ;;  %3317 = vmatpush1.bf16.msra.mxu1 %v4725_v40  ;;  %v4795_v40 = vld [vmem:[%s6544_s3 + $0x18] ss:$28 sps:$4 sm:$0xff]  }
 0x119   :  { %3399 = vmatpush1.bf16.msra.mxu0 %v4728_v41  ;;  %v3058_v59 = vpop.f32.mrb[3].mxu1  ;;  %3318 = vmatprep.subr.bf16.mxu1 %v4733_v43  ;;  %v4798_v41 = vld [vmem:[%s6544_s3 + $0x74c] ss:$28 sps:$4 sm:$0xff]  }
 0x11a   :  { %3400 = vmatprep.subr.bf16.mxu0 %v4736_v44  ;;  %v4799_v43 = vld [vmem:[%s6544_s3 + $0x210] ss:$28 sps:$4 sm:$0xff]   ;;  %v4796_v44 = vld [vmem:[%s6544_s3 + $0x748] ss:$28 sps:$4 sm:$0xff]  }
 0x11b   :  { %v4804_v55 = vld [vmem:[%s6544_s3 + $0x248] ss:$28 sps:$4 sm:$0xff]  }
 0x11c   :  { %3319 = vmatpush1.bf16.msra.mxu1 %v4731_v37  ;;  %v4800_v37 = vld [vmem:[%s6544_s3 + $0x50] ss:$28 sps:$4 sm:$0xff]  }
 0x11d   :  { %3401 = vmatpush1.bf16.msra.mxu0 %v4734_v53  ;;  %3320 = vmatprep.subr.bf16.mxu1 %v4739_v58  ;;  %v4803_v53 = vld [vmem:[%s6544_s3 + $0x784] ss:$28 sps:$4 sm:$0xff]  }
 0x11e   :  { %3402 = vmatprep.subr.bf16.mxu0 %v4742_v38 }
 0x120   :  { %3321 = vmatpush1.bf16.msra.mxu1 %v4737_v60 }
 0x121   :  { %3403 = vmatpush1.bf16.msra.mxu0 %v4740_v62  ;;  %3322 = vmatprep.subr.bf16.mxu1 %v4745_v0 }
 0x122   :  { %3404 = vmatprep.subr.bf16.mxu0 %v4748_v52 }
 0x124   :  { %3323 = vmatpush1.bf16.msra.mxu1 %v4743_v1 }
 0x125   :  { %3405 = vmatpush1.bf16.msra.mxu0 %v4746_v2  ;;  %3324 = vmatprep.subr.bf16.mxu1 %v4751_v3 }
 0x126   :  { %3406 = vmatprep.subr.bf16.mxu0 %v4754_v4 }
 0x128   :  { %3325 = vmatpush1.bf16.msra.mxu1 %v4749_v5 }
 0x129   :  { %3407 = vmatpush1.bf16.msra.mxu0 %v4752_v6  ;;  %3326 = vmatprep.subr.bf16.mxu1 %v4757_v7 }
 0x12a   :  { %3408 = vmatprep.subr.bf16.mxu0 %v4760_v8 }
 0x12c   :  { %3327 = vmatpush1.bf16.msra.mxu1 %v4755_v9 }
 0x12d   :  { %3409 = vmatpush1.bf16.msra.mxu0 %v4758_v10  ;;  %3328 = vmatprep.subr.bf16.mxu1 %v4763_v13 }
 0x12e   :  { %3410 = vmatprep.subr.bf16.mxu0 %v4766_v14 }
 0x130   :  { %3329 = vmatpush1.bf16.msra.mxu1 %v4761_v15 }
 0x131   :  { %3411 = vmatpush1.bf16.msra.mxu0 %v4764_v16  ;;  %3330 = vmatprep.subr.bf16.mxu1 %v4769_v17 }
 0x132   :  { %3412 = vmatprep.subr.bf16.mxu0 %v4772_v18 }
 0x134   :  { %3331 = vmatpush1.bf16.msra.mxu1 %v4767_v19 }
 0x135   :  { %3413 = vmatpush1.bf16.msra.mxu0 %v4770_v20  ;;  %3332 = vmatprep.subr.bf16.mxu1 %v4775_v21 }
 0x136   :  { %3414 = vmatprep.subr.bf16.mxu0 %v4778_v22 }
 0x138   :  { %3333 = vmatpush1.bf16.msra.mxu1 %v4773_v23 }
 0x139   :  { %3415 = vmatpush1.bf16.msra.mxu0 %v4776_v26  ;;  %3334 = vmatprep.subr.bf16.mxu1 %v4781_v28 }
 0x13a   :  { %3416 = vmatprep.subr.bf16.mxu0 %v4784_v29 }
 0x13c   :  { %3335 = vmatpush1.bf16.msra.mxu1 %v4779_v42 }
 0x13d   :  { %3417 = vmatpush1.bf16.msra.mxu0 %v4782_v30  ;;  %3336 = vmatprep.subr.bf16.mxu1 %v4787_v32 }
 0x13e   :  { %3418 = vmatprep.subr.bf16.mxu0 %v4790_v33 }
 0x140   :  { %3337 = vmatpush1.bf16.msra.mxu1 %v4785_v34 }
 0x141   :  { %3419 = vmatpush1.bf16.msra.mxu0 %v4788_v56  ;;  %4182 = vmatprep.subr.bf16.mxu1 %v4794_v36 }
 0x142   :  { %3429 = vmatprep.subr.bf16.mxu0 %v4793_v35 }
 0x143   :  { %3339 = vmatmul.mubr.bf16.vlgmr.msra.gmra.mrb[4].mxu1 %v5718_v63 }
 0x144   :  { %3421 = vmatmul.mubr.bf16.vlgmr.msra.gmra.mrb[4].mxu0 %v5282_v51  ;;  %4183 = vmatpush3.bf16.msra.mxu1 %v4795_v40 }
 0x145   :  { %3430 = vmatpush1.bf16.msra.mxu0 %v4791_v39  ;;  %4184 = vmatprep.subr.bf16.mxu1 %v4799_v43 }
 0x146   :  { %3431 = vmatprep.subr.bf16.mxu0 %v4798_v41  ;;  %3543 = vmatprep.mubr.bf16.mxu1 %v5240_v27 }
 0x147   :  { %3461 = vmatprep.mubr.bf16.mxu0 %v5411_v49 }
 0x148   :  { %10 = vsyncpa [#allocation3], 0  ;;  %4185 = vmatpush3.bf16.msra.mxu1 %v4800_v37  ;;  %v4801_v58 = vld [vmem:[%s6544_s3 + $0x780] ss:$28 sps:$4 sm:$0xff]   ;;  %v4805_v38 = vld [vmem:[%s6544_s3 + $0x88] ss:$28 sps:$4 sm:$0xff]  }
 0x149   :  { %3432 = vmatpush1.bf16.msra.mxu0 %v4796_v44  ;;  %4186 = vmatprep.subr.bf16.mxu1 %v4804_v55  ;;  %v4808_v59 = vld [vmem:[%s6544_s3 + $0x7bc] ss:$28 sps:$4 sm:$0xff]   ;;  %v4813_v0 = vld [vmem:[%s6544_s3 + $0x7f4] ss:$28 sps:$4 sm:$0xff]   ;;  %v4818_v3 = vld [vmem:[%s6544_s3 + $0x82c] ss:$28 sps:$4 sm:$0xff]  }
 0x14a   :  { %3433 = vmatprep.subr.bf16.mxu0 %v4803_v53  ;;  %v4809_v27 = vld [vmem:[%s6544_s3 + $0x280] ss:$28 sps:$4 sm:$0xff]   ;;  %v4806_v60 = vld [vmem:[%s6544_s3 + $0x7b8] ss:$28 sps:$4 sm:$0xff]   ;;  %v4811_v1 = vld [vmem:[%s6544_s3 + $0x7f0] ss:$28 sps:$4 sm:$0xff]  }
 0x14b   :  { %v4810_v62 = vld [vmem:[%s6544_s3 + $0xc0] ss:$28 sps:$4 sm:$0xff]   ;;  %v4814_v52 = vld [vmem:[%s6544_s3 + $0x2b8] ss:$28 sps:$4 sm:$0xff]   ;;  %v4819_v4 = vld [vmem:[%s6544_s3 + $0x2f0] ss:$28 sps:$4 sm:$0xff]  }
 0x14c   :  { %4187 = vmatpush3.bf16.msra.mxu1 %v4805_v38  ;;  %v4815_v2 = vld [vmem:[%s6544_s3 + $0xf8] ss:$28 sps:$4 sm:$0xff]   ;;  %v4816_v5 = vld [vmem:[%s6544_s3 + $0x828] ss:$28 sps:$4 sm:$0xff]   ;;  %v4820_v6 = vld [vmem:[%s6544_s3 + $0x130] ss:$28 sps:$4 sm:$0xff]  }
 0x14d   :  { %3434 = vmatpush1.bf16.msra.mxu0 %v4801_v58  ;;  %4188 = vmatprep.subr.bf16.mxu1 %v4809_v27  ;;  %v4823_v7 = vld [vmem:[%s6544_s3 + $0x864] ss:$28 sps:$4 sm:$0xff]   ;;  %v4828_v13 = vld [vmem:[%s6544_s3 + $0x89c] ss:$28 sps:$4 sm:$0xff]   ;;  %v4833_v17 = vld [vmem:[%s6544_s3 + $0x8d4] ss:$28 sps:$4 sm:$0xff]  }
 0x14e   :  { %3435 = vmatprep.subr.bf16.mxu0 %v4808_v59  ;;  %v4824_v8 = vld [vmem:[%s6544_s3 + $0x328] ss:$28 sps:$4 sm:$0xff]   ;;  %v4821_v9 = vld [vmem:[%s6544_s3 + $0x860] ss:$28 sps:$4 sm:$0xff]   ;;  %v4826_v15 = vld [vmem:[%s6544_s3 + $0x898] ss:$28 sps:$4 sm:$0xff]  }
 0x14f   :  { %v4825_v10 = vld [vmem:[%s6544_s3 + $0x168] ss:$28 sps:$4 sm:$0xff]   ;;  %v4829_v14 = vld [vmem:[%s6544_s3 + $0x360] ss:$28 sps:$4 sm:$0xff]   ;;  %v4834_v18 = vld [vmem:[%s6544_s3 + $0x558] ss:$28 sps:$4 sm:$0xff]  }
 0x150   :  { %4189 = vmatpush3.bf16.msra.mxu1 %v4810_v62  ;;  %v4830_v16 = vld [vmem:[%s6544_s3 + $0x1a0] ss:$28 sps:$4 sm:$0xff]   ;;  %v4831_v19 = vld [vmem:[%s6544_s3 + $0x8d0] ss:$28 sps:$4 sm:$0xff]   ;;  %v4835_v20 = vld [vmem:[%s6544_s3 + $0x398] ss:$28 sps:$4 sm:$0xff]  }
 0x151   :  { %3436 = vmatpush1.bf16.msra.mxu0 %v4806_v60  ;;  %4190 = vmatprep.subr.bf16.mxu1 %v4814_v52  ;;  %v4838_v21 = vld [vmem:[%s6544_s3 + $0x90c] ss:$28 sps:$4 sm:$0xff]   ;;  %v4843_v28 = vld [vmem:[%s6544_s3 + $0x944] ss:$28 sps:$4 sm:$0xff]   ;;  %v4848_v30 = vld [vmem:[%s6544_s3 + $0x97c] ss:$28 sps:$4 sm:$0xff]  }
 0x152   :  { %3437 = vmatprep.subr.bf16.mxu0 %v4813_v0  ;;  %v4839_v22 = vld [vmem:[%s6544_s3 + $0x590] ss:$28 sps:$4 sm:$0xff]   ;;  %v4836_v23 = vld [vmem:[%s6544_s3 + $0x908] ss:$28 sps:$4 sm:$0xff]   ;;  %v4841_v29 = vld [vmem:[%s6544_s3 + $0x940] ss:$28 sps:$4 sm:$0xff]  }
 0x153   :  { %v4840_v26 = vld [vmem:[%s6544_s3 + $0x3d0] ss:$28 sps:$4 sm:$0xff]   ;;  %v4845_v42 = vld [vmem:[%s6544_s3 + $0x408] ss:$28 sps:$4 sm:$0xff]   ;;  %v4846_v32 = vld [vmem:[%s6544_s3 + $0x978] ss:$28 sps:$4 sm:$0xff]  }
 0x154   :  { %4191 = vmatpush3.bf16.msra.mxu1 %v4815_v2  ;;  %v4850_v33 = vld [vmem:[%s6544_s3 + $0x440] ss:$28 sps:$4 sm:$0xff]   ;;  %v4853_v34 = vld [vmem:[%s6544_s3 + $0x9b4] ss:$28 sps:$4 sm:$0xff]   ;;  %v4858_v39 = vld [vmem:[%s6544_s3 + $0x9ec] ss:$28 sps:$4 sm:$0xff]  }
 0x155   :  { %3438 = vmatpush1.bf16.msra.mxu0 %v4811_v1  ;;  %4192 = vmatprep.subr.bf16.mxu1 %v4819_v4  ;;  %v4854_v56 = vld [vmem:[%s6544_s3 + $0x638] ss:$28 sps:$4 sm:$0xff]   ;;  %v4851_v35 = vld [vmem:[%s6544_s3 + $0x9b0] ss:$28 sps:$4 sm:$0xff]   ;;  %v4856_v41 = vld [vmem:[%s6544_s3 + $0x9e8] ss:$28 sps:$4 sm:$0xff]  }
 0x156   :  { %3439 = vmatprep.subr.bf16.mxu0 %v4818_v3  ;;  %v4855_v36 = vld [vmem:[%s6544_s3 + $0x478] ss:$28 sps:$4 sm:$0xff]   ;;  %v4859_v40 = vld [vmem:[%s6544_s3 + $0x670] ss:$28 sps:$4 sm:$0xff]   ;;  %v4863_v44 = vld [vmem:[%s6544_s3 + $0xa24] ss:$28 sps:$4 sm:$0xff]  }
 0x157   :  { %v4860_v43 = vld [vmem:[%s6544_s3 + $0x4b0] ss:$28 sps:$4 sm:$0xff]   ;;  %v4864_v37 = vld [vmem:[%s6544_s3 + $0x6a8] ss:$28 sps:$4 sm:$0xff]   ;;  %v4861_v53 = vld [vmem:[%s6544_s3 + $0xa20] ss:$28 sps:$4 sm:$0xff]  }
 0x158   :  { %4193 = vmatpush3.bf16.msra.mxu1 %v4820_v6  ;;  %v4865_v55 = vld [vmem:[%s6544_s3 + $0x4e8] ss:$28 sps:$4 sm:$0xff]   ;;  %v4868_v58 = vld [vmem:[%s6544_s3 + $0xa5c] ss:$28 sps:$4 sm:$0xff]   ;;  %v4873_v60 = vld [vmem:[%s6544_s3 + $0xa94] ss:$28 sps:$4 sm:$0xff]  }
 0x159   :  { %3440 = vmatpush1.bf16.msra.mxu0 %v4816_v5  ;;  %4194 = vmatprep.subr.bf16.mxu1 %v4824_v8  ;;  %v4869_v38 = vld [vmem:[%s6544_s3 + $0x6e0] ss:$28 sps:$4 sm:$0xff]   ;;  %v4866_v59 = vld [vmem:[%s6544_s3 + $0xa58] ss:$28 sps:$4 sm:$0xff]   ;;  %v4871_v0 = vld [vmem:[%s6544_s3 + $0xa90] ss:$28 sps:$4 sm:$0xff]  }
 0x15a   :  { %3441 = vmatprep.subr.bf16.mxu0 %v4823_v7  ;;  %v4870_v27 = vld [vmem:[%s6544_s3 + $0x520] ss:$28 sps:$4 sm:$0xff]   ;;  %v4874_v62 = vld [vmem:[%s6544_s3 + $0x8d8] ss:$28 sps:$4 sm:$0xff]   ;;  %v4878_v1 = vld [vmem:[%s6544_s3 + $0xacc] ss:$28 sps:$4 sm:$0xff]  }
 0x15b   :  { %v4875_v52 = vld [vmem:[%s6544_s3 + $0x718] ss:$28 sps:$4 sm:$0xff]   ;;  %v4879_v2 = vld [vmem:[%s6544_s3 + $0x910] ss:$28 sps:$4 sm:$0xff]   ;;  %v4876_v3 = vld [vmem:[%s6544_s3 + $0xac8] ss:$28 sps:$4 sm:$0xff]  }
 0x15c   :  { %4195 = vmatpush3.bf16.msra.mxu1 %v4825_v10  ;;  %v4880_v4 = vld [vmem:[%s6544_s3 + $0x750] ss:$28 sps:$4 sm:$0xff]   ;;  %v4883_v5 = vld [vmem:[%s6544_s3 + $0xb04] ss:$28 sps:$4 sm:$0xff]   ;;  %v4888_v8 = vld [vmem:[%s6544_s3 + $0xb3c] ss:$28 sps:$4 sm:$0xff]  }
 0x15d   :  { %3442 = vmatpush1.bf16.msra.mxu0 %v4821_v9  ;;  %4196 = vmatprep.subr.bf16.mxu1 %v4829_v14  ;;  %v4881_v6 = vld [vmem:[%s6544_s3 + $0xb00] ss:$28 sps:$4 sm:$0xff]   ;;  %v4885_v7 = vld [vmem:[%s6544_s3 + $0x788] ss:$28 sps:$4 sm:$0xff]   ;;  %v4886_v9 = vld [vmem:[%s6544_s3 + $0xb38] ss:$28 sps:$4 sm:$0xff]  }
 0x15e   :  { %3443 = vmatprep.subr.bf16.mxu0 %v4828_v13  ;;  %v4890_v10 = vld [vmem:[%s6544_s3 + $0x7c0] ss:$28 sps:$4 sm:$0xff]   ;;  %v4893_v13 = vld [vmem:[%s6544_s3 + $0xb74] ss:$28 sps:$4 sm:$0xff]   ;;  %vm3710_vm8 = vcmask 125952  }
 0x15f   :  { %v4894_v14 = vld [vmem:[%s6544_s3 + $0x9b8] ss:$28 sps:$4 sm:$0xff]  }
 0x160   :  { %4197 = vmatpush3.bf16.msra.mxu1 %v4830_v16  ;;  %v4891_v16 = vld [vmem:[%s6544_s3 + $0xb70] ss:$28 sps:$4 sm:$0xff]  }
 0x161   :  { %3444 = vmatpush1.bf16.msra.mxu0 %v4826_v15  ;;  %4204 = vmatprep.subr.bf16.mxu1 %v4834_v18  ;;  %v6369_v15 = vld [vmem:[%s6545_s4] sm:$0x7f] }
 0x162   :  { %3445 = vmatprep.subr.bf16.mxu0 %v4833_v17  ;;  %v4895_v17 = vld [vmem:[%s6544_s3 + $0x7f8] ss:$28 sps:$4 sm:$0xff]   ;;  %v683_v18 = vrot.slane %v6369_v15, %v5161_v48  ;;  %v4900_v48 = vld [vmem:[%s6544_s3 + $0x830] ss:$28 sps:$4 sm:$0xff]  }
 0x163   :  { %3544 = vmatmul.mubr.bf16.vlgmr.msra.gmra.mrb[8].mxu1 %v5277_v46  ;;  %v4844_v46 = vld [vmem:[%s6544_s3 + $0x5c8] ss:$28 sps:$4 sm:$0xff]  }
 0x164   :  { %4205 = vmatpush3.bf16.msra.mxu1 %v4835_v20  ;;  %3583 = vmatprep.mubr.bf16.mxu1 %v5248_v31  ;;  %v4849_v31 = vld [vmem:[%s6544_s3 + $0x600] ss:$28 sps:$4 sm:$0xff]   ;;  %v4899_v20 = vld [vmem:[%s6544_s3 + $0x9f0] ss:$28 sps:$4 sm:$0xff]  }
 0x165   :  { %3446 = vmatpush1.bf16.msra.mxu0 %v4831_v19  ;;  %4206 = vmatprep.subr.bf16.mxu1 %v4839_v22  ;;  %v4898_v19 = vld [vmem:[%s6544_s3 + $0xbac] ss:$28 sps:$4 sm:$0xff]  }
 0x166   :  { %3447 = vmatprep.subr.bf16.mxu0 %v4838_v21  ;;  %v687_v21 = vrot.slane %v6369_v15, %v5158_v47  ;;  %v4896_v22 = vld [vmem:[%s6544_s3 + $0xba8] ss:$28 sps:$4 sm:$0xff]  }
 0x167   :  { %v4904_v47 = vld [vmem:[%s6544_s3 + $0xa28] ss:$28 sps:$4 sm:$0xff]  }
 0x168   :  { %4207 = vmatpush3.bf16.msra.mxu1 %v4840_v26  ;;  %v4903_v26 = vld [vmem:[%s6544_s3 + $0xbe4] ss:$28 sps:$4 sm:$0xff]  }
 0x169   :  { %3448 = vmatpush1.bf16.msra.mxu0 %v4836_v23  ;;  %4208 = vmatprep.subr.bf16.mxu1 %v4844_v46  ;;  %v3054_v23 = vadd.f32 %v5992_v57, %v683_v18  ;;  %v4901_v57 = vld [vmem:[%s6544_s3 + $0xbe0] ss:$28 sps:$4 sm:$0xff]   ;;  %v691_v18 = vrot.slane %v6369_v15, %v5179_v54 }
 0x16a   :  { %3449 = vmatprep.subr.bf16.mxu0 %v4843_v28  ;;  %v3056_v28 = vadd.f32 %v5997_v45, %v687_v21  ;;  %v4908_v45 = vld [vmem:[%s6544_s3 + $0xc1c] ss:$28 sps:$4 sm:$0xff]  }
 0x16c   :  { %4209 = vmatpush3.bf16.msra.mxu1 %v4845_v42 }
 0x16d   :  { %3450 = vmatpush1.bf16.msra.mxu0 %v4841_v29  ;;  %4210 = vmatprep.subr.bf16.mxu1 %v4849_v31 }
 0x16e   :  { %3451 = vmatprep.subr.bf16.mxu0 %v4848_v30 }
 0x170   :  { %4211 = vmatpush3.bf16.msra.mxu1 %v4850_v33 }
 0x171   :  { %3452 = vmatpush1.bf16.msra.mxu0 %v4846_v32  ;;  %4212 = vmatprep.subr.bf16.mxu1 %v4854_v56  ;;  %v4905_v32 = vld [vmem:[%s6544_s3 + $0x868] ss:$28 sps:$4 sm:$0xff]   ;;  %v4906_v56 = vld [vmem:[%s6544_s3 + $0xc18] ss:$28 sps:$4 sm:$0xff]  }
 0x172   :  { %3453 = vmatprep.subr.bf16.mxu0 %v4853_v34  ;;  %v4909_v34 = vld [vmem:[%s6544_s3 + $0xa60] ss:$28 sps:$4 sm:$0xff]  }
 0x174   :  { %4213 = vmatpush3.bf16.msra.mxu1 %v4855_v36  ;;  %v4913_v36 = vld [vmem:[%s6544_s3 + $0xc54] ss:$28 sps:$4 sm:$0xff]  }
 0x175   :  { %3454 = vmatpush1.bf16.msra.mxu0 %v4851_v35  ;;  %4214 = vmatprep.subr.bf16.mxu1 %v4859_v40  ;;  %v4910_v35 = vld [vmem:[%s6544_s3 + $0x8a0] ss:$28 sps:$4 sm:$0xff]   ;;  %v4911_v40 = vld [vmem:[%s6544_s3 + $0xc50] ss:$28 sps:$4 sm:$0xff]  }
 0x176   :  { %3455 = vmatprep.subr.bf16.mxu0 %v4858_v39  ;;  %v4914_v39 = vld [vmem:[%s6544_s3 + $0xc58] ss:$28 sps:$4 sm:$0xff]  }
 0x178   :  { %4215 = vmatpush3.bf16.msra.mxu1 %v4860_v43  ;;  %v4918_v43 = vld [vmem:[%s6544_s3 + $0xc8c] ss:$28 sps:$4 sm:$0xff]  }
 0x179   :  { %3456 = vmatpush1.bf16.msra.mxu0 %v4856_v41  ;;  %4216 = vmatprep.subr.bf16.mxu1 %v4864_v37  ;;  %v4915_v41 = vld [vmem:[%s6544_s3 + $0xa98] ss:$28 sps:$4 sm:$0xff]  }
 0x17a   :  { %3457 = vmatprep.subr.bf16.mxu0 %v4863_v44  ;;  %v4919_v44 = vld [vmem:[%s6544_s3 + $0xc90] ss:$28 sps:$4 sm:$0xff]  }
 0x17c   :  { %4217 = vmatpush3.bf16.msra.mxu1 %v4865_v55  ;;  %v4916_v55 = vld [vmem:[%s6544_s3 + $0xc88] ss:$28 sps:$4 sm:$0xff]  }
 0x17d   :  { %3458 = vmatpush1.bf16.msra.mxu0 %v4861_v53  ;;  %4218 = vmatprep.subr.bf16.mxu1 %v4869_v38  ;;  %v4923_v38 = vld [vmem:[%s6544_s3 + $0xcc4] ss:$28 sps:$4 sm:$0xff]  }
 0x17e   :  { %3459 = vmatprep.subr.bf16.mxu0 %v4868_v58  ;;  %v4920_v58 = vld [vmem:[%s6544_s3 + $0xad0] ss:$28 sps:$4 sm:$0xff]  }
 0x180   :  { %4219 = vmatpush3.bf16.msra.mxu1 %v4870_v27  ;;  %v4921_v27 = vld [vmem:[%s6544_s3 + $0xcc0] ss:$28 sps:$4 sm:$0xff]  }
 0x181   :  { %3460 = vmatpush1.bf16.msra.mxu0 %v4866_v59  ;;  %4226 = vmatprep.subr.bf16.mxu1 %v4874_v62  ;;  %v4928_v62 = vld [vmem:[%s6544_s3 + $0xcfc] ss:$28 sps:$4 sm:$0xff]  }
 0x182   :  { %3470 = vmatprep.subr.bf16.mxu0 %v4873_v60  ;;  %v4925_v60 = vld [vmem:[%s6544_s3 + $0xb08] ss:$28 sps:$4 sm:$0xff]  }
 0x183   :  { %3584 = vmatmul.mubr.bf16.vlgmr.msra.gmra.mrb[12].mxu1 %v5282_v51  ;;  %v4884_v51 = vld [vmem:[%s6544_s3 + $0x948] ss:$28 sps:$4 sm:$0xff]  }
 0x184   :  { %3462 = vmatmul.mubr.bf16.vlgmr.msra.gmra.mrb[4].mxu0 %v5504_v24  ;;  %4227 = vmatpush3.bf16.msra.mxu1 %v4875_v52  ;;  %v4930_v52 = vld [vmem:[%s6544_s3 + $0xb40] ss:$28 sps:$4 sm:$0xff]  }
 0x185   :  { %3471 = vmatpush1.bf16.msra.mxu0 %v4871_v0  ;;  %4228 = vmatprep.subr.bf16.mxu1 %v4879_v2  ;;  %v4926_v0 = vld [vmem:[%s6544_s3 + $0xcf8] ss:$28 sps:$4 sm:$0xff]  }
 0x186   :  { %3472 = vmatprep.subr.bf16.mxu0 %v4878_v1  ;;  %3623 = vmatprep.mubr.bf16.mxu1 %v5411_v49  ;;  %v4889_v49 = vld [vmem:[%s6544_s3 + $0x980] ss:$28 sps:$4 sm:$0xff]   ;;  %v4933_v1 = vld [vmem:[%s6544_s3 + $0xd34] ss:$28 sps:$4 sm:$0xff]  }
 0x187   :  { %3502 = vmatprep.mubr.bf16.mxu0 %v5568_v61  ;;  %v4934_v2 = vld [vmem:[%s6544_s3 + $0xd38] ss:$28 sps:$4 sm:$0xff]  }
 0x188   :  { %4229 = vmatpush3.bf16.msra.mxu1 %v4880_v4  ;;  %v4935_v4 = vld [vmem:[%s6544_s3 + $0xb78] ss:$28 sps:$4 sm:$0xff]  }
 0x189   :  { %3473 = vmatpush1.bf16.msra.mxu0 %v4876_v3  ;;  %4230 = vmatprep.subr.bf16.mxu1 %v4884_v51  ;;  %v4931_v3 = vld [vmem:[%s6544_s3 + $0xd30] ss:$28 sps:$4 sm:$0xff]  }
 0x18a   :  { %3474 = vmatprep.subr.bf16.mxu0 %v4883_v5  ;;  %v4938_v5 = vld [vmem:[%s6544_s3 + $0xd6c] ss:$28 sps:$4 sm:$0xff]  }
 0x18b   :  { %v4939_v51 = vld [vmem:[%s6544_s3 + $0xd70] ss:$28 sps:$4 sm:$0xff]  }
 0x18c   :  { %4231 = vmatpush3.bf16.msra.mxu1 %v4885_v7  ;;  %v4940_v7 = vld [vmem:[%s6544_s3 + $0xbb0] ss:$28 sps:$4 sm:$0xff]  }
 0x18d   :  { %3475 = vmatpush1.bf16.msra.mxu0 %v4881_v6  ;;  %4232 = vmatprep.subr.bf16.mxu1 %v4889_v49  ;;  %v4936_v6 = vld [vmem:[%s6544_s3 + $0xd68] ss:$28 sps:$4 sm:$0xff]  }
 0x18e   :  { %3476 = vmatprep.subr.bf16.mxu0 %v4888_v8  ;;  %v4943_v8 = vld [vmem:[%s6544_s3 + $0xda4] ss:$28 sps:$4 sm:$0xff]  }
 0x18f   :  { %v4944_v49 = vld [vmem:[%s6544_s3 + $0xda8] ss:$28 sps:$4 sm:$0xff]  }
 0x190   :  { %4233 = vmatpush3.bf16.msra.mxu1 %v4890_v10  ;;  %v4945_v10 = vld [vmem:[%s6544_s3 + $0xbe8] ss:$28 sps:$4 sm:$0xff]  }
 0x191   :  { %3477 = vmatpush1.bf16.msra.mxu0 %v4886_v9  ;;  %4234 = vmatprep.subr.bf16.mxu1 %v4894_v14  ;;  %v4941_v9 = vld [vmem:[%s6544_s3 + $0xda0] ss:$28 sps:$4 sm:$0xff]  }
 0x192   :  { %3478 = vmatprep.subr.bf16.mxu0 %v4893_v13  ;;  %v4948_v13 = vld [vmem:[%s6544_s3 + $0xddc] ss:$28 sps:$4 sm:$0xff]  }
 0x193   :  { %v4949_v14 = vld [vmem:[%s6544_s3 + $0xde0] ss:$28 sps:$4 sm:$0xff]  }
 0x194   :  { %4235 = vmatpush3.bf16.msra.mxu1 %v4895_v17  ;;  %v4950_v17 = vld [vmem:[%s6544_s3 + $0xc20] ss:$28 sps:$4 sm:$0xff]  }
 0x195   :  { %3479 = vmatpush1.bf16.msra.mxu0 %v4891_v16  ;;  %4236 = vmatprep.subr.bf16.mxu1 %v4899_v20  ;;  %v4946_v16 = vld [vmem:[%s6544_s3 + $0xdd8] ss:$28 sps:$4 sm:$0xff]  }
 0x196   :  { %3480 = vmatprep.subr.bf16.mxu0 %v4898_v19  ;;  %v695_v19 = vrot.slane %v6369_v15, %v5167_v50  ;;  %v707_v50 = vrot.slane %v6369_v15, %v5507_v25 }
 0x197   :  { %v3176_v46 = vpop.f32.mrb[0].mxu0 }
 0x198   :  { %v4271_v29 = vadd.f32 %v3176_v46, %v3054_v23  ;;  %v3178_v42 = vpop.f32.mrb[1].mxu0  ;;  %4237 = vmatpush3.bf16.msra.mxu1 %v4900_v48 }
 0x199   :  { %v4273_v30 = vadd.f32 %v3178_v42, %v3056_v28  ;;  %v3180_v31 = vpop.f32.mrb[2].mxu0  ;;  %3481 = vmatpush1.bf16.msra.mxu0 %v4896_v22  ;;  %4238 = vmatprep.subr.bf16.mxu1 %v4904_v47 }
 0x19a   :  { %4951 = vtanh.f32 %v4271_v29  ;;  %v3181_v33 = vpop.f32.mrb[3].mxu0  ;;  %3482 = vmatprep.subr.bf16.mxu0 %v4903_v26 }
 0x19b   :  { %4953 = vtanh.f32 %v4273_v30 }
 0x19c   :  { %4239 = vmatpush3.bf16.msra.mxu1 %v4905_v32 }
 0x19d   :  { %3483 = vmatpush1.bf16.msra.mxu0 %v4901_v57  ;;  %4240 = vmatprep.subr.bf16.mxu1 %v4909_v34 }
 0x19e   :  { %3484 = vmatprep.subr.bf16.mxu0 %v4908_v45 }
 0x1a0   :  { %4241 = vmatpush3.bf16.msra.mxu1 %v4910_v35 }
 0x1a1   :  { %3485 = vmatpush1.bf16.msra.mxu0 %v4906_v56  ;;  %4248 = vmatprep.subr.bf16.mxu1 %v4914_v39 }
 0x1a2   :  { %3486 = vmatprep.subr.bf16.mxu0 %v4913_v36 }
 0x1a3   :  { %3624 = vmatmul.mubr.bf16.vlgmr.msra.gmra.mrb[16].mxu1 %v5504_v24  ;;  %v4924_v24 = vld [vmem:[%s6544_s3 + $0xcc8] ss:$28 sps:$4 sm:$0xff]  }
 0x1a4   :  { %v4952_v37 = vpop.eup %4951  ;;  %4249 = vmatpush3.bf16.msra.mxu1 %v4915_v41  ;;  %3663 = vmatprep.mubr.bf16.mxu1 %v5568_v61  ;;  %v4929_v61 = vld [vmem:[%s6544_s3 + $0xd00] ss:$28 sps:$4 sm:$0xff]   ;;  %s4989_s3 = smov [#allocation2]  }
 0x1a5   :  { %v4954_v53 = vpop.eup %4953  ;;  %3487 = vmatpush1.bf16.msra.mxu0 %v4911_v40  ;;  %4250 = vmatprep.subr.bf16.mxu1 %v4919_v44  ;;  %v699_v44 = vrot.slane %v6369_v15, %v5351_v12  ;;  %s3718_s19 = sshll.u32 %s4989_s3, 4  ;;  %s3719_s19 = int_to_ptr.vmem [resolvable:$true] %s3718_s19 }
 0x1a6   :  { %3488 = vmatprep.subr.bf16.mxu0 %v4918_v43  ;;  %v4178_v59 = vpack.c.bf16 %v4954_v53, %v4952_v37  ;;  %v703_v37 = vrot.slane %v6369_v15, %v5348_v11  ;;  %s4965_s4 = scalar_lea.vmem %s3719_s19, 448  ;;  %p4970_p1 = scmp.lt.s32.totalorder %s3719_s19, %s3719_s19 }
 0x1a7   :  { %p4966_p0 = scmp.ne.s32.totalorder %s3719_s19, %s4965_s4  ;;  %p4971_p2 = scmp.lt.s32.totalorder %s4965_s4, %s4965_s4 }
 0x1a8   :  { %3707 = vst [vmem:[#allocation2] sm:$0xff] %v4178_v59  ;;  %4251 = vmatpush3.bf16.msra.mxu1 %v4920_v58 }
 0x1a9   :  { %3489 = vmatpush1.bf16.msra.mxu0 %v4916_v55  ;;  %4252 = vmatprep.subr.bf16.mxu1 %v4924_v24  ;;  %p4972_p3 = por %p4971_p2, %p4970_p1 }
 0x1aa   :  { %3490 = vmatprep.subr.bf16.mxu0 %v4923_v38 }
 0x1ab   :  { %p4973_p4 = pnand %p4972_p3, %p4966_p0 }
 0x1ac   :  { %4253 = vmatpush3.bf16.msra.mxu1 %v4925_v60 }
 0x1ad   :  { %3491 = vmatpush1.bf16.msra.mxu0 %v4921_v27  ;;  %4254 = vmatprep.subr.bf16.mxu1 %v4929_v61 }
 0x1ae   :  { %3492 = vmatprep.subr.bf16.mxu0 %v4928_v62 }
 0x1b0   :  { %4255 = vmatpush3.bf16.msra.mxu1 %v4930_v52 }
 0x1b1   :  { %3493 = vmatpush1.bf16.msra.mxu0 %v4926_v0  ;;  %4256 = vmatprep.subr.bf16.mxu1 %v4934_v2 }
 0x1b2   :  { %3494 = vmatprep.subr.bf16.mxu0 %v4933_v1 }
 0x1b4   :  { %4257 = vmatpush3.bf16.msra.mxu1 %v4935_v4 }
 0x1b5   :  { %3495 = vmatpush1.bf16.msra.mxu0 %v4931_v3  ;;  %4258 = vmatprep.subr.bf16.mxu1 %v4939_v51 }
 0x1b6   :  { %3496 = vmatprep.subr.bf16.mxu0 %v4938_v5 }
 0x1b8   :  { %4259 = vmatpush3.bf16.msra.mxu1 %v4940_v7 }
 0x1b9   :  { %3497 = vmatpush1.bf16.msra.mxu0 %v4936_v6  ;;  %4260 = vmatprep.subr.bf16.mxu1 %v4944_v49 }
 0x1ba   :  { %3498 = vmatprep.subr.bf16.mxu0 %v4943_v8 }
 0x1bc   :  { %4261 = vmatpush3.bf16.msra.mxu1 %v4945_v10 }
 0x1bd   :  { %3499 = vmatpush1.bf16.msra.mxu0 %v4941_v9  ;;  %4262 = vmatprep.subr.bf16.mxu1 %v4949_v14 }
 0x1be   :  { %3500 = vmatprep.subr.bf16.mxu0 %v4948_v13 }
 0x1c0   :  { %4263 = vmatpush3.bf16.msra.mxu1 %v4950_v17 }
 0x1c1   :  { %3501 = vmatpush1.bf16.msra.mxu0 %v4946_v16 }
 0x1c3   :  { %3664 = vmatmul.mubr.bf16.vlgmr.msra.gmra.mrb[20].mxu1 %v5718_v63 }
 0x1c4   :  { %3503 = vmatmul.mubr.bf16.vlgmr.msra.gmra.mrb[4].mxu0 %v5718_v63 }
 0x216   :  { %v3340_v20 = vpop.f32.mrb[4].mxu1 }
 0x217   :  { %v4274_v21 = vadd.f32 %v3340_v20, %v691_v18  ;;  %v3342_v22 = vpop.f32.mrb[5].mxu1 }
 0x218   :  { %v4275_v48 = vadd.f32 %v3342_v22, %v695_v19  ;;  %v3344_v23 = vpop.f32.mrb[6].mxu1 }
 0x219   :  { %4955 = vtanh.f32 %v4274_v21  ;;  %v3345_v26 = vpop.f32.mrb[7].mxu1 }
 0x21a   :  { %4957 = vtanh.f32 %v4275_v48 }
 0x223   :  { %v4956_v47 = vpop.eup %4955 }
 0x224   :  { %v4958_v28 = vpop.eup %4957 }
 0x225   :  { %v4179_v46 = vpack.c.bf16 %v4958_v28, %v4956_v47 }
 0x227   :  { %3708 = vst [vmem:[#allocation2 + $0x8] sm:$0xff] %v4179_v46 }
 0x236   :  { %v4198_v29 = vpop.f32.mrb[8].mxu1 }
 0x237   :  { %v4199_v63 = vpop.f32.mrb[9].mxu1 }
 0x238   :  { %v4200_v42 = vadd.f32 %v4199_v63, %v4198_v29  ;;  %v4201_v30 = vpop.f32.mrb[10].mxu1 }
 0x239   :  { %v4202_v54 = vpop.f32.mrb[11].mxu1 }
 0x23a   :  { %v3546_v32 = vadd.f32 %v4200_v42, %v707_v50 }
 0x256   :  { %v4220_v31 = vpop.f32.mrb[12].mxu1 }
 0x257   :  { %v4221_v57 = vpop.f32.mrb[13].mxu1 }
 0x258   :  { %v4222_v33 = vadd.f32 %v4221_v57, %v4220_v31  ;;  %v4223_v45 = vpop.f32.mrb[14].mxu1 }
 0x259   :  { %v4224_v34 = vpop.f32.mrb[15].mxu1 }
 0x25a   :  { %v3586_v56 = vadd.f32 %v4222_v33, %v3546_v32 }
 0x276   :  { %v4242_v35 = vpop.f32.mrb[16].mxu1 }
 0x277   :  { %v4243_v36 = vpop.f32.mrb[17].mxu1 }
 0x278   :  { %v4244_v39 = vadd.f32 %v4243_v36, %v4242_v35  ;;  %v4245_v40 = vpop.f32.mrb[18].mxu1 }
 0x279   :  { %v4246_v41 = vpop.f32.mrb[19].mxu1 }
 0x27a   :  { %v3626_v43 = vadd.f32 %v4244_v39, %v3586_v56 }
 0x296   :  { %v4264_v53 = vpop.f32.mrb[20].mxu1 }
 0x297   :  { %v3504_v25 = vpop.f32.mrb[4].mxu0  ;;  %v4265_v38 = vpop.f32.mrb[21].mxu1 }
 0x298   :  { %v4276_v55 = vadd.f32 %v3504_v25, %v699_v44  ;;  %v3506_v58 = vpop.f32.mrb[5].mxu0  ;;  %v4266_v59 = vadd.f32 %v4265_v38, %v4264_v53  ;;  %v4267_v60 = vpop.f32.mrb[22].mxu1 }
 0x299   :  { %v4277_v24 = vadd.f32 %v3506_v58, %v703_v37  ;;  %v3508_v27 = vpop.f32.mrb[6].mxu0  ;;  %v4268_v61 = vpop.f32.mrb[23].mxu1 }
 0x29a   :  { %4959 = vtanh.f32 %v4276_v55  ;;  %v3509_v62 = vpop.f32.mrb[7].mxu0  ;;  %v3666_v0 = vadd.f32 %v4266_v59, %v3626_v43 }
 0x29b   :  { %4961 = vtanh.f32 %v4277_v24 }
 0x29c   :  { %4963 = vtanh.f32 %v3666_v0 }
 0x2a4   :  { %v4960_v52 = vpop.eup %4959 }
 0x2a5   :  { %v4962_v12 = vpop.eup %4961 }
 0x2a6   :  { %v4180_v11 = vpack.c.bf16 %v4962_v12, %v4960_v52  ;;  %v4964_v15 = vpop.eup %4963 }
 0x2a7   :  { %v4181_v1 = vpack.c.bf16 %v4964_v15, %v4964_v15 }
 0x2a8   :  { %3709 = vst [vmem:[#allocation2 + $0x10] sm:$0xff] %v4180_v11 }
 0x2a9   :  { %3711 = vst.msk [vmem:[#allocation2 + $0x18] sm:$0xf] %vm3710_vm8, %v4181_v1 }
 0x2aa   :  { %4976 = shalt.err (!%p4973_p4)
}
 0x2ab   :  { %s4977_s22 = scalar_lea.hbm %s6546_s5, 448 }
 0x2ac   :  { %p4978_p5 = scmp.ne.s32.totalorder %s6546_s5, %s4977_s22  ;;  %p4981_p6 = scmp.lt.u32.totalorder %s4977_s22, %s6546_s5 }
 0x2ae   :  { %p4983_p7 = pnand %p4981_p6, %p4978_p5 }
 0x2b0   :  { %4986 = shalt.err (!%p4983_p7)
}
 0x2b1   :  { %3721 = dma.vmem_to_hbm [thread:$0]  %s3719_s19, 448, %s6546_s5, [#allocation3]  }
 0x2b2   :  { %4987 = dma.done.wait [#allocation3], 448  }
 0x2b3   :  { %4988 = vsyncadd [#allocation3], 4294966848 }
 0x2b4   :  { %3725 = vsyncpa [#allocation3], 1 }

</bundles_post_ra>
